<compile_context>
chip_gen: v6e
topology: v6e:2x2x1
jax: 0.10.0
libtpu: 0.0.40
codegen_flags: <defaults>
</compile_context>

<pallas_src>
import jax
import jax.numpy as jnp
from jax.experimental import pallas as pl
from jax.experimental.pallas import tpu as pltpu


def _resblock_kernel(x_ref, w1_ref, b1_ref, w2_ref, b2_ref, out_ref,
                     xpad_ref, hpad_ref):
    # x_ref   : (Nb, H, W*Cin)          f32 lane-dense rows (also the residual)
    # w1_ref  : (3, (W+2)*Cin, W*Cmid)  banded conv1 weights (one slab per dy)
    # b1_ref  : (1, W*Cmid)             f32 bias tiled over pixels
    # w2_ref  : (3, (W+2)*Cmid, W*Cout) banded conv2 weights
    # b2_ref  : (1, W*Cout)
    # out_ref : (Nb, H, W*Cout)
    # xpad_ref: (Nb, H+2, (W+2)*Cin)    matmul-dtype scratch (padded input rows)
    # hpad_ref: (Nb, H+2, (W+2)*Cmid)   matmul-dtype scratch (padded conv1 rows)
    nb, H, wc_in = x_ref.shape
    wc_mid = b1_ref.shape[1]
    wc_out = b2_ref.shape[1]
    k_in = xpad_ref.shape[2]
    k_mid = hpad_ref.shape[2]
    dt = xpad_ref.dtype

    # Cheap per-step halo refresh: top/bottom rows plus the trailing 2*C halo
    # lanes; interiors are fully overwritten below.  Per-step (not
    # program_id==0 gated) so megacore sharding stays correct.
    xpad_ref[:, 0:1, :] = jnp.zeros((nb, 1, k_in), dt)
    xpad_ref[:, H + 1:H + 2, :] = jnp.zeros((nb, 1, k_in), dt)
    xpad_ref[:, :, wc_in:] = jnp.zeros((nb, H + 2, k_in - wc_in), dt)
    hpad_ref[:, 0:1, :] = jnp.zeros((nb, 1, k_mid), dt)
    hpad_ref[:, H + 1:H + 2, :] = jnp.zeros((nb, 1, k_mid), dt)
    hpad_ref[:, :, wc_mid:] = jnp.zeros((nb, H + 2, k_mid - wc_mid), dt)

    # Load x once; reused for conv1 input (cast once) and the f32 residual.
    x = x_ref[...]                                        # (Nb, H, W*Cin) f32
    xpad_ref[:, 1:H + 1, :wc_in] = x.astype(dt)           # aligned 512-lane write

    def conv3x3(pad_ref, w_ref):
        # sum_dy  pad[:, dy:dy+H, :] @ w[dy];  K=(W+2)*C, Ncols=W*Cout,
        # M=Nb*H; f32 accumulation on the MXU.
        acc = jnp.dot(pad_ref[:, 0:H, :].reshape(nb * H, -1), w_ref[0],
                      preferred_element_type=jnp.float32)
        acc += jnp.dot(pad_ref[:, 1:H + 1, :].reshape(nb * H, -1), w_ref[1],
                       preferred_element_type=jnp.float32)
        acc += jnp.dot(pad_ref[:, 2:H + 2, :].reshape(nb * H, -1), w_ref[2],
                       preferred_element_type=jnp.float32)
        return acc                                        # (Nb*H, W*Cout) f32

    # ---- conv1 + bias + ReLU ----
    h = jnp.maximum(conv3x3(xpad_ref, w1_ref) + b1_ref[...], 0.0)
    hpad_ref[:, 1:H + 1, :wc_mid] = h.reshape(nb, H, wc_mid).astype(dt)

    # ---- conv2 + bias + residual (same lane layout as y: pure VPU add) ----
    y = conv3x3(hpad_ref, w2_ref) + b2_ref[...]
    y = y + x.reshape(nb * H, wc_out)
    out_ref[...] = y.reshape(nb, H, wc_out).astype(out_ref.dtype)


def _banded_weights(w_oihw, W):
    """OIHW (Cout, Cin, 3, 3) -> (3, (W+2)*Cin, W*Cout) banded matmul weights.

    Row r = s*Cin + ci of slab dy corresponds to channel ci of padded column
    position perm[s] (storage order [interior x=0..W-1, left halo, right
    halo]); column x*Cout + co is output pixel x, channel co.  The entry is
    w[co, ci, dy, dx] when perm[s] == x + dx (dx in 0..2), else 0 -- the dx
    taps and the channel contraction are folded into one K dimension so the
    kernel needs no im2col.
    """
    cout, cin, kh, kw = w_oihw.shape
    w_hwio = jnp.transpose(w_oihw, (2, 3, 1, 0))          # (3, 3, Cin, Cout)
    xp = jnp.arange(W + 2)
    x = jnp.arange(W)
    dx = jnp.arange(kw)
    # sel[dx, xp, x] = 1 where padded column xp is tap dx of output pixel x
    sel = (xp[None, :, None] == x[None, None, :] + dx[:, None, None]
           ).astype(w_hwio.dtype)
    # band[dy, xp, ci, x, co] = w_hwio[dy, xp - x, ci, co]  (0 outside the band)
    band = jnp.einsum('dpx,ydio->ypixo', sel, w_hwio)
    # Padded-column storage order: interior first (so the kernel's interior
    # write is lane-aligned), both halo columns in the trailing 2*Cin lanes.
    perm = jnp.concatenate([jnp.arange(1, W + 1), jnp.array([0, W + 1])])
    band = band[:, perm]
    return band.reshape(kh, (W + 2) * cin, W * cout)


def _pick_block_n(n, max_block=8):
    """Largest divisor of n <= max_block, preferring a grid of >= 2 steps."""
    divisors = [d for d in range(1, min(n, max_block) + 1) if n % d == 0]
    nb = divisors[-1]
    if n // nb < 2:                     # keep both v7x TensorCores busy
        two_step = [d for d in divisors if n // d >= 2]
        if two_step:
            nb = two_step[-1]
    return nb


def resblock(x_nchw, w1_oihw, b1, w2_oihw, b2, *,
             matmul_dtype=jnp.bfloat16, block_n=None):
    """Fused ResBlock forward: y = x + conv2(relu(conv1(x))).

    x_nchw : (N, Cin, H, W) float32 (PyTorch layout)
    w1_oihw: (Cin, Cin, 3, 3),  b1: (Cin,)
    w2_oihw: (Cout, Cin, 3, 3), b2: (Cout,)
    matmul_dtype: bf16 (production; recommended on v5e) or f32 (validation).
    """
    N, Cin, H, W = x_nchw.shape
    Cmid = w1_oihw.shape[0]
    Cout = w2_oihw.shape[0]
    assert w1_oihw.shape == (Cmid, Cin, 3, 3)
    assert w2_oihw.shape == (Cout, Cmid, 3, 3)
    assert Cin == Cout, "residual add requires in_planes == out_planes"

    nb = _pick_block_n(N) if block_n is None else block_n
    assert N % nb == 0, "block_n must divide N"

    # XLA-side prep (tiny, outside the kernel).
    x_rows = jnp.transpose(x_nchw, (0, 2, 3, 1)).reshape(N, H, W * Cin)
    w1m = _banded_weights(w1_oihw, W).astype(matmul_dtype)
    w2m = _banded_weights(w2_oihw, W).astype(matmul_dtype)
    b1r = jnp.tile(b1.astype(jnp.float32), W)[None, :]     # (1, W*Cmid)
    b2r = jnp.tile(b2.astype(jnp.float32), W)[None, :]     # (1, W*Cout)

    out_rows = pl.pallas_call(
        _resblock_kernel,
        out_shape=jax.ShapeDtypeStruct((N, H, W * Cout), x_nchw.dtype),
        grid_spec=pltpu.PrefetchScalarGridSpec(
            num_scalar_prefetch=0,
            grid=(N // nb,),
            in_specs=[
                pl.BlockSpec((nb, H, W * Cin), lambda n: (n, 0, 0)),
                pl.BlockSpec((3, (W + 2) * Cin, W * Cmid), lambda n: (0, 0, 0)),
                pl.BlockSpec((1, W * Cmid), lambda n: (0, 0)),
                pl.BlockSpec((3, (W + 2) * Cmid, W * Cout), lambda n: (0, 0, 0)),
                pl.BlockSpec((1, W * Cout), lambda n: (0, 0)),
            ],
            out_specs=pl.BlockSpec((nb, H, W * Cout), lambda n: (n, 0, 0)),
            scratch_shapes=[
                pltpu.VMEM((nb, H + 2, (W + 2) * Cin), matmul_dtype),
                pltpu.VMEM((nb, H + 2, (W + 2) * Cmid), matmul_dtype),
            ],
        ),
        compiler_params=pltpu.CompilerParams(
            dimension_semantics=("parallel",),
            vmem_limit_bytes=32 * 1024 * 1024),
    )(x_rows, w1m, b1r, w2m, b2r)

    # Lane-dense rows -> NCHW (cheap XLA reshuffle at these sizes).
    return jnp.transpose(out_rows.reshape(N, H, W, Cout), (0, 3, 1, 2))


def _reference(x_nchw, w1_oihw, b1, w2_oihw, b2):
    dn = ("NCHW", "OIHW", "NCHW")
    h = jax.lax.conv_general_dilated(x_nchw, w1_oihw, (1, 1), "SAME",
                                     dimension_numbers=dn)
    h = jnp.maximum(h + b1[None, :, None, None], 0.0)
    y = jax.lax.conv_general_dilated(h, w2_oihw, (1, 1), "SAME",
                                     dimension_numbers=dn)
    y = y + b2[None, :, None, None]
    return x_nchw + y


if __name__ == "__main__":
    N, C, H, W = 2, 32, 16, 16   # module defaults: in_planes = out_planes = 32

    key = jax.random.PRNGKey(0)
    k_x, k_w1, k_b1, k_w2, k_b2 = jax.random.split(key, 5)

    x = jax.random.normal(k_x, (N, C, H, W), jnp.float32)
    w1 = jax.random.normal(k_w1, (C, C, 3, 3), jnp.float32) * 0.05
    b1 = jax.random.normal(k_b1, (C,), jnp.float32) * 0.05
    w2 = jax.random.normal(k_w2, (C, C, 3, 3), jnp.float32) * 0.05
    b2 = jax.random.normal(k_b2, (C,), jnp.float32) * 0.05

    ref = _reference(x, w1, b1, w2, b2)

    # Production path: bf16 MXU inputs, f32 accumulation.
    out_fast = jax.block_until_ready(resblock(x, w1, b1, w2, b2))
    assert out_fast.shape == (N, C, H, W)
    assert jnp.max(jnp.abs(out_fast - ref)) < 3e-2, "bf16 path mismatch"

    # Exact-precision validation path: f32 matmuls, tight tolerance.
    out_f32 = jax.block_until_ready(
        resblock(x, w1, b1, w2, b2, matmul_dtype=jnp.float32))
    assert out_f32.shape == (N, C, H, W)
    assert jnp.max(jnp.abs(out_f32 - ref)) < 1e-3, "f32 path mismatch"

    print("KERNEL_OK")
</pallas_src>

<mosaic_0001>
module attributes {stable_mosaic.version = 11 : i64} {
  func.func @_resblock_kernel(%arg0: i32, %arg1: memref<1x16x512xf32, #tpu.memory_space<vmem>>, %arg2: memref<3x576x512xbf16, #tpu.memory_space<vmem>>, %arg3: memref<1x512xf32, #tpu.memory_space<vmem>>, %arg4: memref<3x576x512xbf16, #tpu.memory_space<vmem>>, %arg5: memref<1x512xf32, #tpu.memory_space<vmem>>, %arg6: memref<1x16x512xf32, #tpu.memory_space<vmem>>, %arg7: memref<1x18x576xbf16, #tpu.memory_space<vmem>>, %arg8: memref<1x18x576xbf16, #tpu.memory_space<vmem>>) attributes {dimension_semantics = [#tpu.dimension_semantics<parallel>], iteration_bounds = array<i64: 2>, scalar_prefetch = 0 : i64, scratch_operands = 2 : i64, tpu.core_type = #tpu.core_type<tc>, window_params = [{transform_indices = @transform_0, window_bounds = array<i64: 1, 16, 512>}, {pipeline_mode = #tpu.pipeline_mode<synchronous>, transform_indices = @transform_1, window_bounds = array<i64: 3, 576, 512>}, {pipeline_mode = #tpu.pipeline_mode<synchronous>, transform_indices = @transform_2, window_bounds = array<i64: 1, 512>}, {pipeline_mode = #tpu.pipeline_mode<synchronous>, transform_indices = @transform_3, window_bounds = array<i64: 3, 576, 512>}, {pipeline_mode = #tpu.pipeline_mode<synchronous>, transform_indices = @transform_4, window_bounds = array<i64: 1, 512>}, {transform_indices = @transform_5, window_bounds = array<i64: 1, 16, 512>}]} {
    %cst = arith.constant 0.000000e+00 : bf16
    %0 = vector.broadcast %cst : bf16 to vector<1x1x576xbf16>
    %c0 = arith.constant 0 : index
    %c0_0 = arith.constant 0 : index
    %c0_1 = arith.constant 0 : index
    %1 = vector.load %arg7[%c0, %c0_0, %c0_1] : memref<1x18x576xbf16, #tpu.memory_space<vmem>>, vector<1x1x576xbf16>
    tpu.vector_store %arg7[%c0, %c0_0, %c0_1], %0 {strides = array<i32>} : memref<1x18x576xbf16, #tpu.memory_space<vmem>>, vector<1x1x576xbf16>,
    %cst_2 = arith.constant 0.000000e+00 : bf16
    %2 = vector.broadcast %cst_2 : bf16 to vector<1x1x576xbf16>
    %c0_3 = arith.constant 0 : index
    %c17 = arith.constant 17 : index
    %c0_4 = arith.constant 0 : index
    %3 = vector.load %arg7[%c0_3, %c17, %c0_4] : memref<1x18x576xbf16, #tpu.memory_space<vmem>>, vector<1x1x576xbf16>
    tpu.vector_store %arg7[%c0_3, %c17, %c0_4], %2 {strides = array<i32>} : memref<1x18x576xbf16, #tpu.memory_space<vmem>>, vector<1x1x576xbf16>,
    %cst_5 = arith.constant 0.000000e+00 : bf16
    %4 = vector.broadcast %cst_5 : bf16 to vector<1x18x64xbf16>
    %c0_6 = arith.constant 0 : index
    %c0_7 = arith.constant 0 : index
    %c512 = arith.constant 512 : index
    %5 = vector.load %arg7[%c0_6, %c0_7, %c512] : memref<1x18x576xbf16, #tpu.memory_space<vmem>>, vector<1x18x64xbf16>
    tpu.vector_store %arg7[%c0_6, %c0_7, %c512], %4 {strides = array<i32>} : memref<1x18x576xbf16, #tpu.memory_space<vmem>>, vector<1x18x64xbf16>,
    %cst_8 = arith.constant 0.000000e+00 : bf16
    %6 = vector.broadcast %cst_8 : bf16 to vector<1x1x576xbf16>
    %c0_9 = arith.constant 0 : index
    %c0_10 = arith.constant 0 : index
    %c0_11 = arith.constant 0 : index
    %7 = vector.load %arg8[%c0_9, %c0_10, %c0_11] : memref<1x18x576xbf16, #tpu.memory_space<vmem>>, vector<1x1x576xbf16>
    tpu.vector_store %arg8[%c0_9, %c0_10, %c0_11], %6 {strides = array<i32>} : memref<1x18x576xbf16, #tpu.memory_space<vmem>>, vector<1x1x576xbf16>,
    %cst_12 = arith.constant 0.000000e+00 : bf16
    %8 = vector.broadcast %cst_12 : bf16 to vector<1x1x576xbf16>
    %c0_13 = arith.constant 0 : index
    %c17_14 = arith.constant 17 : index
    %c0_15 = arith.constant 0 : index
    %9 = vector.load %arg8[%c0_13, %c17_14, %c0_15] : memref<1x18x576xbf16, #tpu.memory_space<vmem>>, vector<1x1x576xbf16>
    tpu.vector_store %arg8[%c0_13, %c17_14, %c0_15], %8 {strides = array<i32>} : memref<1x18x576xbf16, #tpu.memory_space<vmem>>, vector<1x1x576xbf16>,
    %cst_16 = arith.constant 0.000000e+00 : bf16
    %10 = vector.broadcast %cst_16 : bf16 to vector<1x18x64xbf16>
    %c0_17 = arith.constant 0 : index
    %c0_18 = arith.constant 0 : index
    %c512_19 = arith.constant 512 : index
    %11 = vector.load %arg8[%c0_17, %c0_18, %c512_19] : memref<1x18x576xbf16, #tpu.memory_space<vmem>>, vector<1x18x64xbf16>
    tpu.vector_store %arg8[%c0_17, %c0_18, %c512_19], %10 {strides = array<i32>} : memref<1x18x576xbf16, #tpu.memory_space<vmem>>, vector<1x18x64xbf16>,
    %c0_20 = arith.constant 0 : index
    %c0_21 = arith.constant 0 : index
    %c0_22 = arith.constant 0 : index
    %12 = vector.load %arg1[%c0_20, %c0_21, %c0_22] : memref<1x16x512xf32, #tpu.memory_space<vmem>>, vector<1x16x512xf32>
    %13 = arith.truncf %12 : vector<1x16x512xf32> to vector<1x16x512xbf16>
    %c0_23 = arith.constant 0 : index
    %c1 = arith.constant 1 : index
    %c0_24 = arith.constant 0 : index
    %14 = vector.load %arg7[%c0_23, %c1, %c0_24] : memref<1x18x576xbf16, #tpu.memory_space<vmem>>, vector<1x16x512xbf16>
    tpu.vector_store %arg7[%c0_23, %c1, %c0_24], %13 {strides = array<i32>} : memref<1x18x576xbf16, #tpu.memory_space<vmem>>, vector<1x16x512xbf16>,
    %c0_25 = arith.constant 0 : index
    %c0_26 = arith.constant 0 : index
    %c0_27 = arith.constant 0 : index
    %15 = vector.load %arg7[%c0_25, %c0_26, %c0_27] : memref<1x18x576xbf16, #tpu.memory_space<vmem>>, vector<1x16x576xbf16>
    %16 = vector.shape_cast %15 : vector<1x16x576xbf16> to vector<16x576xbf16>
    %c0_28 = arith.constant 0 : index
    %c0_29 = arith.constant 0 : index
    %c0_30 = arith.constant 0 : index
    %17 = vector.load %arg2[%c0_28, %c0_29, %c0_30] : memref<3x576x512xbf16, #tpu.memory_space<vmem>>, vector<1x576x512xbf16>
    %18 = vector.shape_cast %17 : vector<1x576x512xbf16> to vector<576x512xbf16>
    %cst_31 = arith.constant dense<0.000000e+00> : vector<16x512xf32>
    %19 = tpu.matmul %16, %18, %cst_31 {dimension_numbers = #tpu.dot_dimension_numbers<[1], [0], [0], [1], [0, 0, 1, 1], [], []>} : vector<16x576xbf16>, vector<576x512xbf16>, vector<16x512xf32> -> vector<16x512xf32>
    %c0_32 = arith.constant 0 : index
    %c1_33 = arith.constant 1 : index
    %c0_34 = arith.constant 0 : index
    %20 = vector.load %arg7[%c0_32, %c1_33, %c0_34] : memref<1x18x576xbf16, #tpu.memory_space<vmem>>, vector<1x16x576xbf16>
    %21 = vector.shape_cast %20 : vector<1x16x576xbf16> to vector<16x576xbf16>
    %c1_35 = arith.constant 1 : index
    %c0_36 = arith.constant 0 : index
    %c0_37 = arith.constant 0 : index
    %22 = vector.load %arg2[%c1_35, %c0_36, %c0_37] : memref<3x576x512xbf16, #tpu.memory_space<vmem>>, vector<1x576x512xbf16>
    %23 = vector.shape_cast %22 : vector<1x576x512xbf16> to vector<576x512xbf16>
    %cst_38 = arith.constant dense<0.000000e+00> : vector<16x512xf32>
    %24 = tpu.matmul %21, %23, %cst_38 {dimension_numbers = #tpu.dot_dimension_numbers<[1], [0], [0], [1], [0, 0, 1, 1], [], []>} : vector<16x576xbf16>, vector<576x512xbf16>, vector<16x512xf32> -> vector<16x512xf32>
    %25 = arith.addf %19, %24 : vector<16x512xf32>
    %c0_39 = arith.constant 0 : index
    %c2 = arith.constant 2 : index
    %c0_40 = arith.constant 0 : index
    %26 = vector.load %arg7[%c0_39, %c2, %c0_40] : memref<1x18x576xbf16, #tpu.memory_space<vmem>>, vector<1x16x576xbf16>
    %27 = vector.shape_cast %26 : vector<1x16x576xbf16> to vector<16x576xbf16>
    %c2_41 = arith.constant 2 : index
    %c0_42 = arith.constant 0 : index
    %c0_43 = arith.constant 0 : index
    %28 = vector.load %arg2[%c2_41, %c0_42, %c0_43] : memref<3x576x512xbf16, #tpu.memory_space<vmem>>, vector<1x576x512xbf16>
    %29 = vector.shape_cast %28 : vector<1x576x512xbf16> to vector<576x512xbf16>
    %cst_44 = arith.constant dense<0.000000e+00> : vector<16x512xf32>
    %30 = tpu.matmul %27, %29, %cst_44 {dimension_numbers = #tpu.dot_dimension_numbers<[1], [0], [0], [1], [0, 0, 1, 1], [], []>} : vector<16x576xbf16>, vector<576x512xbf16>, vector<16x512xf32> -> vector<16x512xf32>
    %31 = arith.addf %25, %30 : vector<16x512xf32>
    %c0_45 = arith.constant 0 : index
    %c0_46 = arith.constant 0 : index
    %32 = vector.load %arg3[%c0_45, %c0_46] : memref<1x512xf32, #tpu.memory_space<vmem>>, vector<1x512xf32>
    %33 = vector.broadcast %32 : vector<1x512xf32> to vector<16x512xf32>
    %34 = arith.addf %31, %33 : vector<16x512xf32>
    %cst_47 = arith.constant 0.000000e+00 : f32
    %35 = vector.broadcast %cst_47 : f32 to vector<16x512xf32>
    %36 = arith.maximumf %34, %35 : vector<16x512xf32>
    %37 = vector.shape_cast %36 : vector<16x512xf32> to vector<1x16x512xf32>
    %38 = arith.truncf %37 : vector<1x16x512xf32> to vector<1x16x512xbf16>
    %c0_48 = arith.constant 0 : index
    %c1_49 = arith.constant 1 : index
    %c0_50 = arith.constant 0 : index
    %39 = vector.load %arg8[%c0_48, %c1_49, %c0_50] : memref<1x18x576xbf16, #tpu.memory_space<vmem>>, vector<1x16x512xbf16>
    tpu.vector_store %arg8[%c0_48, %c1_49, %c0_50], %38 {strides = array<i32>} : memref<1x18x576xbf16, #tpu.memory_space<vmem>>, vector<1x16x512xbf16>,
    %c0_51 = arith.constant 0 : index
    %c0_52 = arith.constant 0 : index
    %c0_53 = arith.constant 0 : index
    %40 = vector.load %arg8[%c0_51, %c0_52, %c0_53] : memref<1x18x576xbf16, #tpu.memory_space<vmem>>, vector<1x16x576xbf16>
    %41 = vector.shape_cast %40 : vector<1x16x576xbf16> to vector<16x576xbf16>
    %c0_54 = arith.constant 0 : index
    %c0_55 = arith.constant 0 : index
    %c0_56 = arith.constant 0 : index
    %42 = vector.load %arg4[%c0_54, %c0_55, %c0_56] : memref<3x576x512xbf16, #tpu.memory_space<vmem>>, vector<1x576x512xbf16>
    %43 = vector.shape_cast %42 : vector<1x576x512xbf16> to vector<576x512xbf16>
    %cst_57 = arith.constant dense<0.000000e+00> : vector<16x512xf32>
    %44 = tpu.matmul %41, %43, %cst_57 {dimension_numbers = #tpu.dot_dimension_numbers<[1], [0], [0], [1], [0, 0, 1, 1], [], []>} : vector<16x576xbf16>, vector<576x512xbf16>, vector<16x512xf32> -> vector<16x512xf32>
    %c0_58 = arith.constant 0 : index
    %c1_59 = arith.constant 1 : index
    %c0_60 = arith.constant 0 : index
    %45 = vector.load %arg8[%c0_58, %c1_59, %c0_60] : memref<1x18x576xbf16, #tpu.memory_space<vmem>>, vector<1x16x576xbf16>
    %46 = vector.shape_cast %45 : vector<1x16x576xbf16> to vector<16x576xbf16>
    %c1_61 = arith.constant 1 : index
    %c0_62 = arith.constant 0 : index
    %c0_63 = arith.constant 0 : index
    %47 = vector.load %arg4[%c1_61, %c0_62, %c0_63] : memref<3x576x512xbf16, #tpu.memory_space<vmem>>, vector<1x576x512xbf16>
    %48 = vector.shape_cast %47 : vector<1x576x512xbf16> to vector<576x512xbf16>
    %cst_64 = arith.constant dense<0.000000e+00> : vector<16x512xf32>
    %49 = tpu.matmul %46, %48, %cst_64 {dimension_numbers = #tpu.dot_dimension_numbers<[1], [0], [0], [1], [0, 0, 1, 1], [], []>} : vector<16x576xbf16>, vector<576x512xbf16>, vector<16x512xf32> -> vector<16x512xf32>
    %50 = arith.addf %44, %49 : vector<16x512xf32>
    %c0_65 = arith.constant 0 : index
    %c2_66 = arith.constant 2 : index
    %c0_67 = arith.constant 0 : index
    %51 = vector.load %arg8[%c0_65, %c2_66, %c0_67] : memref<1x18x576xbf16, #tpu.memory_space<vmem>>, vector<1x16x576xbf16>
    %52 = vector.shape_cast %51 : vector<1x16x576xbf16> to vector<16x576xbf16>
    %c2_68 = arith.constant 2 : index
    %c0_69 = arith.constant 0 : index
    %c0_70 = arith.constant 0 : index
    %53 = vector.load %arg4[%c2_68, %c0_69, %c0_70] : memref<3x576x512xbf16, #tpu.memory_space<vmem>>, vector<1x576x512xbf16>
    %54 = vector.shape_cast %53 : vector<1x576x512xbf16> to vector<576x512xbf16>
    %cst_71 = arith.constant dense<0.000000e+00> : vector<16x512xf32>
    %55 = tpu.matmul %52, %54, %cst_71 {dimension_numbers = #tpu.dot_dimension_numbers<[1], [0], [0], [1], [0, 0, 1, 1], [], []>} : vector<16x576xbf16>, vector<576x512xbf16>, vector<16x512xf32> -> vector<16x512xf32>
    %56 = arith.addf %50, %55 : vector<16x512xf32>
    %c0_72 = arith.constant 0 : index
    %c0_73 = arith.constant 0 : index
    %57 = vector.load %arg5[%c0_72, %c0_73] : memref<1x512xf32, #tpu.memory_space<vmem>>, vector<1x512xf32>
    %58 = vector.broadcast %57 : vector<1x512xf32> to vector<16x512xf32>
    %59 = arith.addf %56, %58 : vector<16x512xf32>
    %60 = vector.shape_cast %12 : vector<1x16x512xf32> to vector<16x512xf32>
    %61 = arith.addf %59, %60 : vector<16x512xf32>
    %62 = vector.shape_cast %61 : vector<16x512xf32> to vector<1x16x512xf32>
    %c0_74 = arith.constant 0 : index
    %c0_75 = arith.constant 0 : index
    %c0_76 = arith.constant 0 : index
    %63 = vector.load %arg6[%c0_74, %c0_75, %c0_76] : memref<1x16x512xf32, #tpu.memory_space<vmem>>, vector<1x16x512xf32>
    tpu.vector_store %arg6[%c0_74, %c0_75, %c0_76], %62 {strides = array<i32>} : memref<1x16x512xf32, #tpu.memory_space<vmem>>, vector<1x16x512xf32>,
    return
  }
  func.func @transform_0(%arg0: i32) -> (i32, i32, i32) {
    %c0_i32 = arith.constant 0 : i32
    %c0_i32_0 = arith.constant 0 : i32
    %c0_i32_1 = arith.constant 0 : i32
    return %arg0, %c0_i32, %c0_i32_0 : i32, i32, i32
  }
  func.func @transform_1(%arg0: i32) -> (i32, i32, i32) {
    %c0_i32 = arith.constant 0 : i32
    %c0_i32_0 = arith.constant 0 : i32
    %c0_i32_1 = arith.constant 0 : i32
    %c0_i32_2 = arith.constant 0 : i32
    return %c0_i32, %c0_i32_0, %c0_i32_1 : i32, i32, i32
  }
  func.func @transform_2(%arg0: i32) -> (i32, i32) {
    %c0_i32 = arith.constant 0 : i32
    %c0_i32_0 = arith.constant 0 : i32
    %c0_i32_1 = arith.constant 0 : i32
    return %c0_i32, %c0_i32_0 : i32, i32
  }
  func.func @transform_3(%arg0: i32) -> (i32, i32, i32) {
    %c0_i32 = arith.constant 0 : i32
    %c0_i32_0 = arith.constant 0 : i32
    %c0_i32_1 = arith.constant 0 : i32
    %c0_i32_2 = arith.constant 0 : i32
    return %c0_i32, %c0_i32_0, %c0_i32_1 : i32, i32, i32
  }
  func.func @transform_4(%arg0: i32) -> (i32, i32) {
    %c0_i32 = arith.constant 0 : i32
    %c0_i32_0 = arith.constant 0 : i32
    %c0_i32_1 = arith.constant 0 : i32
    return %c0_i32, %c0_i32_0 : i32, i32
  }
  func.func @transform_5(%arg0: i32) -> (i32, i32, i32) {
    %c0_i32 = arith.constant 0 : i32
    %c0_i32_0 = arith.constant 0 : i32
    %c0_i32_1 = arith.constant 0 : i32
    return %arg0, %c0_i32, %c0_i32_0 : i32, i32, i32
  }
}

</mosaic_0001>

<bundles_post_ra>
// kernel: tpu_custom_call.1
= control target key start
LH: loop header
LB: loop body
LE: loop exit
PB: predicated region body
PF: predicated region fallthrough
CT: control target
= control target key end

     0   :  { %10 = vsyncpa [#allocation5], 0  ;;  %s11163_s0 = inlined_call_operand.hbm [shape: f32[2,16,512], index: 0, kind: input, shape index: {}]   ;;  %s11164_s1 = inlined_call_operand.hbm [shape: bf16[3,576,512], index: 1, kind: input, shape index: {}]   ;;  %s11165_s2 = inlined_call_operand.hbm [shape: f32[1,512], index: 2, kind: input, shape index: {}]   ;;  %s11166_s3 = inlined_call_operand.hbm [shape: bf16[3,576,512], index: 3, kind: input, shape index: {}]   ;;  %s11167_s4 = inlined_call_operand.hbm [shape: f32[1,512], index: 4, kind: input, shape index: {}]   ;;  %s11168_s5 = inlined_call_operand.hbm [shape: f32[2,16,512], index: 5, kind: output, shape index: {}]  }
   0x1   :  { %12 = vsyncpa [#allocation5 + $0x1], 0 }
   0x2   :  { %13 = vsyncpa [#allocation8], 0 }
   0x3   :  { %14 = vsyncpa [#allocation11], 0 }
   0x4   :  { %15 = vsyncpa [#allocation6], 0 }
   0x5   :  { %17 = vsyncpa [#allocation6 + $0x1], 0  ;;  %s10403_s18 = smov 0   ;;  %s10405_s19 = smov 0  }
   0x6   :  { %s10407_s20 = smov 0   ;;  %s10409_s21 = smov 0  }
   0x7 LB: > { %s10424_s22 = sadd.s32 4294967295, %s10358_s21   ;;  %s7792_s23 = sadd.s32 4294967294, %s10358_s21   ;;  %s10358_s21 = sphi %s10409_s21, %s11214_s21   ;;  %s10354_s20 = sphi %s10407_s20, %s11213_s20   ;;  %s10350_s19 = sphi %s10405_s19, %s11212_s19   ;;  %s10346_s18 = sphi %s10403_s18, %s11211_s18  }
   0x8   : > { %p43_p0 = scmp.ne.s32.totalorder %s10350_s19, %s10346_s18  ;;  %p11169_p1 = scmp.eq.s32.totalorder %s10424_s22, 0 }
   0x9   : > { %p157_p3 = scmp.eq.s32.totalorder %s7792_s23, 1  ;;  %p7793_p5 = scmp.ge.s32.totalorder %s10358_s21, 1 }
   0xa   : > { %p10433_p4 = por %p11169_p1, %p43_p0  ;;  %p164_p7 = scmp.lt.s32.totalorder %s10358_s21, 3 }
   0xb   : > { %p10438_p6 = por %p157_p3, %p43_p0  ;;  %s10360_s27 = smov [#allocation7]  }
   0xc   : > { %s11173_s24 = scalar_select %p10433_p4, 1, 0 }
   0xd   : > { %s11174_s25 = scalar_select %p10438_p6, 1, 0 }
   0xe   : > { %p10443_p8 = pnand %p7793_p5, %p164_p7  ;;  %s176_s28 = sshll.u32 %s10360_s27, 4  ;;  %s177_s28 = int_to_ptr.vmem [resolvable:$true] %s176_s28 }
   0xf   : > { %s10361_s30 = smov [#allocation10]   ;;  %s10362_s7 = smov [#allocation9]  }
  0x10   : > { %s11175_s26 = scalar_select %p10443_p8, 1, 0 }
  0x11   : > { %p8758_p9 = pneg %p10443_p8  ;;  %s200_s6 = sshll.u32 %s10361_s30, 4  ;;  %s201_s6 = int_to_ptr.vmem [resolvable:$true] %s200_s6 }
  0x12   : > { %s190_s8 = sshll.u32 %s10362_s7, 4  ;;  %s10165_s9 = scalar_lea.vmem %s177_s28, 55296  ;;  %s191_s8 = int_to_ptr.vmem [resolvable:$true] %s190_s8 }
  0x13   : > { %p10452_p11 = pnand %p8758_p9, %p11169_p1  ;;  %p10166_p13 = scmp.ne.s32.totalorder %s177_s28, %s10165_s9 }
  0x14   : > { %p10173_p5 = scmp.lt.s32.totalorder %s177_s28, %s177_s28  ;;  %p10174_p7 = scmp.lt.s32.totalorder %s10165_s9, %s10165_s9 }
  0x15   : > { %p10156_p12 = pneg %p10452_p11 }
  0x16   : > { %p10175_p9 = por %p10174_p7, %p10173_p5 }
  0x17   : > { %p10168_p0 = pnand %p10166_p13, %p10156_p12 }
  0x19   : > { %p10169_p3 = pneg %p10168_p0 }
  0x1b   : > { %p10176_p10 = pnand %p10175_p9, %p10169_p3 }
  0x1d   : > { %10179 = shalt.err (!%p10176_p10)
}
  0x1e   : > { %s10363_s10 = smov 256   ;;  %s10364_s11 = smov 16  }
  0x1f   : > { %8761 = dma.hbm_to_vmem [thread:$0]  (!%p10452_p11), %s11164_s1, 55296, %s177_s28, [#allocation8], %s10363_s10, %s10363_s10, %s10364_s11  }
  0x20   : > { %s10191_s14 = scalar_lea.vmem %s201_s6, 55296  ;;  %p10199_p2 = scmp.lt.s32.totalorder %s201_s6, %s201_s6 }
  0x21   : > { %p10192_p1 = scmp.ne.s32.totalorder %s201_s6, %s10191_s14  ;;  %p10200_p6 = scmp.lt.s32.totalorder %s10191_s14, %s10191_s14 }
  0x23   : > { %p10194_p13 = pnand %p10192_p1, %p10156_p12  ;;  %p10201_p5 = por %p10200_p6, %p10199_p2 }
  0x25   : > { %p10195_p0 = pneg %p10194_p13 }
  0x27   : > { %p10202_p3 = pnand %p10201_p5, %p10195_p0 }
  0x29   : > { %10205 = shalt.err (!%p10202_p3)
}
  0x2a   : > { %8767 = dma.hbm_to_vmem [thread:$0]  (!%p10452_p11), %s11166_s3, 55296, %s201_s6, [#allocation11], %s10363_s10, %s10363_s10, %s10364_s11  }
  0x2b   : > { %s10217_s17 = scalar_lea.vmem %s191_s8, 64  ;;  %p10225_p9 = scmp.lt.s32.totalorder %s191_s8, %s191_s8 }
  0x2c   : > { %p10218_p10 = scmp.ne.s32.totalorder %s191_s8, %s10217_s17  ;;  %p10226_p13 = scmp.lt.s32.totalorder %s10217_s17, %s10217_s17 }
  0x2e   : > { %p10220_p7 = pnand %p10218_p10, %p10156_p12  ;;  %p10227_p4 = por %p10226_p13, %p10225_p9 }
  0x30   : > { %p10221_p1 = pneg %p10220_p7 }
  0x32   : > { %p10228_p2 = pnand %p10227_p4, %p10221_p1 }
  0x34   : > { %10231 = shalt.err (!%p10228_p2)
}
  0x35   : > { %8764 = dma.hbm_to_vmem [thread:$0]  (!%p10452_p11), %s11165_s2, 64, %s191_s8, [#allocation8]  }
  0x36   : > { %s10365_s28 = smov [#allocation12]  }
  0x37   : > { %s214_s30 = sshll.u32 %s10365_s28, 4  ;;  %s215_s30 = int_to_ptr.vmem [resolvable:$true] %s214_s30 }
  0x38   : > { %s10243_s6 = scalar_lea.vmem %s215_s30, 64  ;;  %p10251_p3 = scmp.lt.s32.totalorder %s215_s30, %s215_s30 }
  0x39   : > { %p10244_p6 = scmp.ne.s32.totalorder %s215_s30, %s10243_s6  ;;  %p10252_p10 = scmp.lt.s32.totalorder %s10243_s6, %s10243_s6 }
  0x3b   : > { %p10246_p0 = pnand %p10244_p6, %p10156_p12  ;;  %p10253_p4 = por %p10252_p10, %p10251_p3 }
  0x3d   : > { %p10247_p5 = pneg %p10246_p0 }
  0x3f   : > { %p10254_p7 = pnand %p10253_p4, %p10247_p5 }
  0x41   : > { %10257 = shalt.err (!%p10254_p7)
}
  0x42   : > { %8770 = dma.hbm_to_vmem [thread:$0]  (!%p10452_p11), %s11167_s4, 64, %s215_s30, [#allocation11]  }
  0x43   : > { %s10491_s8 = sadd.s32 1, %s10358_s21   ;;  %s30_s10 = sadd.s32 1, %s10354_s20 }
  0x44   : > { %s27_s29 = ssub.s32 %s10358_s21, %s10491_s8  ;;  %p37_p12 = scmp.ne.s32.totalorder %s10354_s20, %s10350_s19 }
  0x45   : > { %p28_p1 = scmp.eq.s32.totalorder %s27_s29, 0  ;;  %p38_p9 = scmp.eq.s32.totalorder %s10358_s21, 0 }
  0x46   : > { %p11177_p13 = scmp.eq.s32.totalorder %s10424_s22, 1  ;;  %p8783_p6 = scmp.lt.s32.totalorder %s10358_s21, 2 }
  0x47   : > { %s10507_s12 = scalar_select %p28_p1, %s10354_s20, %s30_s10  }
  0x48   : > { %p10501_p2 = por %p11177_p13, %p37_p12  ;;  %p39_p0 = por %p38_p9, %p37_p12 }
  0x49   : > { %s225_s13 = sand.u32 1, %s10354_s20   ;;  %s8728_s15 = sshll.u32 %s10358_s21, 10 }
  0x4a   : > { %s11178_s11 = scalar_select %p10501_p2, 1, 0 }
  0x4b   : > { %s7799_s14 = sshll.u32 %s225_s13, 6  ;;  %s10514_s23 = scalar_lea.hbm %s11163_s0, %s8728_s15 }
  0x4c   : > { %s229_s27 = scalar_lea.vmem [#allocation4], %s7799_s14  ;;  %p10518_p11 = pnand %p8783_p6, %p39_p0 }
  0x4d   : > { %s236_s28 = sshll.u32 %s229_s27, 4  ;;  %s10522_s6 = scalar_lea.sflag [#allocation5], %s225_s13  ;;  %s10516_s28 = int_to_ptr.vmem [resolvable:$true] %s236_s28 }
  0x4e   : > { %s10258_s7 = scalar_lea.hbm %s10514_s23, 1024  ;;  %p10260_p3 = pneg %p10518_p11 }
  0x4f   : > { %p10259_p5 = scmp.ne.s32.totalorder %s10514_s23, %s10258_s7  ;;  %s10263_s29 = scalar_lea.hbm %s11163_s0, 2048 }
  0x50   : > { %p10264_p7 = scmp.lt.s32.totalorder %s10514_s23, %s11163_s0  ;;  %p10265_p12 = scmp.lt.s32.totalorder %s10263_s29, %s10258_s7 }
  0x51   : > { %p10261_p10 = pnand %p10260_p3, %p10259_p5 }
  0x52   : > { %p10266_p1 = por %p10265_p12, %p10264_p7 }
  0x53   : > { %p10262_p4 = pneg %p10261_p10 }
  0x55   : > { %p10267_p9 = pnand %p10266_p1, %p10262_p4 }
  0x57   : > { %10270 = shalt.err (!%p10267_p9)
}
  0x58   : > { %s10271_s13 = scalar_lea.vmem %s10516_s28, 1024  ;;  %s10366_s16 = smov [#allocation4]  }
  0x59   : > { %p10272_p13 = scmp.ne.s32.totalorder %s10516_s28, %s10271_s13  ;;  %s10276_s17 = sshll.u32 %s10366_s16, 4  ;;  %s10277_s17 = int_to_ptr.vmem [resolvable:$false] %s10276_s17 }
  0x5a   : > { %s10278_s27 = scalar_lea.vmem %s10277_s17, 2048  ;;  %p10279_p5 = scmp.lt.s32.totalorder %s10516_s28, %s10277_s17 }
  0x5b   : > { %p10274_p6 = pnand %p10272_p13, %p10260_p3  ;;  %p10280_p10 = scmp.lt.s32.totalorder %s10278_s27, %s10271_s13 }
  0x5d   : > { %p10275_p0 = pneg %p10274_p6  ;;  %p10281_p2 = por %p10280_p10, %p10279_p5 }
  0x5f   : > { %p10282_p8 = pnand %p10281_p2, %p10275_p0 }
  0x61   : > { %10285 = shalt.err (!%p10282_p8)
}
  0x62   : > { %s10367_s7 = smov 512   ;;  %s10368_s9 = smov 32  }
  0x63   : > { %8774 = dma.hbm_to_vmem [thread:$0]  (!%p10518_p11), %s10514_s23, 1024, %s10516_s28, %s10522_s6, %s10367_s7, %s10367_s7, %s10368_s9  }
  0x64   : > { %p11180_p3 = scmp.ne.s32.totalorder %s11175_s26, 0 }
  0x65   : > { %s10546_s10 = sand.u32 (!%p11180_p3), 1, %s10350_s19   ;;  %p11181_p8 = scmp.ne.s32.totalorder (!%p11180_p3), %s11173_s24, 0 }
  0x66   : > { %248 = sbr.rel (%p11180_p3) target bundleno = 1370 (0x55a), region = 40  ;;  %s7803_s29 = sshll.u32 (!%p11180_p3), %s10546_s10, 6 }
  0x67   : > { %s251_s14 = scalar_lea.sflag (!%p11180_p3), [#allocation5], %s10546_s10  ;;  %s10552_s15 = scalar_lea.vmem (!%p11180_p3), [#allocation4], %s7803_s29 }
  0x6b   : > { %10329 = dma.done.wait (%p11181_p8), %s251_s14, 1024  }
  0x6c   : > { %10331 = vsyncadd (%p11181_p8), %s251_s14, 4294966272  ;;  %p11182_p2 = scmp.eq.s32.totalorder %s10424_s22, 0 }
  0x6e   : > { %10333 = dma.done.wait (%p11182_p2), [#allocation8], 55360   ;;  %p11183_p11 = pmov %p11182_p2 }
  0x6f   : > { %p11184_p4 = pmov %p11182_p2 }
  0x70   : > { %10335 = vsyncadd (%p11183_p11), [#allocation8], 4294911936 }
  0x71   : > { %10337 = dma.done.wait (%p11184_p4), [#allocation11], 55360   ;;  %p11185_p7 = pmov %p11182_p2 }
  0x72   : > { %vm331_vm0 = vcmask 519168   ;;  %v10369_v0 = vmov 0   ;;  %v8832_v1 = vld [vmem:[#allocation7 + $0x564] ss:$16 sps:$4 sm:$0xff]   ;;  %v8836_v3 = vld [vmem:[#allocation7 + $0x560] ss:$16 sps:$4 sm:$0xff]  }
  0x73   : > { %10339 = vsyncadd (%p11185_p7), [#allocation11], 4294911936  ;;  %333 = vst.msk [vmem:[#allocation2 + $0x24] sm:$0xf] %vm331_vm0, %v10369_v0  ;;  %v8834_v2 = vld [vmem:[#allocation7 + $0x764] ss:$16 sps:$4 sm:$0xff]   ;;  %1567 = vmatprep.subr.bf16.mxu0 %v8832_v1 }
  0x74   : > { %355 = vst.msk [vmem:[#allocation3 + $0x24] sm:$0xf] %vm331_vm0, %v10369_v0  ;;  %v8837_v4 = vld [vmem:[#allocation7 + $0x760] ss:$16 sps:$4 sm:$0xff]   ;;  %1610 = vmatprep.subr.bf16.mxu1 %v8834_v2  ;;  %v8838_v5 = vld [vmem:[#allocation7 + $0x544] ss:$16 sps:$4 sm:$0xff]   ;;  %1568 = vmatpush1.bf16.msra.mxu0 %v8836_v3 }
  0x75   : > { %1611 = vmatpush1.bf16.msra.mxu1 %v8837_v4  ;;  %v8840_v6 = vld [vmem:[#allocation7 + $0x744] ss:$16 sps:$4 sm:$0xff]   ;;  %v8842_v7 = vld [vmem:[#allocation7 + $0x540] ss:$16 sps:$4 sm:$0xff]   ;;  %1569 = vmatprep.subr.bf16.mxu0 %v8838_v5  ;;  %vm299_vm1 = vsmask.f32 256 }
  0x76   : > { %v8843_v8 = vld [vmem:[#allocation7 + $0x740] ss:$16 sps:$4 sm:$0xff]   ;;  %1612 = vmatprep.subr.bf16.mxu1 %v8840_v6  ;;  %v8844_v9 = vld [vmem:[#allocation7 + $0x524] ss:$16 sps:$4 sm:$0xff]   ;;  %vm298_vm2 = vcmask 1040384   ;;  %vm301_vm6 = vcmask 1044484  }
  0x77   : > { %v8846_v10 = vld [vmem:[#allocation7 + $0x724] ss:$16 sps:$4 sm:$0xff]   ;;  %v8848_v11 = vld [vmem:[#allocation7 + $0x520] ss:$16 sps:$4 sm:$0xff]   ;;  %vm302_vm3 = vsmask.f32 4352  ;;  %vm10572_vm4 = vmand %vm298_vm2, %vm299_vm1 }
  0x78   : > { %v8849_v12 = vld [vmem:[#allocation7 + $0x720] ss:$16 sps:$4 sm:$0xff]   ;;  %1570 = vmatpush1.bf16.msra.mxu0 %v8842_v7  ;;  %v8850_v13 = vld [vmem:[#allocation7 + $0x504] ss:$16 sps:$4 sm:$0xff]   ;;  %vm316_vm5 = vsmask.f32 7938  ;;  %vm10576_vm7 = vmand %vm301_vm6, %vm302_vm3 }
  0x79   : > { %1613 = vmatpush1.bf16.msra.mxu1 %v8843_v8  ;;  %1571 = vmatprep.subr.bf16.mxu0 %v8844_v9  ;;  %v8852_v14 = vld [vmem:[#allocation7 + $0x704] ss:$16 sps:$4 sm:$0xff]   ;;  %v8854_v15 = vld [vmem:[#allocation7 + $0x500] ss:$16 sps:$4 sm:$0xff]   ;;  %vm10582_vm8 = vmand %vm298_vm2, %vm316_vm5  ;;  %vm318_vm9 = vsmask.f32 7954 }
  0x7a   : > { %1614 = vmatprep.subr.bf16.mxu1 %v8846_v10  ;;  %v8855_v16 = vld [vmem:[#allocation7 + $0x700] ss:$16 sps:$4 sm:$0xff]   ;;  %v8856_v17 = vld [vmem:[#allocation7 + $0x4e4] ss:$16 sps:$4 sm:$0xff]   ;;  %vm319_vm10 = vmand %vm301_vm6, %vm318_vm9  ;;  %vm427_vm13 = vcmask 1043456   ;;  %vm429_vm14 = vcmask 1047556  }
  0x7b   : > { %v8858_v18 = vld [vmem:[#allocation7 + $0x6e4] ss:$16 sps:$4 sm:$0xff]   ;;  %v8860_v19 = vld [vmem:[#allocation7 + $0x4e0] ss:$16 sps:$4 sm:$0xff]   ;;  %vm10591_vm11 = vmor %vm10576_vm7, %vm10572_vm4  ;;  %vm385_vm15 = vsmask.f32 4368 }
  0x7c   : > { %1572 = vmatpush1.bf16.msra.mxu0 %v8848_v11  ;;  %v8861_v20 = vld [vmem:[#allocation7 + $0x6e0] ss:$16 sps:$4 sm:$0xff]   ;;  %v8862_v21 = vld [vmem:[#allocation7 + $0x4c4] ss:$16 sps:$4 sm:$0xff]   ;;  %vm10597_vm12 = vmor %vm319_vm10, %vm10582_vm8  ;;  %vm311_vm7 = vcmask 516096   ;;  %s11088_s24 = scalar_lea.vmem [#allocation13], %s7803_s29 }
  0x7d   : > { %1615 = vmatpush1.bf16.msra.mxu1 %v8849_v12  ;;  %1573 = vmatprep.subr.bf16.mxu0 %v8850_v13  ;;  %v8864_v22 = vld [vmem:[#allocation7 + $0x6c4] ss:$16 sps:$4 sm:$0xff]   ;;  %v8866_v23 = vld [vmem:[#allocation7 + $0x4c0] ss:$16 sps:$4 sm:$0xff]   ;;  %v305_v54 = vld [vmem:[#allocation2] sm:$0x11] }
  0x7e   : > { %1616 = vmatprep.subr.bf16.mxu1 %v8852_v14  ;;  %v8867_v24 = vld [vmem:[#allocation7 + $0x6c0] ss:$16 sps:$4 sm:$0xff]   ;;  %v8868_v25 = vld [vmem:[#allocation7 + $0x4a4] ss:$16 sps:$4 sm:$0xff]   ;;  %v306_v56 = vsel %vm10591_vm11, 0, %v305_v54  ;;  %v358_v59 = vld [vmem:[%s10552_s15 + $0x8] sm:$0xff] }
  0x7f   : > { %v8870_v26 = vld [vmem:[#allocation7 + $0x6a4] ss:$16 sps:$4 sm:$0xff]   ;;  %v8872_v27 = vld [vmem:[#allocation7 + $0x4a0] ss:$16 sps:$4 sm:$0xff]   ;;  %307 = vst [vmem:[#allocation2] sm:$0x11] %v306_v56  ;;  %vm10611_vm2 = vmand %vm427_vm13, %vm316_vm5 }
  0x80   : > { %1574 = vmatpush1.bf16.msra.mxu0 %v8854_v15  ;;  %v8873_v28 = vld [vmem:[#allocation7 + $0x6a0] ss:$16 sps:$4 sm:$0xff]   ;;  %v8874_v29 = vld [vmem:[#allocation7 + $0x484] ss:$16 sps:$4 sm:$0xff]   ;;  %v362_v63 = vld [vmem:[%s10552_s15 + $0x28] sm:$0xff]  ;;  %s8737_s26 = sshll.u32 %s10424_s22, 10 }
  0x81   : > { %1617 = vmatpush1.bf16.msra.mxu1 %v8855_v16  ;;  %1575 = vmatprep.subr.bf16.mxu0 %v8856_v17  ;;  %v8876_v30 = vld [vmem:[#allocation7 + $0x684] ss:$16 sps:$4 sm:$0xff]   ;;  %v8878_v31 = vld [vmem:[#allocation7 + $0x480] ss:$16 sps:$4 sm:$0xff]   ;;  %v324_v5 = vld [vmem:[#allocation2 + $0x30] sm:$0x11]  ;;  %s11115_s6 = scalar_lea.hbm %s11168_s5, %s8737_s26 }
  0x82   : > { %1618 = vmatprep.subr.bf16.mxu1 %v8858_v18  ;;  %v8879_v33 = vld [vmem:[#allocation7 + $0x680] ss:$16 sps:$4 sm:$0xff]   ;;  %v8880_v34 = vld [vmem:[#allocation7 + $0x664] ss:$16 sps:$4 sm:$0xff]   ;;  %vm10617_vm3 = vmand %vm429_vm14, %vm318_vm9  ;;  %v325_v11 = vsel %vm10597_vm12, 0, %v324_v5  ;;  %s7681_s23 = sshll.u32 %s11088_s24, 4  ;;  %s11117_s23 = int_to_ptr.vmem [resolvable:$true] %s7681_s23 }
  0x83   : > { %v8882_v35 = vld [vmem:[#allocation7 + $0x864] ss:$16 sps:$4 sm:$0xff]   ;;  %v8884_v37 = vld [vmem:[#allocation7 + $0x660] ss:$16 sps:$4 sm:$0xff]   ;;  %v360_v13 = vld [vmem:[%s10552_s15 + $0x18] sm:$0xff]  ;;  %s7668_s22 = scalar_lea.sflag [#allocation6], %s10546_s10 }
  0x84   : > { %1576 = vmatpush1.bf16.msra.mxu0 %v8860_v19  ;;  %v8885_v38 = vld [vmem:[#allocation7 + $0x860] ss:$16 sps:$4 sm:$0xff]   ;;  %v8886_v40 = vld [vmem:[#allocation7 + $0x644] ss:$16 sps:$4 sm:$0xff]   ;;  %326 = vst [vmem:[#allocation2 + $0x30] sm:$0x11] %v325_v11  ;;  %vm10633_vm4 = vmor %vm10617_vm3, %vm10611_vm2 }
  0x85   : > { %1619 = vmatpush1.bf16.msra.mxu1 %v8861_v20  ;;  %1577 = vmatprep.subr.bf16.mxu0 %v8862_v21  ;;  %v8888_v41 = vld [vmem:[#allocation7 + $0x844] ss:$16 sps:$4 sm:$0xff]   ;;  %v8890_v42 = vld [vmem:[#allocation7 + $0x640] ss:$16 sps:$4 sm:$0xff]   ;;  %v364_v18 = vld [vmem:[%s10552_s15 + $0x38] sm:$0xff]  ;;  %s10286_s13 = scalar_lea.vmem %s11117_s23, 1024 }
  0x86   : > { %1620 = vmatprep.subr.bf16.mxu1 %v8864_v22  ;;  %v8891_v43 = vld [vmem:[#allocation7 + $0x840] ss:$16 sps:$4 sm:$0xff]   ;;  %v8892_v44 = vld [vmem:[#allocation7 + $0x624] ss:$16 sps:$4 sm:$0xff]   ;;  %vm10639_vm6 = vmor %vm299_vm1, %vm385_vm15  ;;  %p10287_p12 = scmp.ne.s32.totalorder %s11117_s23, %s10286_s13  ;;  %p11208_p1 = scmp.ne.s32.totalorder %s11178_s11, 0 }
  0x87   : > { %v8894_v45 = vld [vmem:[#allocation7 + $0x824] ss:$16 sps:$4 sm:$0xff]   ;;  %v8896_v47 = vld [vmem:[#allocation7 + $0x620] ss:$16 sps:$4 sm:$0xff]   ;;  %vm10671_vm8 = vmand %vm311_vm7, %vm299_vm1  ;;  %vm778_vm1 = vsmask.f32 7424 }
  0x88   : > { %1578 = vmatpush1.bf16.msra.mxu0 %v8866_v23  ;;  %v8897_v48 = vld [vmem:[#allocation7 + $0x820] ss:$16 sps:$4 sm:$0xff]   ;;  %v8898_v50 = vld [vmem:[#allocation7 + $0x604] ss:$16 sps:$4 sm:$0xff]   ;;  %vm10679_vm9 = vmand %vm311_vm7, %vm316_vm5  ;;  %vm2970_vm5 = vcmask 1046528   ;;  %p10288_p9 = pnand %p10287_p12, %p11208_p1  ;;  %s10370_s16 = smov [#allocation13]  }
  0x89   : > { %1621 = vmatpush1.bf16.msra.mxu1 %v8867_v24  ;;  %1579 = vmatprep.subr.bf16.mxu0 %v8868_v25  ;;  %v8900_v51 = vld [vmem:[#allocation7 + $0x804] ss:$16 sps:$4 sm:$0xff]   ;;  %v8902_v52 = vld [vmem:[#allocation7 + $0x600] ss:$16 sps:$4 sm:$0xff]   ;;  %s10290_s17 = sshll.u32 %s10370_s16, 4  ;;  %s10291_s17 = int_to_ptr.vmem [resolvable:$false] %s10290_s17 }
  0x8a   : > { %1622 = vmatprep.subr.bf16.mxu1 %v8870_v26  ;;  %v8903_v53 = vld [vmem:[#allocation7 + $0x800] ss:$16 sps:$4 sm:$0xff]   ;;  %v8904_v55 = vld [vmem:[#allocation7 + $0x5e4] ss:$16 sps:$4 sm:$0xff]   ;;  %p10289_p13 = pneg %p10288_p9  ;;  %s10292_s27 = scalar_lea.vmem %s10291_s17, 2048 }
  0x8b   : > { %v321_v57 = vld [vmem:[#allocation2 + $0x28] sm:$0x11]  ;;  %v357_v58 = vld [vmem:[%s10552_s15] sm:$0xff]  ;;  %v443_v54 = vld [vmem:[#allocation2 + $0x30] sm:$0x11]  ;;  %p10293_p6 = scmp.lt.s32.totalorder %s11117_s23, %s10291_s17  ;;  %p10294_p0 = scmp.lt.s32.totalorder %s10292_s27, %s10286_s13 }
  0x8c   : > { %1580 = vmatpush1.bf16.msra.mxu0 %v8872_v27  ;;  %v8906_v60 = vld [vmem:[#allocation7 + $0x7e4] ss:$16 sps:$4 sm:$0xff]   ;;  %v322_v61 = vsel %vm10597_vm12, 0, %v321_v57  ;;  %v8729_v1 = vpack.c.bf16 %v358_v59, %v357_v58  ;;  %v8908_v6 = vld [vmem:[#allocation7 + $0x5e0] ss:$16 sps:$4 sm:$0xff]  }
  0x8d   : > { %1623 = vmatpush1.bf16.msra.mxu1 %v8873_v28  ;;  %1581 = vmatprep.subr.bf16.mxu0 %v8874_v29  ;;  %v361_v62 = vld [vmem:[%s10552_s15 + $0x20] sm:$0xff]  ;;  %323 = vst [vmem:[#allocation2 + $0x28] sm:$0x11] %v322_v61  ;;  %v308_v4 = vld [vmem:[#allocation2 + $0x8] sm:$0x11]  ;;  %p10295_p5 = por %p10294_p0, %p10293_p6 }
  0x8e   : > { %1624 = vmatprep.subr.bf16.mxu1 %v8876_v30  ;;  %v8731_v2 = vpack.c.bf16 %v362_v63, %v361_v62  ;;  %v388_v7 = vshrl.u32 %v8729_v1, 16  ;;  %v391_v8 = vshll.u32 %v8729_v1, 16  ;;  %v309_v10 = vsel %vm10591_vm11, 0, %v308_v4  ;;  %v359_v12 = vld [vmem:[%s10552_s15 + $0x10] sm:$0xff] }
  0x8f   : > { %v8909_v14 = vld [vmem:[#allocation7 + $0x7e0] ss:$16 sps:$4 sm:$0xff]   ;;  %310 = vst [vmem:[#allocation2 + $0x8] sm:$0x11] %v309_v10  ;;  %v8730_v19 = vpack.c.bf16 %v360_v13, %v359_v12  ;;  %v8910_v20 = vld [vmem:[#allocation7 + $0x5c4] ss:$16 sps:$4 sm:$0xff]   ;;  %p10296_p10 = pnand %p10295_p5, %p10289_p13 }
  0x90   : > { %1582 = vmatpush1.bf16.msra.mxu0 %v8878_v31  ;;  %v403_v15 = vshrl.u32 %v8731_v2, 16  ;;  %v406_v16 = vshll.u32 %v8731_v2, 16  ;;  %v363_v17 = vld [vmem:[%s10552_s15 + $0x30] sm:$0xff]  ;;  %v390_v21 = vrot.slane %v388_v7, 7  ;;  %v8937_v10 = vld [vmem:[#allocation7 + $0x56c] ss:$16 sps:$4 sm:$0xff]  }
  0x91   : > { %1625 = vmatpush1.bf16.msra.mxu1 %v8879_v33  ;;  %1583 = vmatprep.subr.bf16.mxu0 %v8880_v34  ;;  %v8732_v22 = vpack.c.bf16 %v364_v18, %v363_v17  ;;  %v8912_v23 = vld [vmem:[#allocation7 + $0x7c4] ss:$16 sps:$4 sm:$0xff]   ;;  %v395_v26 = vshrl.u32 %v8730_v19, 16  ;;  %v398_v27 = vshll.u32 %v8730_v19, 16  ;;  %v8914_v28 = vld [vmem:[#allocation7 + $0x5c0] ss:$16 sps:$4 sm:$0xff]  }
  0x92   : > { %1626 = vmatprep.subr.bf16.mxu1 %v8882_v35  ;;  %v405_v24 = vrot.slane %v403_v15, 7  ;;  %v393_v30 = vor.u32 %v391_v8, %v390_v21  ;;  %v401_v31 = vrot.slane %v390_v21, 4  ;;  %v8915_v34 = vld [vmem:[#allocation7 + $0x7c0] ss:$16 sps:$4 sm:$0xff]   ;;  %v8916_v39 = vld [vmem:[#allocation7 + $0x5a4] ss:$16 sps:$4 sm:$0xff]  }
  0x93   : > { %v412_v32 = vshrl.u32 %v8732_v22, 16  ;;  %v415_v33 = vshll.u32 %v8732_v22, 16  ;;  %v8920_v56 = vld [vmem:[#allocation7 + $0x5a0] ss:$16 sps:$4 sm:$0xff]   ;;  %v8922_v59 = vld [vmem:[#allocation7 + $0x584] ss:$16 sps:$4 sm:$0xff]  }
  0x94   : > { %1584 = vmatpush2.bf16.msra.mxu0 %v8884_v37  ;;  %v408_v35 = vor.u32 %v406_v16, %v405_v24  ;;  %v419_v36 = vrot.slane %v405_v24, 4  ;;  %v432_v37 = vld [vmem:[#allocation2] sm:$0xff]  ;;  %v8921_v58 = vld [vmem:[#allocation7 + $0x7a0] ss:$16 sps:$4 sm:$0xff]   ;;  %v8924_v63 = vld [vmem:[#allocation7 + $0x784] ss:$16 sps:$4 sm:$0xff]  }
  0x95   : > { %1627 = vmatpush2.bf16.msra.mxu1 %v8885_v38  ;;  %1585 = vmatprep.subr.bf16.mxu0 %v8886_v40  ;;  %v397_v38 = vrot.slane %v395_v26, 7  ;;  %v433_v40 = vsel %vm10633_vm4, %v393_v30, %v432_v37  ;;  %v8926_v4 = vld [vmem:[#allocation7 + $0x580] ss:$16 sps:$4 sm:$0xff]   ;;  %v8934_v9 = vld [vmem:[#allocation7 + $0x8e4] ss:$16 sps:$4 sm:$0xff]  }
  0x96   : > { %1628 = vmatprep.subr.bf16.mxu1 %v8888_v41  ;;  %v440_v41 = vld [vmem:[#allocation2 + $0x28] sm:$0x11]  ;;  %434 = vst [vmem:[#allocation2] sm:$0xff] %v433_v40 }
  0x97   : > { %v8927_v5 = vld [vmem:[#allocation7 + $0x780] ss:$16 sps:$4 sm:$0xff]   ;;  %v9525_v18 = vld [vmem:[#allocation10 + $0x5c0] ss:$16 sps:$4 sm:$0xff]  }
  0x98   : > { %1586 = vmatpush2.bf16.msra.mxu0 %v8890_v42  ;;  %v414_v42 = vrot.slane %v412_v32, 7  ;;  %v9631_v49 = vld [vmem:[#allocation10 + $0x780] ss:$16 sps:$4 sm:$0xff]   ;;  %v9624_v25 = vld [vmem:[#allocation10 + $0x82c] ss:$16 sps:$4 sm:$0xff]  }
  0x99   : > { %1629 = vmatpush2.bf16.msra.mxu1 %v8891_v43  ;;  %1587 = vmatprep.subr.bf16.mxu0 %v8892_v44  ;;  %v8918_v43 = vld [vmem:[#allocation7 + $0x7a4] ss:$16 sps:$4 sm:$0xff]   ;;  %v409_v44 = vsel %vm10639_vm6, %v401_v31, %v408_v35  ;;  %v9636_v46 = vld [vmem:[#allocation10 + $0x7ec] ss:$16 sps:$4 sm:$0xff]  }
  0x9a   : > { %1630 = vmatprep.subr.bf16.mxu1 %v8894_v45  ;;  %v441_v45 = vsel %vm10591_vm11, %v419_v36, %v440_v41  ;;  %438 = vst [vmem:[#allocation2 + $0x14] sm:$0xff] %v409_v44 }
  0x9b   : > { %442 = vst [vmem:[#allocation2 + $0x28] sm:$0x11] %v441_v45 }
  0x9c   : > { %1588 = vmatpush2.bf16.msra.mxu0 %v8896_v47  ;;  %v400_v47 = vor.u32 %v398_v27, %v397_v38  ;;  %v328_v27 = vld [vmem:[#allocation2 + $0x38] sm:$0x1] }
  0x9d   : > { %1631 = vmatpush2.bf16.msra.mxu1 %v8897_v48  ;;  %1589 = vmatprep.subr.bf16.mxu0 %v8898_v50  ;;  %v410_v48 = vrot.slane %v397_v38, 4  ;;  %v10649_v50 = vcombine.high %v433_v40, %v409_v44 }
  0x9e   : > { %1632 = vmatprep.subr.bf16.mxu1 %v8900_v51  ;;  %v417_v51 = vor.u32 %v415_v33, %v414_v42 }
  0xa0   : > { %1590 = vmatpush2.bf16.msra.mxu0 %v8902_v52  ;;  %v420_v52 = vrot.slane %v414_v42, 4  ;;  %v418_v61 = vsel %vm10639_vm6, %v410_v48, %v417_v51  ;;  %v8940_v48 = vld [vmem:[#allocation7 + $0x8c4] ss:$16 sps:$4 sm:$0xff]  }
  0xa1   : > { %1633 = vmatpush2.bf16.msra.mxu1 %v8903_v53  ;;  %1591 = vmatprep.subr.bf16.mxu0 %v8904_v55  ;;  %v435_v53 = vld [vmem:[#allocation2 + $0x8] sm:$0xff]  ;;  %v10651_v55 = vcombine.low %v433_v40, %v409_v44  ;;  %439 = vst [vmem:[#allocation2 + $0x1c] sm:$0xff] %v418_v61 }
  0xa2   : > { %1634 = vmatprep.subr.bf16.mxu1 %v8906_v60  ;;  %v436_v57 = vsel %vm10633_vm4, %v400_v47, %v435_v53  ;;  %v794_v60 = vshll.u32 %v10649_v50, 16  ;;  %v444_v62 = vsel %vm10591_vm11, %v420_v52, %v443_v54  ;;  %v596_v15 = vld [vmem:[#allocation2 + $0x28] sm:$0x11]  ;;  %v8935_v53 = vld [vmem:[#allocation7 + $0x568] ss:$16 sps:$4 sm:$0xff]  }
  0xa3   : > { %437 = vst [vmem:[#allocation2 + $0x8] sm:$0xff] %v436_v57  ;;  %445 = vst [vmem:[#allocation2 + $0x30] sm:$0x11] %v444_v62  ;;  %v10660_v1 = vcombine.high %v436_v57, %v418_v61  ;;  %v782_v2 = vshll.u32 %v10651_v55, 16  ;;  %v10663_v3 = vcombine.low %v436_v57, %v418_v61  ;;  %v780_v11 = vshrl.u32 %v10651_v55, 16 }
  0xa4   : > { %1592 = vmatpush2.bf16.msra.mxu0 %v8908_v6  ;;  %v792_v6 = vshrl.u32 %v10649_v50, 16  ;;  %v796_v7 = vrot.slane %v794_v60, 1  ;;  %v10683_v19 = vcombine.high %v596_v15, %v596_v15  ;;  %v10685_v21 = vcombine.low %v596_v15, %v596_v15  ;;  %v8932_v44 = vld [vmem:[#allocation7 + $0x8e0] ss:$16 sps:$4 sm:$0xff]   ;;  %v8941_v60 = vld [vmem:[#allocation7 + $0x548] ss:$16 sps:$4 sm:$0xff]  }
  0xa5   : > { %1635 = vmatpush2.bf16.msra.mxu1 %v8909_v14  ;;  %1593 = vmatprep.subr.bf16.mxu0 %v8910_v20  ;;  %v818_v8 = vshll.u32 %v10660_v1, 16  ;;  %v784_v12 = vrot.slane %v782_v2, 1  ;;  %v806_v13 = vshll.u32 %v10663_v3, 16  ;;  %v816_v16 = vshrl.u32 %v10660_v1, 16  ;;  %v8938_v54 = vld [vmem:[#allocation7 + $0x8c0] ss:$16 sps:$4 sm:$0xff]  }
  0xa6   : > { %1636 = vmatprep.subr.bf16.mxu1 %v8912_v23  ;;  %v804_v17 = vshrl.u32 %v10663_v3, 16  ;;  %v313_v23 = vld [vmem:[#allocation2 + $0x10] sm:$0x1]  ;;  %v797_v24 = vor.u32 %v796_v7, %v792_v6  ;;  %v799_v30 = vshll.u32 %v10683_v19, 16  ;;  %v787_v33 = vshll.u32 %v10685_v21, 16 }
  0xa7   : > { %v820_v20 = vrot.slane %v818_v8, 1  ;;  %v808_v22 = vrot.slane %v806_v13, 1  ;;  %v314_v26 = vsel %vm10671_vm8, 0, %v313_v23  ;;  %v785_v32 = vor.u32 %v784_v12, %v780_v11  ;;  %v8946_v61 = vld [vmem:[#allocation7 + $0x8a4] ss:$16 sps:$4 sm:$0xff]  }
  0xa8   : > { %1594 = vmatpush2.bf16.msra.mxu0 %v8914_v28  ;;  %v342_v28 = vld [vmem:[#allocation3 + $0x10] sm:$0x1]  ;;  %315 = vst [vmem:[#allocation2 + $0x10] sm:$0x1] %v314_v26  ;;  %v801_v38 = vrot.slane %v799_v30, 1 }
  0xa9   : > { %1637 = vmatpush2.bf16.msra.mxu1 %v8915_v34  ;;  %1595 = vmatprep.subr.bf16.mxu0 %v8916_v39  ;;  %v329_v34 = vsel %vm10679_vm9, 0, %v328_v27  ;;  %332 = vst.msk [vmem:[#allocation2 + $0x10] sm:$0xf] %vm331_vm0, %v10369_v0  ;;  %v343_v37 = vsel %vm10671_vm8, 0, %v342_v28  ;;  %v789_v39 = vrot.slane %v787_v33, 1  ;;  %v821_v40 = vor.u32 %v820_v20, %v816_v16 }
  0xaa   : > { %1638 = vmatprep.subr.bf16.mxu1 %v8918_v43  ;;  %v597_v31 = vld [vmem:[#allocation2 + $0x30] sm:$0x11]  ;;  %330 = vst [vmem:[#allocation2 + $0x38] sm:$0x1] %v329_v34  ;;  %344 = vst [vmem:[#allocation3 + $0x10] sm:$0x1] %v343_v37  ;;  %v809_v42 = vor.u32 %v808_v22, %v804_v17  ;;  %v802_v45 = vsel %vm778_vm1, %v797_v24, %v801_v38 }
  0xab   : > { %v10693_v35 = vcombine.high %v597_v31, %v597_v31  ;;  %v10695_v36 = vcombine.low %v597_v31, %v597_v31  ;;  %335 = vst.msk [vmem:[#allocation2 + $0x38] sm:$0x1] %vm311_vm7, %v10369_v0  ;;  %v10709_v47 = vsel %vm778_vm1, %v785_v32, %v789_v39  ;;  %1599 = vmatprep.mubr.bf16.mxu0 %v802_v45  ;;  %v8950_v12 = vld [vmem:[#allocation7 + $0x880] ss:$16 sps:$4 sm:$0xff]   ;;  %v8955_v13 = vld [vmem:[#allocation7 + $0x50c] ss:$16 sps:$4 sm:$0xff]  }
  0xac   : > { %1596 = vmatpush2.bf16.msra.mxu0 %v8920_v56  ;;  %354 = vst.msk [vmem:[#allocation3 + $0x10] sm:$0xf] %vm331_vm0, %v10369_v0  ;;  %v451_v56 = vld [vmem:[#allocation2 + $0x24] sm:$0xf]  ;;  %v8953_v17 = vld [vmem:[#allocation7 + $0x508] ss:$16 sps:$4 sm:$0xff]  }
  0xad   : > { %1639 = vmatpush2.bf16.msra.mxu1 %v8921_v58  ;;  %1597 = vmatprep.subr.bf16.mxu0 %v8922_v59  ;;  %v823_v41 = vshll.u32 %v10693_v35, 16  ;;  %v811_v43 = vshll.u32 %v10695_v36, 16  ;;  %v8943_v59 = vld [vmem:[#allocation7 + $0x54c] ss:$16 sps:$4 sm:$0xff]   ;;  %vm1563_vm0 = vcmask 523264  }
  0xae   : > { %1640 = vmatprep.subr.bf16.mxu1 %v8924_v63  ;;  %v8963_v16 = vld [vmem:[#allocation7 + $0x76c] ss:$16 sps:$4 sm:$0xff]   ;;  %v8961_v23 = vld [vmem:[#allocation7 + $0x768] ss:$16 sps:$4 sm:$0xff]  }
  0xaf   : > { %v825_v51 = vrot.slane %v823_v41, 1  ;;  %v813_v52 = vrot.slane %v811_v43, 1  ;;  %v8960_v20 = vld [vmem:[#allocation7 + $0x4ec] ss:$16 sps:$4 sm:$0xff]   ;;  %v8958_v26 = vld [vmem:[#allocation7 + $0x4e8] ss:$16 sps:$4 sm:$0xff]  }
  0xb0   : > { %1598 = vmatpush2.bf16.msra.mxu0 %v8926_v4  ;;  %v448_v62 = vld [vmem:[#allocation2 + $0x10] sm:$0xf]  ;;  %v8944_v4 = vld [vmem:[#allocation7 + $0x8a0] ss:$16 sps:$4 sm:$0xff]   ;;  %v8969_v24 = vld [vmem:[#allocation7 + $0x74c] ss:$16 sps:$4 sm:$0xff]  }
  0xb1   : > { %1641 = vmatpush2.bf16.msra.mxu1 %v8927_v5  ;;  %1661 = vmatprep.subr.bf16.mxu0 %v8934_v9  ;;  %v826_v57 = vsel %vm778_vm1, %v821_v40, %v825_v51  ;;  %v10714_v58 = vsel %vm778_vm1, %v809_v42, %v813_v52  ;;  %v10718_v63 = vcombine.low %v448_v62, %v451_v56  ;;  %v8949_v5 = vld [vmem:[#allocation7 + $0x52c] ss:$16 sps:$4 sm:$0xff]   ;;  %v8952_v9 = vld [vmem:[#allocation7 + $0x884] ss:$16 sps:$4 sm:$0xff]   ;;  %v8967_v28 = vld [vmem:[#allocation7 + $0x748] ss:$16 sps:$4 sm:$0xff]  }
  0xb2   : > { %1696 = vmatprep.subr.bf16.mxu1 %v8937_v10  ;;  %1642 = vmatprep.mubr.bf16.mxu1 %v826_v57  ;;  %v8957_v2 = vld [vmem:[#allocation2 + $0x38] ss:$0 sps:$4 sm:$0x11]   ;;  %v8947_v10 = vld [vmem:[#allocation7 + $0x528] ss:$16 sps:$4 sm:$0xff]  }
  0xb3   : > { %1600 = vmatmul.mubr.bf16.vlgmr.msra.gmra.mxu0 %v10709_v47  ;;  %v828_v6 = vshrl.u32 %v10718_v63, 16  ;;  %v830_v7 = vshll.u32 %v10718_v63, 16  ;;  %v835_v8 = vshll.u32 %v8957_v2, 16  ;;  %v8966_v27 = vld [vmem:[#allocation7 + $0x4cc] ss:$16 sps:$4 sm:$0xff]  }
  0xb4   : > { %1662 = vmatpush1.bf16.msra.mxu0 %v8932_v44  ;;  %1685 = vmatprep.mubr.bf16.mxu0 %v10369_v0  ;;  %v8975_v30 = vld [vmem:[#allocation7 + $0x72c] ss:$16 sps:$4 sm:$0xff]   ;;  %v8964_v31 = vld [vmem:[#allocation7 + $0x4c8] ss:$16 sps:$4 sm:$0xff]  }
  0xb5   : > { %1663 = vmatprep.subr.bf16.mxu0 %v8940_v48  ;;  %1643 = vmatmul.mubr.bf16.vlgmr.msra.gmra.mxu1 %v10714_v58  ;;  %v832_v11 = vrot.slane %v830_v7, 1  ;;  %v837_v15 = vrot.slane %v835_v8, 1  ;;  %v8972_v32 = vld [vmem:[#allocation7 + $0x4ac] ss:$16 sps:$4 sm:$0xff]   ;;  %v8973_v33 = vld [vmem:[#allocation7 + $0x728] ss:$16 sps:$4 sm:$0xff]  }
  0xb6   : > { %1697 = vmatpush1.bf16.msra.mxu1 %v8935_v53  ;;  %1728 = vmatprep.mubr.bf16.mxu1 %v802_v45  ;;  %v8981_v34 = vld [vmem:[#allocation7 + $0x70c] ss:$16 sps:$4 sm:$0xff]   ;;  %v8970_v37 = vld [vmem:[#allocation7 + $0x4a8] ss:$16 sps:$4 sm:$0xff]  }
  0xb7   : > { %1698 = vmatprep.subr.bf16.mxu1 %v8943_v59  ;;  %v833_v14 = vor.u32 %v832_v11, %v828_v6  ;;  %v8978_v38 = vld [vmem:[#allocation7 + $0x48c] ss:$16 sps:$4 sm:$0xff]   ;;  %v8979_v39 = vld [vmem:[#allocation7 + $0x708] ss:$16 sps:$4 sm:$0xff]  }
  0xb8   : > { %1664 = vmatpush1.bf16.msra.mxu0 %v8938_v54  ;;  %v8987_v40 = vld [vmem:[#allocation7 + $0x6ec] ss:$16 sps:$4 sm:$0xff]   ;;  %v8976_v41 = vld [vmem:[#allocation7 + $0x488] ss:$16 sps:$4 sm:$0xff]  }
  0xb9   : > { %1665 = vmatprep.subr.bf16.mxu0 %v8946_v61  ;;  %v10723_v22 = vsel %vm778_vm1, %v833_v14, %v837_v15  ;;  %v8984_v42 = vld [vmem:[#allocation7 + $0x66c] ss:$16 sps:$4 sm:$0xff]   ;;  %v8985_v43 = vld [vmem:[#allocation7 + $0x6e8] ss:$16 sps:$4 sm:$0xff]  }
  0xba   : > { %1699 = vmatpush1.bf16.msra.mxu1 %v8941_v60  ;;  %v8993_v44 = vld [vmem:[#allocation7 + $0x6cc] ss:$16 sps:$4 sm:$0xff]   ;;  %v8982_v45 = vld [vmem:[#allocation7 + $0x668] ss:$16 sps:$4 sm:$0xff]  }
  0xbb   : > { %1700 = vmatprep.subr.bf16.mxu1 %v8949_v5  ;;  %v8990_v48 = vld [vmem:[#allocation7 + $0x64c] ss:$16 sps:$4 sm:$0xff]   ;;  %v8991_v51 = vld [vmem:[#allocation7 + $0x6c8] ss:$16 sps:$4 sm:$0xff]  }
  0xbc   : > { %1666 = vmatpush1.bf16.msra.mxu0 %v8944_v4  ;;  %v8999_v52 = vld [vmem:[#allocation7 + $0x6ac] ss:$16 sps:$4 sm:$0xff]   ;;  %v8988_v53 = vld [vmem:[#allocation7 + $0x648] ss:$16 sps:$4 sm:$0xff]  }
  0xbd   : > { %1667 = vmatprep.subr.bf16.mxu0 %v8952_v9  ;;  %v8996_v54 = vld [vmem:[#allocation7 + $0x62c] ss:$16 sps:$4 sm:$0xff]   ;;  %v8997_v56 = vld [vmem:[#allocation7 + $0x6a8] ss:$16 sps:$4 sm:$0xff]  }
  0xbe   : > { %1701 = vmatpush1.bf16.msra.mxu1 %v8947_v10  ;;  %v8994_v59 = vld [vmem:[#allocation7 + $0x628] ss:$16 sps:$4 sm:$0xff]   ;;  %v9002_v60 = vld [vmem:[#allocation7 + $0x60c] ss:$16 sps:$4 sm:$0xff]  }
  0xbf   : > { %1702 = vmatprep.subr.bf16.mxu1 %v8955_v13  ;;  %v9003_v61 = vld [vmem:[#allocation7 + $0x688] ss:$16 sps:$4 sm:$0xff]   ;;  %v9011_v62 = vld [vmem:[#allocation7 + $0x86c] ss:$16 sps:$4 sm:$0xff]  }
  0xc0   : > { %1668 = vmatpush1.bf16.msra.mxu0 %v8950_v12  ;;  %v9000_v2 = vld [vmem:[#allocation7 + $0x608] ss:$16 sps:$4 sm:$0xff]   ;;  %v9008_v4 = vld [vmem:[#allocation7 + $0x5ec] ss:$16 sps:$4 sm:$0xff]  }
  0xc1   : > { %1739 = vmatprep.subr.bf16.mxu0 %v8963_v16  ;;  %v9009_v5 = vld [vmem:[#allocation7 + $0x868] ss:$16 sps:$4 sm:$0xff]   ;;  %v9017_v6 = vld [vmem:[#allocation7 + $0x84c] ss:$16 sps:$4 sm:$0xff]  }
  0xc2   : > { %1703 = vmatpush1.bf16.msra.mxu1 %v8953_v17  ;;  %v9006_v7 = vld [vmem:[#allocation7 + $0x5e8] ss:$16 sps:$4 sm:$0xff]   ;;  %v9014_v8 = vld [vmem:[#allocation7 + $0x5cc] ss:$16 sps:$4 sm:$0xff]  }
  0xc3   : > { %7967 = vmatmul.mubr.msk.bf16.vlgmr.msra.gmra.mxu0 %vm1563_vm0, %v10723_v22  ;;  %1704 = vmatprep.subr.bf16.mxu1 %v8960_v20  ;;  %v9015_v9 = vld [vmem:[#allocation7 + $0x848] ss:$16 sps:$4 sm:$0xff]   ;;  %v9023_v10 = vld [vmem:[#allocation7 + $0x82c] ss:$16 sps:$4 sm:$0xff]  }
  0xc4   : > { %1740 = vmatpush1.bf16.msra.mxu0 %v8961_v23  ;;  %1771 = vmatprep.mubr.bf16.mxu0 %v826_v57  ;;  %v9005_v57 = vld [vmem:[#allocation7 + $0x68c] ss:$16 sps:$4 sm:$0xff]   ;;  %v9012_v11 = vld [vmem:[#allocation7 + $0x5c8] ss:$16 sps:$4 sm:$0xff]  }
  0xc5   : > { %1741 = vmatprep.subr.bf16.mxu0 %v8969_v24  ;;  %v9020_v12 = vld [vmem:[#allocation7 + $0x5ac] ss:$16 sps:$4 sm:$0xff]   ;;  %v9021_v13 = vld [vmem:[#allocation7 + $0x828] ss:$16 sps:$4 sm:$0xff]  }
  0xc6   : > { %1705 = vmatpush1.bf16.msra.mxu1 %v8958_v26  ;;  %v9029_v14 = vld [vmem:[#allocation7 + $0x80c] ss:$16 sps:$4 sm:$0xff]   ;;  %v9018_v15 = vld [vmem:[#allocation7 + $0x5a8] ss:$16 sps:$4 sm:$0xff]  }
  0xc7   : > { %1706 = vmatprep.subr.bf16.mxu1 %v8966_v27  ;;  %v9026_v16 = vld [vmem:[#allocation7 + $0x58c] ss:$16 sps:$4 sm:$0xff]   ;;  %v9027_v17 = vld [vmem:[#allocation7 + $0x808] ss:$16 sps:$4 sm:$0xff]  }
  0xc8   : > { %1742 = vmatpush1.bf16.msra.mxu0 %v8967_v28  ;;  %v9032_v20 = vld [vmem:[#allocation7 + $0x7ec] ss:$16 sps:$4 sm:$0xff]   ;;  %v9024_v23 = vld [vmem:[#allocation7 + $0x588] ss:$16 sps:$4 sm:$0xff]  }
  0xc9   : > { %1743 = vmatprep.subr.bf16.mxu0 %v8975_v30  ;;  %v9030_v24 = vld [vmem:[#allocation7 + $0x7e8] ss:$16 sps:$4 sm:$0xff]   ;;  %v9035_v26 = vld [vmem:[#allocation7 + $0x8ec] ss:$16 sps:$4 sm:$0xff]  }
  0xca   : > { %1707 = vmatpush1.bf16.msra.mxu1 %v8964_v31  ;;  %v9038_v27 = vld [vmem:[#allocation7 + $0x7cc] ss:$16 sps:$4 sm:$0xff]   ;;  %v9033_v28 = vld [vmem:[#allocation7 + $0x8e8] ss:$16 sps:$4 sm:$0xff]  }
  0xcb   : > { %1708 = vmatprep.subr.bf16.mxu1 %v8972_v32  ;;  %v9036_v30 = vld [vmem:[#allocation7 + $0x7c8] ss:$16 sps:$4 sm:$0xff]   ;;  %v9041_v31 = vld [vmem:[#allocation7 + $0x8cc] ss:$16 sps:$4 sm:$0xff]  }
  0xcc   : > { %1744 = vmatpush1.bf16.msra.mxu0 %v8973_v33  ;;  %v9044_v32 = vld [vmem:[#allocation7 + $0x7ac] ss:$16 sps:$4 sm:$0xff]   ;;  %v9039_v33 = vld [vmem:[#allocation7 + $0x8c8] ss:$16 sps:$4 sm:$0xff]  }
  0xcd   : > { %1745 = vmatprep.subr.bf16.mxu0 %v8981_v34  ;;  %v9042_v34 = vld [vmem:[#allocation7 + $0x7a8] ss:$16 sps:$4 sm:$0xff]  }
  0xce   : > { %1709 = vmatpush1.bf16.msra.mxu1 %v8970_v37  ;;  %v9047_v37 = vld [vmem:[#allocation7 + $0x8ac] ss:$16 sps:$4 sm:$0xff]  }
  0xcf   : > { %1710 = vmatprep.subr.bf16.mxu1 %v8978_v38  ;;  %v9050_v38 = vld [vmem:[#allocation7 + $0x78c] ss:$16 sps:$4 sm:$0xff]  }
  0xd0   : > { %1746 = vmatpush1.bf16.msra.mxu0 %v8979_v39  ;;  %v9045_v39 = vld [vmem:[#allocation7 + $0x8a8] ss:$16 sps:$4 sm:$0xff]  }
  0xd1   : > { %1747 = vmatprep.subr.bf16.mxu0 %v8987_v40  ;;  %v9048_v40 = vld [vmem:[#allocation7 + $0x788] ss:$16 sps:$4 sm:$0xff]  }
  0xd2   : > { %1711 = vmatpush1.bf16.msra.mxu1 %v8976_v41  ;;  %v9053_v41 = vld [vmem:[#allocation7 + $0x88c] ss:$16 sps:$4 sm:$0xff]  }
  0xd3   : > { %1712 = vmatprep.subr.bf16.mxu1 %v8984_v42  ;;  %v9056_v42 = vld [vmem:[#allocation7 + $0xe4] ss:$16 sps:$4 sm:$0xff]  }
  0xd4   : > { %1748 = vmatpush1.bf16.msra.mxu0 %v8985_v43  ;;  %v9051_v43 = vld [vmem:[#allocation7 + $0x888] ss:$16 sps:$4 sm:$0xff]  }
  0xd5   : > { %1749 = vmatprep.subr.bf16.mxu0 %v8993_v44  ;;  %v9059_v44 = vld [vmem:[#allocation7 + $0x2e4] ss:$16 sps:$4 sm:$0xff]  }
  0xd6   : > { %1713 = vmatpush2.bf16.msra.mxu1 %v8982_v45  ;;  %v9062_v45 = vld [vmem:[#allocation7 + $0xc4] ss:$16 sps:$4 sm:$0xff]  }
  0xd7   : > { %1714 = vmatprep.subr.bf16.mxu1 %v8990_v48  ;;  %v9057_v48 = vld [vmem:[#allocation7 + $0x2e0] ss:$16 sps:$4 sm:$0xff]  }
  0xd8   : > { %1750 = vmatpush1.bf16.msra.mxu0 %v8991_v51  ;;  %v9060_v51 = vld [vmem:[#allocation7 + $0xc0] ss:$16 sps:$4 sm:$0xff]  }
  0xd9   : > { %1751 = vmatprep.subr.bf16.mxu0 %v8999_v52  ;;  %v9065_v52 = vld [vmem:[#allocation7 + $0x2c4] ss:$16 sps:$4 sm:$0xff]  }
  0xda   : > { %1715 = vmatpush2.bf16.msra.mxu1 %v8988_v53  ;;  %v9068_v53 = vld [vmem:[#allocation7 + $0xa4] ss:$16 sps:$4 sm:$0xff]  }
  0xdb   : > { %1716 = vmatprep.subr.bf16.mxu1 %v8996_v54  ;;  %v9063_v54 = vld [vmem:[#allocation7 + $0x2c0] ss:$16 sps:$4 sm:$0xff]  }
  0xdc   : > { %1752 = vmatpush1.bf16.msra.mxu0 %v8997_v56  ;;  %v9066_v56 = vld [vmem:[#allocation7 + $0xa0] ss:$16 sps:$4 sm:$0xff]  }
  0xdd   : > { %1753 = vmatprep.subr.bf16.mxu0 %v9005_v57  ;;  %v9071_v57 = vld [vmem:[#allocation7 + $0x2a4] ss:$16 sps:$4 sm:$0xff]  }
  0xde   : > { %1717 = vmatpush2.bf16.msra.mxu1 %v8994_v59  ;;  %v9069_v59 = vld [vmem:[#allocation7 + $0x2a0] ss:$16 sps:$4 sm:$0xff]  }
  0xdf   : > { %1718 = vmatprep.subr.bf16.mxu1 %v9002_v60  ;;  %v9072_v60 = vld [vmem:[#allocation7 + $0x80] ss:$16 sps:$4 sm:$0xff]  }
  0xe0   : > { %1754 = vmatpush1.bf16.msra.mxu0 %v9003_v61  ;;  %v9077_v61 = vld [vmem:[#allocation7 + $0x284] ss:$16 sps:$4 sm:$0xff]  }
  0xe1   : > { %1755 = vmatprep.subr.bf16.mxu0 %v9011_v62  ;;  %v9080_v62 = vld [vmem:[#allocation7 + $0x64] ss:$16 sps:$4 sm:$0xff]  }
  0xe2   : > { %1719 = vmatpush2.bf16.msra.mxu1 %v9000_v2  ;;  %v9075_v2 = vld [vmem:[#allocation7 + $0x280] ss:$16 sps:$4 sm:$0xff]  }
  0xe3   : > { %1720 = vmatprep.subr.bf16.mxu1 %v9008_v4  ;;  %v9083_v4 = vld [vmem:[#allocation7 + $0x264] ss:$16 sps:$4 sm:$0xff]  }
  0xe4   : > { %1756 = vmatpush2.bf16.msra.mxu0 %v9009_v5  ;;  %v9086_v5 = vld [vmem:[#allocation7 + $0x44] ss:$16 sps:$4 sm:$0xff]  }
  0xe5   : > { %1757 = vmatprep.subr.bf16.mxu0 %v9017_v6  ;;  %v9081_v6 = vld [vmem:[#allocation7 + $0x260] ss:$16 sps:$4 sm:$0xff]  }
  0xe6   : > { %1721 = vmatpush2.bf16.msra.mxu1 %v9006_v7  ;;  %v9084_v7 = vld [vmem:[#allocation7 + $0x40] ss:$16 sps:$4 sm:$0xff]  }
  0xe7   : > { %1722 = vmatprep.subr.bf16.mxu1 %v9014_v8  ;;  %v9089_v8 = vld [vmem:[#allocation7 + $0x244] ss:$16 sps:$4 sm:$0xff]  }
  0xe8   : > { %1758 = vmatpush2.bf16.msra.mxu0 %v9015_v9  ;;  %v9092_v9 = vld [vmem:[#allocation7 + $0x24] ss:$16 sps:$4 sm:$0xff]  }
  0xe9   : > { %1759 = vmatprep.subr.bf16.mxu0 %v9023_v10  ;;  %v9087_v10 = vld [vmem:[#allocation7 + $0x240] ss:$16 sps:$4 sm:$0xff]  }
  0xea   : > { %1723 = vmatpush2.bf16.msra.mxu1 %v9012_v11  ;;  %v9090_v11 = vld [vmem:[#allocation7 + $0x20] ss:$16 sps:$4 sm:$0xff]  }
  0xeb   : > { %1724 = vmatprep.subr.bf16.mxu1 %v9020_v12  ;;  %v9095_v12 = vld [vmem:[#allocation7 + $0x224] ss:$16 sps:$4 sm:$0xff]  }
  0xec   : > { %1760 = vmatpush2.bf16.msra.mxu0 %v9021_v13  ;;  %v9098_v13 = vld [vmem:[#allocation7 + $0x4] ss:$16 sps:$4 sm:$0xff]  }
  0xed   : > { %1761 = vmatprep.subr.bf16.mxu0 %v9029_v14  ;;  %v9093_v14 = vld [vmem:[#allocation7 + $0x220] ss:$16 sps:$4 sm:$0xff]  }
  0xee   : > { %1725 = vmatpush2.bf16.msra.mxu1 %v9018_v15  ;;  %v9096_v15 = vld [vmem:[#allocation7] ss:$16 sps:$4 sm:$0xff]  }
  0xef   : > { %1726 = vmatprep.subr.bf16.mxu1 %v9026_v16  ;;  %v9101_v16 = vld [vmem:[#allocation7 + $0x204] ss:$16 sps:$4 sm:$0xff]  }
  0xf0   : > { %1762 = vmatpush2.bf16.msra.mxu0 %v9027_v17  ;;  %v9104_v17 = vld [vmem:[#allocation7 + $0x1e4] ss:$16 sps:$4 sm:$0xff]  }
  0xf1   : > { %1763 = vmatprep.subr.bf16.mxu0 %v9032_v20  ;;  %v9099_v20 = vld [vmem:[#allocation7 + $0x200] ss:$16 sps:$4 sm:$0xff]  }
  0xf2   : > { %1727 = vmatpush2.bf16.msra.mxu1 %v9024_v23  ;;  %v9102_v23 = vld [vmem:[#allocation7 + $0x1e0] ss:$16 sps:$4 sm:$0xff]  }
  0xf3   : > { %1790 = vmatprep.subr.bf16.mxu1 %v9035_v26  ;;  %v9110_v26 = vld [vmem:[#allocation7 + $0x1c4] ss:$16 sps:$4 sm:$0xff]  }
  0xf4   : > { %1764 = vmatpush2.bf16.msra.mxu0 %v9030_v24  ;;  %v9107_v24 = vld [vmem:[#allocation7 + $0x3e4] ss:$16 sps:$4 sm:$0xff]  }
  0xf5   : > { %1765 = vmatprep.subr.bf16.mxu0 %v9038_v27  ;;  %1729 = vmatmul.mubr.bf16.vlgmr.msra.gmra.mxu1 %v10709_v47  ;;  %v9054_v47 = vld [vmem:[#allocation7 + $0xe0] ss:$16 sps:$4 sm:$0xff]  }
  0xf6   : > { %1791 = vmatpush1.bf16.msra.mxu1 %v9033_v28  ;;  %1814 = vmatprep.mubr.bf16.mxu1 %v10369_v0  ;;  %v9105_v27 = vld [vmem:[#allocation7 + $0x3e0] ss:$16 sps:$4 sm:$0xff]  }
  0xf7   : > { %1792 = vmatprep.subr.bf16.mxu1 %v9041_v31  ;;  %v9108_v28 = vld [vmem:[#allocation7 + $0x1c0] ss:$16 sps:$4 sm:$0xff]   ;;  %v9116_v31 = vld [vmem:[#allocation7 + $0x1a4] ss:$16 sps:$4 sm:$0xff]  }
  0xf8   : > { %1766 = vmatpush2.bf16.msra.mxu0 %v9036_v30  ;;  %v9113_v30 = vld [vmem:[#allocation7 + $0x3c4] ss:$16 sps:$4 sm:$0xff]  }
  0xf9   : > { %1767 = vmatprep.subr.bf16.mxu0 %v9044_v32  ;;  %v9111_v32 = vld [vmem:[#allocation7 + $0x3c0] ss:$16 sps:$4 sm:$0xff]  }
  0xfa   : > { %1793 = vmatpush1.bf16.msra.mxu1 %v9039_v33  ;;  %v9114_v33 = vld [vmem:[#allocation7 + $0x1a0] ss:$16 sps:$4 sm:$0xff]  }
  0xfb   : > { %1794 = vmatprep.subr.bf16.mxu1 %v9047_v37  ;;  %v9122_v37 = vld [vmem:[#allocation7 + $0x184] ss:$16 sps:$4 sm:$0xff]  }
  0xfc   : > { %1768 = vmatpush2.bf16.msra.mxu0 %v9042_v34  ;;  %v9119_v34 = vld [vmem:[#allocation7 + $0x3a4] ss:$16 sps:$4 sm:$0xff]  }
  0xfd   : > { %1769 = vmatprep.subr.bf16.mxu0 %v9050_v38  ;;  %v9117_v38 = vld [vmem:[#allocation7 + $0x3a0] ss:$16 sps:$4 sm:$0xff]  }
  0xfe   : > { %1795 = vmatpush1.bf16.msra.mxu1 %v9045_v39  ;;  %v9120_v39 = vld [vmem:[#allocation7 + $0x180] ss:$16 sps:$4 sm:$0xff]  }
  0xff   : > { %1796 = vmatprep.subr.bf16.mxu1 %v9053_v41  ;;  %v9128_v41 = vld [vmem:[#allocation7 + $0x164] ss:$16 sps:$4 sm:$0xff]  }
 0x100   : > { %1770 = vmatpush2.bf16.msra.mxu0 %v9048_v40  ;;  %v9125_v40 = vld [vmem:[#allocation7 + $0x384] ss:$16 sps:$4 sm:$0xff]  }
 0x101   : > { %2551 = vmatprep.subr.bf16.mxu0 %v9056_v42  ;;  %v9123_v42 = vld [vmem:[#allocation7 + $0x380] ss:$16 sps:$4 sm:$0xff]  }
 0x102   : > { %1797 = vmatpush1.bf16.msra.mxu1 %v9051_v43  ;;  %v9126_v43 = vld [vmem:[#allocation7 + $0x160] ss:$16 sps:$4 sm:$0xff]  }
 0x103   : > { %1772 = vmatmul.mubr.bf16.vlgmr.msra.gmra.mxu0 %v10714_v58  ;;  %2594 = vmatprep.subr.bf16.mxu1 %v9059_v44  ;;  %v9074_v58 = vld [vmem:[#allocation7 + $0x84] ss:$16 sps:$4 sm:$0xff]  }
 0x104   : > { %2552 = vmatpush1.bf16.msra.mxu0 %v9054_v47  ;;  %2583 = vmatprep.mubr.bf16.mxu0 %v10649_v50  ;;  %v9131_v47 = vld [vmem:[#allocation7 + $0x364] ss:$16 sps:$4 sm:$0xff]  }
 0x105   : > { %2553 = vmatprep.subr.bf16.mxu0 %v9062_v45  ;;  %7968 = vmatmul.mubr.msk.bf16.vlgmr.msra.gmra.mxu1 %vm1563_vm0, %v10723_v22  ;;  %v9078_v22 = vld [vmem:[#allocation7 + $0x60] ss:$16 sps:$4 sm:$0xff]   ;;  %v9134_v44 = vld [vmem:[#allocation7 + $0x144] ss:$16 sps:$4 sm:$0xff]  }
 0x106   : > { %2595 = vmatpush1.bf16.msra.mxu1 %v9057_v48  ;;  %2626 = vmatprep.mubr.bf16.mxu1 %v10660_v1  ;;  %v9129_v45 = vld [vmem:[#allocation7 + $0x360] ss:$16 sps:$4 sm:$0xff]  }
 0x107   : > { %2596 = vmatprep.subr.bf16.mxu1 %v9065_v52  ;;  %v9132_v48 = vld [vmem:[#allocation7 + $0x140] ss:$16 sps:$4 sm:$0xff]   ;;  %v9140_v52 = vld [vmem:[#allocation7 + $0x124] ss:$16 sps:$4 sm:$0xff]  }
 0x108   : > { %2554 = vmatpush1.bf16.msra.mxu0 %v9060_v51  ;;  %v9137_v51 = vld [vmem:[#allocation7 + $0x344] ss:$16 sps:$4 sm:$0xff]  }
 0x109   : > { %2555 = vmatprep.subr.bf16.mxu0 %v9068_v53  ;;  %v9135_v53 = vld [vmem:[#allocation7 + $0x340] ss:$16 sps:$4 sm:$0xff]  }
 0x10a   : > { %2597 = vmatpush1.bf16.msra.mxu1 %v9063_v54  ;;  %v9138_v54 = vld [vmem:[#allocation7 + $0x120] ss:$16 sps:$4 sm:$0xff]  }
 0x10b   : > { %2598 = vmatprep.subr.bf16.mxu1 %v9071_v57  ;;  %v9146_v57 = vld [vmem:[#allocation7 + $0x104] ss:$16 sps:$4 sm:$0xff]  }
 0x10c   : > { %2556 = vmatpush1.bf16.msra.mxu0 %v9066_v56  ;;  %v9143_v56 = vld [vmem:[#allocation7 + $0x324] ss:$16 sps:$4 sm:$0xff]  }
 0x10d   : > { %2557 = vmatprep.subr.bf16.mxu0 %v9074_v58  ;;  %v9141_v58 = vld [vmem:[#allocation7 + $0x320] ss:$16 sps:$4 sm:$0xff]  }
 0x10e   : > { %2599 = vmatpush1.bf16.msra.mxu1 %v9069_v59  ;;  %v9144_v59 = vld [vmem:[#allocation7 + $0x100] ss:$16 sps:$4 sm:$0xff]  }
 0x10f   : > { %2600 = vmatprep.subr.bf16.mxu1 %v9077_v61  ;;  %v9152_v61 = vld [vmem:[#allocation7 + $0x464] ss:$16 sps:$4 sm:$0xff]  }
 0x110   : > { %2558 = vmatpush1.bf16.msra.mxu0 %v9072_v60  ;;  %v9149_v60 = vld [vmem:[#allocation7 + $0x304] ss:$16 sps:$4 sm:$0xff]  }
 0x111   : > { %2559 = vmatprep.subr.bf16.mxu0 %v9080_v62  ;;  %v9147_v62 = vld [vmem:[#allocation7 + $0x300] ss:$16 sps:$4 sm:$0xff]  }
 0x112   : > { %2601 = vmatpush1.bf16.msra.mxu1 %v9075_v2  ;;  %v9150_v2 = vld [vmem:[#allocation7 + $0x460] ss:$16 sps:$4 sm:$0xff]  }
 0x113   : > { %2602 = vmatprep.subr.bf16.mxu1 %v9083_v4  ;;  %v9158_v4 = vld [vmem:[#allocation7 + $0x444] ss:$16 sps:$4 sm:$0xff]  }
 0x114   : > { %2560 = vmatpush1.bf16.msra.mxu0 %v9078_v22  ;;  %v9155_v22 = vld [vmem:[#allocation7 + $0xec] ss:$16 sps:$4 sm:$0xff]  }
 0x115   : > { %2561 = vmatprep.subr.bf16.mxu0 %v9086_v5  ;;  %v9153_v5 = vld [vmem:[#allocation7 + $0xe8] ss:$16 sps:$4 sm:$0xff]  }
 0x116   : > { %2603 = vmatpush1.bf16.msra.mxu1 %v9081_v6  ;;  %v9156_v6 = vld [vmem:[#allocation7 + $0x440] ss:$16 sps:$4 sm:$0xff]  }
 0x117   : > { %2604 = vmatprep.subr.bf16.mxu1 %v9089_v8  ;;  %v9164_v8 = vld [vmem:[#allocation7 + $0x424] ss:$16 sps:$4 sm:$0xff]  }
 0x118   : > { %2562 = vmatpush1.bf16.msra.mxu0 %v9084_v7  ;;  %v9161_v7 = vld [vmem:[#allocation7 + $0xcc] ss:$16 sps:$4 sm:$0xff]  }
 0x119   : > { %2563 = vmatprep.subr.bf16.mxu0 %v9092_v9  ;;  %v9159_v9 = vld [vmem:[#allocation7 + $0xc8] ss:$16 sps:$4 sm:$0xff]  }
 0x11a   : > { %2605 = vmatpush1.bf16.msra.mxu1 %v9087_v10  ;;  %v9162_v10 = vld [vmem:[#allocation7 + $0x420] ss:$16 sps:$4 sm:$0xff]  }
 0x11b   : > { %2606 = vmatprep.subr.bf16.mxu1 %v9095_v12  ;;  %v9170_v12 = vld [vmem:[#allocation7 + $0x404] ss:$16 sps:$4 sm:$0xff]  }
 0x11c   : > { %2564 = vmatpush1.bf16.msra.mxu0 %v9090_v11  ;;  %v9167_v11 = vld [vmem:[#allocation7 + $0xac] ss:$16 sps:$4 sm:$0xff]  }
 0x11d   : > { %2565 = vmatprep.subr.bf16.mxu0 %v9098_v13  ;;  %v9165_v13 = vld [vmem:[#allocation7 + $0xa8] ss:$16 sps:$4 sm:$0xff]  }
 0x11e   : > { %2607 = vmatpush1.bf16.msra.mxu1 %v9093_v14  ;;  %v9168_v14 = vld [vmem:[#allocation7 + $0x400] ss:$16 sps:$4 sm:$0xff]  }
 0x11f   : > { %2608 = vmatprep.subr.bf16.mxu1 %v9101_v16  ;;  %v9179_v16 = vld [vmem:[#allocation7 + $0x2ec] ss:$16 sps:$4 sm:$0xff]  }
 0x120   : > { %2566 = vmatpush1.bf16.msra.mxu0 %v9096_v15  ;;  %v9173_v15 = vld [vmem:[#allocation7 + $0x8c] ss:$16 sps:$4 sm:$0xff]  }
 0x121   : > { %2567 = vmatprep.subr.bf16.mxu0 %v9104_v17  ;;  %v9171_v17 = vld [vmem:[#allocation7 + $0x88] ss:$16 sps:$4 sm:$0xff]  }
 0x122   : > { %2609 = vmatpush1.bf16.msra.mxu1 %v9099_v20  ;;  %v9176_v20 = vld [vmem:[#allocation7 + $0x6c] ss:$16 sps:$4 sm:$0xff]  }
 0x123   : > { %2610 = vmatprep.subr.bf16.mxu1 %v9107_v24  ;;  %v9174_v24 = vld [vmem:[#allocation7 + $0x68] ss:$16 sps:$4 sm:$0xff]  }
 0x124   : > { %2568 = vmatpush2.bf16.msra.mxu0 %v9102_v23  ;;  %v9177_v23 = vld [vmem:[#allocation7 + $0x2e8] ss:$16 sps:$4 sm:$0xff]  }
 0x125   : > { %2569 = vmatprep.subr.bf16.mxu0 %v9110_v26  ;;  %v9182_v26 = vld [vmem:[#allocation7 + $0x4c] ss:$16 sps:$4 sm:$0xff]  }
 0x126   : > { %2611 = vmatpush2.bf16.msra.mxu1 %v9105_v27  ;;  %v9183_v27 = vld [vmem:[#allocation7 + $0x2c8] ss:$16 sps:$4 sm:$0xff]  }
 0x127   : > { %2612 = vmatprep.subr.bf16.mxu1 %v9113_v30  ;;  %v9180_v30 = vld [vmem:[#allocation7 + $0x48] ss:$16 sps:$4 sm:$0xff]  }
 0x128   : > { %2570 = vmatpush2.bf16.msra.mxu0 %v9108_v28  ;;  %v9191_v28 = vld [vmem:[#allocation7 + $0x2ac] ss:$16 sps:$4 sm:$0xff]  }
 0x129   : > { %2571 = vmatprep.subr.bf16.mxu0 %v9116_v31  ;;  %v9188_v31 = vld [vmem:[#allocation7 + $0x2c] ss:$16 sps:$4 sm:$0xff]  }
 0x12a   : > { %2613 = vmatpush2.bf16.msra.mxu1 %v9111_v32  ;;  %v9189_v32 = vld [vmem:[#allocation7 + $0x2a8] ss:$16 sps:$4 sm:$0xff]  }
 0x12b   : > { %2614 = vmatprep.subr.bf16.mxu1 %v9119_v34  ;;  %v9186_v34 = vld [vmem:[#allocation7 + $0x28] ss:$16 sps:$4 sm:$0xff]  }
 0x12c   : > { %2572 = vmatpush2.bf16.msra.mxu0 %v9114_v33  ;;  %v9197_v33 = vld [vmem:[#allocation7 + $0x28c] ss:$16 sps:$4 sm:$0xff]  }
 0x12d   : > { %2573 = vmatprep.subr.bf16.mxu0 %v9122_v37  ;;  %v9194_v37 = vld [vmem:[#allocation7 + $0xc] ss:$16 sps:$4 sm:$0xff]  }
 0x12e   : > { %2615 = vmatpush2.bf16.msra.mxu1 %v9117_v38  ;;  %v9195_v38 = vld [vmem:[#allocation7 + $0x288] ss:$16 sps:$4 sm:$0xff]  }
 0x12f   : > { %2616 = vmatprep.subr.bf16.mxu1 %v9125_v40  ;;  %v9192_v40 = vld [vmem:[#allocation7 + $0x8] ss:$16 sps:$4 sm:$0xff]  }
 0x130   : > { %2574 = vmatpush2.bf16.msra.mxu0 %v9120_v39  ;;  %v9203_v39 = vld [vmem:[#allocation7 + $0x26c] ss:$16 sps:$4 sm:$0xff]  }
 0x131   : > { %2575 = vmatprep.subr.bf16.mxu0 %v9128_v41  ;;  %v9200_v41 = vld [vmem:[#allocation7 + $0x1ec] ss:$16 sps:$4 sm:$0xff]  }
 0x132   : > { %2617 = vmatpush2.bf16.msra.mxu1 %v9123_v42  ;;  %v9209_v42 = vld [vmem:[#allocation7 + $0x24c] ss:$16 sps:$4 sm:$0xff]  }
 0x133   : > { %2618 = vmatprep.subr.bf16.mxu1 %v9131_v47  ;;  %v9206_v47 = vld [vmem:[#allocation7 + $0x1cc] ss:$16 sps:$4 sm:$0xff]  }
 0x134   : > { %2576 = vmatpush2.bf16.msra.mxu0 %v9126_v43  ;;  %v9198_v43 = vld [vmem:[#allocation7 + $0x1e8] ss:$16 sps:$4 sm:$0xff]  }
 0x135   : > { %2577 = vmatprep.subr.bf16.mxu0 %v9134_v44  ;;  %v9207_v44 = vld [vmem:[#allocation7 + $0x248] ss:$16 sps:$4 sm:$0xff]  }
 0x136   : > { %2619 = vmatpush2.bf16.msra.mxu1 %v9129_v45  ;;  %v9215_v45 = vld [vmem:[#allocation7 + $0x22c] ss:$16 sps:$4 sm:$0xff]  }
 0x137   : > { %2620 = vmatprep.subr.bf16.mxu1 %v9137_v51  ;;  %v9212_v51 = vld [vmem:[#allocation7 + $0x1ac] ss:$16 sps:$4 sm:$0xff]  }
 0x138   : > { %2578 = vmatpush2.bf16.msra.mxu0 %v9132_v48  ;;  %v9204_v48 = vld [vmem:[#allocation7 + $0x1c8] ss:$16 sps:$4 sm:$0xff]  }
 0x139   : > { %2579 = vmatprep.subr.bf16.mxu0 %v9140_v52  ;;  %v9213_v52 = vld [vmem:[#allocation7 + $0x228] ss:$16 sps:$4 sm:$0xff]  }
 0x13a   : > { %2621 = vmatpush2.bf16.msra.mxu1 %v9135_v53  ;;  %v9221_v53 = vld [vmem:[#allocation7 + $0x20c] ss:$16 sps:$4 sm:$0xff]  }
 0x13b   : > { %2622 = vmatprep.subr.bf16.mxu1 %v9143_v56  ;;  %v9218_v56 = vld [vmem:[#allocation7 + $0x18c] ss:$16 sps:$4 sm:$0xff]  }
 0x13c   : > { %2580 = vmatpush2.bf16.msra.mxu0 %v9138_v54  ;;  %v9210_v54 = vld [vmem:[#allocation7 + $0x1a8] ss:$16 sps:$4 sm:$0xff]  }
 0x13d   : > { %2581 = vmatprep.subr.bf16.mxu0 %v9146_v57  ;;  %v9219_v57 = vld [vmem:[#allocation7 + $0x208] ss:$16 sps:$4 sm:$0xff]  }
 0x13e   : > { %2623 = vmatpush2.bf16.msra.mxu1 %v9141_v58  ;;  %v9227_v58 = vld [vmem:[#allocation7 + $0x3ec] ss:$16 sps:$4 sm:$0xff]  }
 0x13f   : > { %2624 = vmatprep.subr.bf16.mxu1 %v9149_v60  ;;  %v9224_v60 = vld [vmem:[#allocation7 + $0x16c] ss:$16 sps:$4 sm:$0xff]  }
 0x140   : > { %2582 = vmatpush2.bf16.msra.mxu0 %v9144_v59  ;;  %v9216_v59 = vld [vmem:[#allocation7 + $0x188] ss:$16 sps:$4 sm:$0xff]  }
 0x141   : > { %2645 = vmatprep.subr.bf16.mxu0 %v9152_v61  ;;  %v9225_v61 = vld [vmem:[#allocation7 + $0x3e8] ss:$16 sps:$4 sm:$0xff]  }
 0x142   : > { %2625 = vmatpush2.bf16.msra.mxu1 %v9147_v62  ;;  %v9233_v62 = vld [vmem:[#allocation7 + $0x3cc] ss:$16 sps:$4 sm:$0xff]  }
 0x143   : > { %2584 = vmatmul.mubr.bf16.vlgmr.msra.gmra.mxu0 %v10651_v55  ;;  %2680 = vmatprep.subr.bf16.mxu1 %v9155_v22  ;;  %v9230_v22 = vld [vmem:[#allocation7 + $0x14c] ss:$16 sps:$4 sm:$0xff]  }
 0x144   : > { %2646 = vmatpush1.bf16.msra.mxu0 %v9150_v2  ;;  %2669 = vmatprep.mubr.bf16.mxu0 %v10369_v0  ;;  %v9222_v2 = vld [vmem:[#allocation7 + $0x168] ss:$16 sps:$4 sm:$0xff]  }
 0x145   : > { %2647 = vmatprep.subr.bf16.mxu0 %v9158_v4  ;;  %2627 = vmatmul.mubr.bf16.vlgmr.msra.gmra.mxu1 %v10663_v3  ;;  %v9231_v4 = vld [vmem:[#allocation7 + $0x3c8] ss:$16 sps:$4 sm:$0xff]  }
 0x146   : > { %2681 = vmatpush1.bf16.msra.mxu1 %v9153_v5  ;;  %2712 = vmatprep.mubr.bf16.mxu1 %v10649_v50  ;;  %v9185_v50 = vld [vmem:[#allocation7 + $0x2cc] ss:$16 sps:$4 sm:$0xff]  }
 0x147   : > { %2682 = vmatprep.subr.bf16.mxu1 %v9161_v7  ;;  %v9239_v5 = vld [vmem:[#allocation7 + $0x3ac] ss:$16 sps:$4 sm:$0xff]  }
 0x148   : > { %2648 = vmatpush1.bf16.msra.mxu0 %v9156_v6  ;;  %v9228_v6 = vld [vmem:[#allocation7 + $0x148] ss:$16 sps:$4 sm:$0xff]   ;;  %v9236_v7 = vld [vmem:[#allocation7 + $0x12c] ss:$16 sps:$4 sm:$0xff]  }
 0x149   : > { %2649 = vmatprep.subr.bf16.mxu0 %v9164_v8  ;;  %v9237_v8 = vld [vmem:[#allocation7 + $0x3a8] ss:$16 sps:$4 sm:$0xff]  }
 0x14a   : > { %2683 = vmatpush1.bf16.msra.mxu1 %v9159_v9  ;;  %v9245_v9 = vld [vmem:[#allocation7 + $0x38c] ss:$16 sps:$4 sm:$0xff]  }
 0x14b   : > { %2684 = vmatprep.subr.bf16.mxu1 %v9167_v11  ;;  %v9242_v11 = vld [vmem:[#allocation7 + $0x10c] ss:$16 sps:$4 sm:$0xff]  }
 0x14c   : > { %2650 = vmatpush1.bf16.msra.mxu0 %v9162_v10  ;;  %v9234_v10 = vld [vmem:[#allocation7 + $0x128] ss:$16 sps:$4 sm:$0xff]  }
 0x14d   : > { %2651 = vmatprep.subr.bf16.mxu0 %v9170_v12  ;;  %v9243_v12 = vld [vmem:[#allocation7 + $0x388] ss:$16 sps:$4 sm:$0xff]  }
 0x14e   : > { %2685 = vmatpush1.bf16.msra.mxu1 %v9165_v13  ;;  %v9248_v13 = vld [vmem:[#allocation7 + $0x36c] ss:$16 sps:$4 sm:$0xff]  }
 0x14f   : > { %2686 = vmatprep.subr.bf16.mxu1 %v9173_v15  ;;  %v9246_v15 = vld [vmem:[#allocation7 + $0x368] ss:$16 sps:$4 sm:$0xff]  }
 0x150   : > { %2652 = vmatpush1.bf16.msra.mxu0 %v9168_v14  ;;  %v9240_v14 = vld [vmem:[#allocation7 + $0x108] ss:$16 sps:$4 sm:$0xff]  }
 0x151   : > { %2723 = vmatprep.subr.bf16.mxu0 %v9179_v16  ;;  %v9251_v16 = vld [vmem:[#allocation7 + $0x46c] ss:$16 sps:$4 sm:$0xff]  }
 0x152   : > { %2687 = vmatpush1.bf16.msra.mxu1 %v9171_v17  ;;  %v9254_v17 = vld [vmem:[#allocation7 + $0x34c] ss:$16 sps:$4 sm:$0xff]  }
 0x153   : > { %8113 = vmatmul.mubr.msk.bf16.vlgmr.msra.gmra.mxu0 %vm1563_vm0, %v10718_v63  ;;  %2688 = vmatprep.subr.bf16.mxu1 %v9176_v20  ;;  %v9249_v20 = vld [vmem:[#allocation7 + $0x468] ss:$16 sps:$4 sm:$0xff]  }
 0x154   : > { %2724 = vmatpush1.bf16.msra.mxu0 %v9177_v23  ;;  %2755 = vmatprep.mubr.bf16.mxu0 %v10660_v1  ;;  %v9201_v1 = vld [vmem:[#allocation7 + $0x268] ss:$16 sps:$4 sm:$0xff]  }
 0x155   : > { %2725 = vmatprep.subr.bf16.mxu0 %v9185_v50  ;;  %v9252_v23 = vld [vmem:[#allocation7 + $0x348] ss:$16 sps:$4 sm:$0xff]   ;;  %v9257_v50 = vld [vmem:[#allocation7 + $0x44c] ss:$16 sps:$4 sm:$0xff]  }
 0x156   : > { %2689 = vmatpush1.bf16.msra.mxu1 %v9174_v24  ;;  %v9260_v24 = vld [vmem:[#allocation7 + $0x32c] ss:$16 sps:$4 sm:$0xff]  }
 0x157   : > { %2690 = vmatprep.subr.bf16.mxu1 %v9182_v26  ;;  %v9255_v26 = vld [vmem:[#allocation7 + $0x448] ss:$16 sps:$4 sm:$0xff]  }
 0x158   : > { %2726 = vmatpush1.bf16.msra.mxu0 %v9183_v27  ;;  %v10743_v27 = vld [vmem:[#allocation2] sm:$0xee] }
 0x159   : > { %2727 = vmatprep.subr.bf16.mxu0 %v9191_v28  ;;  %v9258_v28 = vld [vmem:[#allocation7 + $0x328] ss:$16 sps:$4 sm:$0xff]  }
 0x15a   : > { %2691 = vmatpush1.bf16.msra.mxu1 %v9180_v30  ;;  %v9263_v30 = vld [vmem:[#allocation7 + $0x42c] ss:$16 sps:$4 sm:$0xff]  }
 0x15b   : > { %2692 = vmatprep.subr.bf16.mxu1 %v9188_v31  ;;  %v9266_v31 = vld [vmem:[#allocation7 + $0x30c] ss:$16 sps:$4 sm:$0xff]  }
 0x15c   : > { %2728 = vmatpush1.bf16.msra.mxu0 %v9189_v32  ;;  %v10745_v32 = vld [vmem:[#allocation2 + $0x8] sm:$0xee] }
 0x15d   : > { %2729 = vmatprep.subr.bf16.mxu0 %v9197_v33  ;;  %v9261_v33 = vld [vmem:[#allocation7 + $0x428] ss:$16 sps:$4 sm:$0xff]  }
 0x15e   : > { %2693 = vmatpush1.bf16.msra.mxu1 %v9186_v34  ;;  %v10747_v34 = vld [vmem:[#allocation2 + $0x14] sm:$0xff] }
 0x15f   : > { %2694 = vmatprep.subr.bf16.mxu1 %v9194_v37  ;;  %v9264_v37 = vld [vmem:[#allocation7 + $0x308] ss:$16 sps:$4 sm:$0xff]  }
 0x160   : > { %2730 = vmatpush1.bf16.msra.mxu0 %v9195_v38  ;;  %v9269_v38 = vld [vmem:[#allocation7 + $0x40c] ss:$16 sps:$4 sm:$0xff]  }
 0x161   : > { %2731 = vmatprep.subr.bf16.mxu0 %v9203_v39  ;;  %v10751_v39 = vld [vmem:[#allocation2 + $0x1c] sm:$0xff] }
 0x162   : > { %2695 = vmatpush1.bf16.msra.mxu1 %v9192_v40  ;;  %v8118_v40 = vcombine.high %v10745_v32, %v10751_v39 }
 0x163   : > { %2696 = vmatprep.subr.bf16.mxu1 %v9200_v41  ;;  %v9267_v41 = vld [vmem:[#allocation7 + $0x408] ss:$16 sps:$4 sm:$0xff]  }
 0x164   : > { %2732 = vmatpush1.bf16.msra.mxu0 %v9201_v1  ;;  %v9272_v1 = vld [vmem:[#allocation7 + $0x9e4] ss:$16 sps:$4 sm:$0xff]  }
 0x165   : > { %2733 = vmatprep.subr.bf16.mxu0 %v9209_v42 }
 0x166   : > { %2697 = vmatpush2.bf16.msra.mxu1 %v9198_v43  ;;  %v2975_v43 = vrot.slane %v10683_v19, 1  ;;  %v9276_v19 = vld [vmem:[#allocation7 + $0x9c0] ss:$16 sps:$4 sm:$0xff]  }
 0x167   : > { %2698 = vmatprep.subr.bf16.mxu1 %v9206_v47  ;;  %v9270_v47 = vld [vmem:[#allocation7 + $0x9e0] ss:$16 sps:$4 sm:$0xff]  }
 0x168   : > { %2734 = vmatpush1.bf16.msra.mxu0 %v9207_v44  ;;  %v9275_v44 = vld [vmem:[#allocation7 + $0xbe4] ss:$16 sps:$4 sm:$0xff]  }
 0x169   : > { %2735 = vmatprep.subr.bf16.mxu0 %v9215_v45  ;;  %v9278_v45 = vld [vmem:[#allocation7 + $0x9c4] ss:$16 sps:$4 sm:$0xff]  }
 0x16a   : > { %2699 = vmatpush2.bf16.msra.mxu1 %v9204_v48  ;;  %v2980_v48 = vrot.slane %v8118_v40, 1  ;;  %v9329_v40 = vld [vmem:[#allocation7 + $0xcc4] ss:$16 sps:$4 sm:$0xff]  }
 0x16b   : > { %2700 = vmatprep.subr.bf16.mxu1 %v9212_v51  ;;  %v2981_v51 = vrot.slane %v10693_v35, 1  ;;  %v9287_v35 = vld [vmem:[#allocation7 + $0xba4] ss:$16 sps:$4 sm:$0xff]  }
 0x16c   : > { %2736 = vmatpush1.bf16.msra.mxu0 %v9213_v52  ;;  %v9273_v52 = vld [vmem:[#allocation7 + $0xbe0] ss:$16 sps:$4 sm:$0xff]  }
 0x16d   : > { %2737 = vmatprep.subr.bf16.mxu0 %v9221_v53 }
 0x16e   : > { %2701 = vmatpush2.bf16.msra.mxu1 %v9210_v54  ;;  %v9281_v54 = vld [vmem:[#allocation7 + $0xbc4] ss:$16 sps:$4 sm:$0xff]  }
 0x16f   : > { %2702 = vmatprep.subr.bf16.mxu1 %v9218_v56  ;;  %v10762_v56 = vsel %vm2970_vm5, %v2980_v48, %v2981_v51  ;;  %v9338_v48 = vld [vmem:[#allocation7 + $0xa84] ss:$16 sps:$4 sm:$0xff]  }
 0x170   : > { %2738 = vmatpush1.bf16.msra.mxu0 %v9219_v57  ;;  %v9279_v57 = vld [vmem:[#allocation7 + $0xbc0] ss:$16 sps:$4 sm:$0xff]  }
 0x171   : > { %2739 = vmatprep.subr.bf16.mxu0 %v9227_v58  ;;  %v9284_v58 = vld [vmem:[#allocation7 + $0x9a4] ss:$16 sps:$4 sm:$0xff]  }
 0x172   : > { %2703 = vmatpush2.bf16.msra.mxu1 %v9216_v59  ;;  %v9290_v59 = vld [vmem:[#allocation7 + $0x984] ss:$16 sps:$4 sm:$0xff]  }
 0x173   : > { %2704 = vmatprep.subr.bf16.mxu1 %v9224_v60  ;;  %v9285_v60 = vld [vmem:[#allocation7 + $0xba0] ss:$16 sps:$4 sm:$0xff]  }
 0x174   : > { %2740 = vmatpush2.bf16.msra.mxu0 %v9225_v61  ;;  %v9288_v61 = vld [vmem:[#allocation7 + $0x980] ss:$16 sps:$4 sm:$0xff]  }
 0x175   : > { %2741 = vmatprep.subr.bf16.mxu0 %v9233_v62  ;;  %v9293_v62 = vld [vmem:[#allocation7 + $0xb84] ss:$16 sps:$4 sm:$0xff]  }
 0x176   : > { %2705 = vmatpush2.bf16.msra.mxu1 %v9222_v2  ;;  %v9296_v2 = vld [vmem:[#allocation7 + $0x964] ss:$16 sps:$4 sm:$0xff]  }
 0x177   : > { %2706 = vmatprep.subr.bf16.mxu1 %v9230_v22  ;;  %v9291_v22 = vld [vmem:[#allocation7 + $0xb80] ss:$16 sps:$4 sm:$0xff]  }
 0x178   : > { %2742 = vmatpush2.bf16.msra.mxu0 %v9231_v4  ;;  %v9299_v4 = vld [vmem:[#allocation7 + $0xb64] ss:$16 sps:$4 sm:$0xff]  }
 0x179   : > { %2743 = vmatprep.subr.bf16.mxu0 %v9239_v5  ;;  %v9302_v5 = vld [vmem:[#allocation7 + $0x944] ss:$16 sps:$4 sm:$0xff]  }
 0x17a   : > { %2707 = vmatpush2.bf16.msra.mxu1 %v9228_v6  ;;  %v9297_v6 = vld [vmem:[#allocation7 + $0xb60] ss:$16 sps:$4 sm:$0xff]  }
 0x17b   : > { %2708 = vmatprep.subr.bf16.mxu1 %v9236_v7  ;;  %v9300_v7 = vld [vmem:[#allocation7 + $0x940] ss:$16 sps:$4 sm:$0xff]  }
 0x17c   : > { %2744 = vmatpush2.bf16.msra.mxu0 %v9237_v8  ;;  %v9305_v8 = vld [vmem:[#allocation7 + $0xb44] ss:$16 sps:$4 sm:$0xff]  }
 0x17d   : > { %2745 = vmatprep.subr.bf16.mxu0 %v9245_v9  ;;  %v9308_v9 = vld [vmem:[#allocation7 + $0x924] ss:$16 sps:$4 sm:$0xff]  }
 0x17e   : > { %2709 = vmatpush2.bf16.msra.mxu1 %v9234_v10  ;;  %v9303_v10 = vld [vmem:[#allocation7 + $0xb40] ss:$16 sps:$4 sm:$0xff]  }
 0x17f   : > { %2710 = vmatprep.subr.bf16.mxu1 %v9242_v11  ;;  %v9306_v11 = vld [vmem:[#allocation7 + $0x920] ss:$16 sps:$4 sm:$0xff]  }
 0x180   : > { %2746 = vmatpush2.bf16.msra.mxu0 %v9243_v12  ;;  %v9311_v12 = vld [vmem:[#allocation7 + $0xb24] ss:$16 sps:$4 sm:$0xff]  }
 0x181   : > { %2747 = vmatprep.subr.bf16.mxu0 %v9248_v13  ;;  %v10768_v13 = vpop.f32.mrf.mxu0 }
 0x182   : > { %2711 = vmatpush2.bf16.msra.mxu1 %v9240_v14  ;;  %v9314_v14 = vld [vmem:[#allocation7 + $0x904] ss:$16 sps:$4 sm:$0xff]  }
 0x183   : > { %2774 = vmatprep.subr.bf16.mxu1 %v9251_v16  ;;  %v10770_v16 = vpop.f32.mrf.mxu1 }
 0x184   : > { %2748 = vmatpush2.bf16.msra.mxu0 %v9246_v15  ;;  %v9309_v15 = vld [vmem:[#allocation7 + $0xb20] ss:$16 sps:$4 sm:$0xff]  }
 0x185   : > { %2749 = vmatprep.subr.bf16.mxu0 %v9254_v17  ;;  %2713 = vmatmul.mubr.bf16.vlgmr.msra.gmra.mxu1 %v10651_v55  ;;  %v8116_v55 = vcombine.high %v10743_v27, %v10747_v34  ;;  %v9312_v17 = vld [vmem:[#allocation7 + $0x900] ss:$16 sps:$4 sm:$0xff]  }
 0x186   : > { %2775 = vmatpush1.bf16.msra.mxu1 %v9249_v20  ;;  %2798 = vmatprep.mubr.bf16.mxu1 %v10369_v0  ;;  %v9317_v20 = vld [vmem:[#allocation7 + $0xb04] ss:$16 sps:$4 sm:$0xff]  }
 0x187   : > { %2776 = vmatprep.subr.bf16.mxu1 %v9257_v50  ;;  %v2974_v42 = vrot.slane %v8116_v55, 1  ;;  %v9320_v50 = vld [vmem:[#allocation7 + $0xae4] ss:$16 sps:$4 sm:$0xff]   ;;  %v9321_v55 = vld [vmem:[#allocation7 + $0xce0] ss:$16 sps:$4 sm:$0xff]  }
 0x188   : > { %2750 = vmatpush2.bf16.msra.mxu0 %v9252_v23  ;;  %v10772_v23 = vpop.f32.mrf.mxu0 }
 0x189   : > { %2751 = vmatprep.subr.bf16.mxu0 %v9260_v24  ;;  %v10758_v53 = vsel %vm2970_vm5, %v2974_v42, %v2975_v43  ;;  %v9315_v24 = vld [vmem:[#allocation7 + $0xb00] ss:$16 sps:$4 sm:$0xff]  }
 0x18a   : > { %2777 = vmatpush1.bf16.msra.mxu1 %v9255_v26  ;;  %v10774_v26 = vpop.f32.mrf.mxu1  ;;  %v9327_v43 = vld [vmem:[#allocation7 + $0xcc0] ss:$16 sps:$4 sm:$0xff]  }
 0x18b   : > { %2778 = vmatprep.subr.bf16.mxu1 %v9263_v30  ;;  %v9323_v30 = vld [vmem:[#allocation7 + $0xce4] ss:$16 sps:$4 sm:$0xff]  }
 0x18c   : > { %2752 = vmatpush2.bf16.msra.mxu0 %v9258_v28  ;;  %v9318_v28 = vld [vmem:[#allocation7 + $0xae0] ss:$16 sps:$4 sm:$0xff]  }
 0x18d   : > { %2753 = vmatprep.subr.bf16.mxu0 %v9266_v31  ;;  %v10776_v31 = vpop.f32.mrf.mxu0 }
 0x18e   : > { %2779 = vmatpush1.bf16.msra.mxu1 %v9261_v33  ;;  %v9326_v33 = vld [vmem:[#allocation7 + $0xac4] ss:$16 sps:$4 sm:$0xff]  }
 0x18f   : > { %2780 = vmatprep.subr.bf16.mxu1 %v9269_v38  ;;  %v9324_v38 = vld [vmem:[#allocation7 + $0xac0] ss:$16 sps:$4 sm:$0xff]  }
 0x190   : > { %2754 = vmatpush2.bf16.msra.mxu0 %v9264_v37  ;;  %v10778_v37 = vpop.f32.mrf.mxu1 }
 0x191   : > { %3713 = vmatprep.subr.bf16.mxu0 %v9272_v1  ;;  %v9332_v1 = vld [vmem:[#allocation7 + $0xaa4] ss:$16 sps:$4 sm:$0xff]  }
 0x192   : > { %2781 = vmatpush1.bf16.msra.mxu1 %v9267_v41  ;;  %v10780_v41 = vpop.f32.mrf.mxu0 }
 0x193   : > { %2756 = vmatmul.mubr.bf16.vlgmr.msra.gmra.mxu0 %v10663_v3  ;;  %3756 = vmatprep.subr.bf16.mxu1 %v9275_v44  ;;  %v9282_v3 = vld [vmem:[#allocation7 + $0x9a0] ss:$16 sps:$4 sm:$0xff]  }
 0x194   : > { %3714 = vmatpush1.bf16.msra.mxu0 %v9270_v47  ;;  %3745 = vmatprep.mubr.bf16.mxu0 %v10758_v53  ;;  %v10782_v42 = vpop.f32.mrf.mxu0  ;;  %v10784_v47 = vpop.f32.mrf.mxu1  ;;  %v9330_v44 = vld [vmem:[#allocation7 + $0xaa0] ss:$16 sps:$4 sm:$0xff]  }
 0x195   : > { %3715 = vmatprep.subr.bf16.mxu0 %v9278_v45  ;;  %8114 = vmatmul.mubr.msk.bf16.vlgmr.msra.gmra.mxu1 %vm1563_vm0, %v10718_v63  ;;  %v9294_v63 = vld [vmem:[#allocation7 + $0x960] ss:$16 sps:$4 sm:$0xff]   ;;  %v9335_v45 = vld [vmem:[#allocation7 + $0xca4] ss:$16 sps:$4 sm:$0xff]  }
 0x196   : > { %3757 = vmatpush1.bf16.msra.mxu1 %v9273_v52  ;;  %3788 = vmatprep.mubr.bf16.mxu1 %v10762_v56  ;;  %v10786_v52 = vpop.f32.mrf.mxu0 }
 0x197   : > { %3758 = vmatprep.subr.bf16.mxu1 %v9281_v54  ;;  %v9336_v54 = vld [vmem:[#allocation7 + $0xa80] ss:$16 sps:$4 sm:$0xff]  }
 0x198   : > { %3716 = vmatpush1.bf16.msra.mxu0 %v9276_v19  ;;  %v9333_v19 = vld [vmem:[#allocation7 + $0xca0] ss:$16 sps:$4 sm:$0xff]  }
 0x199   : > { %3717 = vmatprep.subr.bf16.mxu0 %v9284_v58  ;;  %v9344_v58 = vld [vmem:[#allocation7 + $0xa64] ss:$16 sps:$4 sm:$0xff]  }
 0x19a   : > { %3759 = vmatpush1.bf16.msra.mxu1 %v9279_v57  ;;  %v9341_v57 = vld [vmem:[#allocation7 + $0xc84] ss:$16 sps:$4 sm:$0xff]  }
 0x19b   : > { %3760 = vmatprep.subr.bf16.mxu1 %v9287_v35  ;;  %v10788_v35 = vpop.f32.mrf.mxu0 }
 0x19c   : > { %3718 = vmatpush1.bf16.msra.mxu0 %v9282_v3 }
 0x19d   : > { %3719 = vmatprep.subr.bf16.mxu0 %v9290_v59  ;;  %v9339_v59 = vld [vmem:[#allocation7 + $0xc80] ss:$16 sps:$4 sm:$0xff]  }
 0x19e   : > { %3761 = vmatpush1.bf16.msra.mxu1 %v9285_v60  ;;  %v9342_v60 = vld [vmem:[#allocation7 + $0xa60] ss:$16 sps:$4 sm:$0xff]  }
 0x19f   : > { %3762 = vmatprep.subr.bf16.mxu1 %v9293_v62  ;;  %v9350_v62 = vld [vmem:[#allocation7 + $0xa44] ss:$16 sps:$4 sm:$0xff]  }
 0x1a0   : > { %3720 = vmatpush1.bf16.msra.mxu0 %v9288_v61  ;;  %v9347_v61 = vld [vmem:[#allocation7 + $0xc64] ss:$16 sps:$4 sm:$0xff]  }
 0x1a1   : > { %3721 = vmatprep.subr.bf16.mxu0 %v9296_v2 }
 0x1a2   : > { %3763 = vmatpush1.bf16.msra.mxu1 %v9291_v22  ;;  %v10790_v22 = vpop.f32.mrf.mxu0 }
 0x1a3   : > { %3764 = vmatprep.subr.bf16.mxu1 %v9299_v4  ;;  %v9348_v4 = vld [vmem:[#allocation7 + $0xa40] ss:$16 sps:$4 sm:$0xff]  }
 0x1a4   : > { %3722 = vmatpush1.bf16.msra.mxu0 %v9294_v63  ;;  %v9345_v63 = vld [vmem:[#allocation7 + $0xc60] ss:$16 sps:$4 sm:$0xff]  }
 0x1a5   : > { %3723 = vmatprep.subr.bf16.mxu0 %v9302_v5  ;;  %v9353_v5 = vld [vmem:[#allocation7 + $0xc44] ss:$16 sps:$4 sm:$0xff]  }
 0x1a6   : > { %3765 = vmatpush1.bf16.msra.mxu1 %v9297_v6 }
 0x1a7   : > { %3766 = vmatprep.subr.bf16.mxu1 %v9305_v8 }
 0x1a8   : > { %3724 = vmatpush1.bf16.msra.mxu0 %v9300_v7  ;;  %v9356_v7 = vld [vmem:[#allocation7 + $0xa24] ss:$16 sps:$4 sm:$0xff]  }
 0x1a9   : > { %3725 = vmatprep.subr.bf16.mxu0 %v9308_v9 }
 0x1aa   : > { %3767 = vmatpush1.bf16.msra.mxu1 %v9303_v10 }
 0x1ab   : > { %3768 = vmatprep.subr.bf16.mxu1 %v9311_v12 }
 0x1ac   : > { %3726 = vmatpush1.bf16.msra.mxu0 %v9306_v11  ;;  %v9351_v11 = vld [vmem:[#allocation7 + $0xc40] ss:$16 sps:$4 sm:$0xff]  }
 0x1ad   : > { %3727 = vmatprep.subr.bf16.mxu0 %v9314_v14 }
 0x1ae   : > { %3769 = vmatpush1.bf16.msra.mxu1 %v9309_v15  ;;  %v9354_v15 = vld [vmem:[#allocation7 + $0xa20] ss:$16 sps:$4 sm:$0xff]  }
 0x1af   : > { %3770 = vmatprep.subr.bf16.mxu1 %v9317_v20 }
 0x1b0   : > { %3728 = vmatpush1.bf16.msra.mxu0 %v9312_v17  ;;  %v9359_v17 = vld [vmem:[#allocation7 + $0xc24] ss:$16 sps:$4 sm:$0xff]  }
 0x1b1   : > { %3729 = vmatprep.subr.bf16.mxu0 %v9320_v50 }
 0x1b2   : > { %3771 = vmatpush1.bf16.msra.mxu1 %v9315_v24  ;;  %v9362_v24 = vld [vmem:[#allocation7 + $0xa04] ss:$16 sps:$4 sm:$0xff]  }
 0x1b3   : > { %3772 = vmatprep.subr.bf16.mxu1 %v9323_v30 }
 0x1b4   : > { %3730 = vmatpush2.bf16.msra.mxu0 %v9318_v28 }
 0x1b5   : > { %3731 = vmatprep.subr.bf16.mxu0 %v9326_v33  ;;  %v1730_v51 = vpop.f32.mrf.mxu1  ;;  %v8115_v33 = vcombine.low %v10743_v27, %v10747_v34  ;;  %v2972_v34 = vrot.slane %v10685_v21, 1  ;;  %v9377_v21 = vld [vmem:[#allocation7 + $0x9cc] ss:$16 sps:$4 sm:$0xff]  }
 0x1b6   : > { %3773 = vmatpush2.bf16.msra.mxu1 %v9321_v55 }
 0x1b7   : > { %3774 = vmatprep.subr.bf16.mxu1 %v9329_v40  ;;  %v1732_v3 = vpop.f32.mrf.mxu1  ;;  %v9357_v40 = vld [vmem:[#allocation7 + $0xc20] ss:$16 sps:$4 sm:$0xff]   ;;  %v2971_v27 = vrot.slane %v8115_v33, 1  ;;  %v9393_v33 = vld [vmem:[#allocation7 + $0xbe8] ss:$16 sps:$4 sm:$0xff]  }
 0x1b8   : > { %3732 = vmatpush2.bf16.msra.mxu0 %v9324_v38 }
 0x1b9   : > { %3733 = vmatprep.subr.bf16.mxu0 %v9332_v1  ;;  %v1734_v2 = vpop.f32.mrf.mxu1 }
 0x1ba   : > { %3775 = vmatpush2.bf16.msra.mxu1 %v9327_v43 }
 0x1bb   : > { %3776 = vmatprep.subr.bf16.mxu1 %v9335_v45  ;;  %v1736_v8 = vpop.f32.mrf.mxu1  ;;  %v9365_v45 = vld [vmem:[#allocation7 + $0xc04] ss:$16 sps:$4 sm:$0xff]  }
 0x1bc   : > { %3734 = vmatpush2.bf16.msra.mxu0 %v9330_v44  ;;  %v9360_v44 = vld [vmem:[#allocation7 + $0xa00] ss:$16 sps:$4 sm:$0xff]  }
 0x1bd   : > { %3735 = vmatprep.subr.bf16.mxu0 %v9338_v48 }
 0x1be   : > { %3777 = vmatpush2.bf16.msra.mxu1 %v9333_v19  ;;  %v9368_v19 = vld [vmem:[#allocation7 + $0xd64] ss:$16 sps:$4 sm:$0xff]  }
 0x1bf   : > { %3778 = vmatprep.subr.bf16.mxu1 %v9341_v57 }
 0x1c0   : > { %3736 = vmatpush2.bf16.msra.mxu0 %v9336_v54 }
 0x1c1   : > { %3737 = vmatprep.subr.bf16.mxu0 %v9344_v58  ;;  %v9363_v58 = vld [vmem:[#allocation7 + $0xc00] ss:$16 sps:$4 sm:$0xff]  }
 0x1c2   : > { %3779 = vmatpush2.bf16.msra.mxu1 %v9339_v59  ;;  %v9371_v59 = vld [vmem:[#allocation7 + $0x9ec] ss:$16 sps:$4 sm:$0xff]  }
 0x1c3   : > { %v1773_v6 = vpop.f32.mrf.mxu0  ;;  %3780 = vmatprep.subr.bf16.mxu1 %v9347_v61  ;;  %v2978_v61 = vrot.slane %v10695_v36, 1  ;;  %v9375_v36 = vld [vmem:[#allocation7 + $0x9c8] ss:$16 sps:$4 sm:$0xff]  }
 0x1c4   : > { %v1774_v9 = vadd.f32 %v1773_v6, %v1730_v51  ;;  %3738 = vmatpush2.bf16.msra.mxu0 %v9342_v60  ;;  %v8117_v51 = vcombine.low %v10745_v32, %v10751_v39  ;;  %v10807_v32 = vsel %vm2970_vm5, %v2971_v27, %v2972_v34  ;;  %v9369_v39 = vld [vmem:[#allocation7 + $0x9e8] ss:$16 sps:$4 sm:$0xff]   ;;  %v9378_v6 = vld [vmem:[#allocation7 + $0xd20] ss:$16 sps:$4 sm:$0xff]   ;;  %v9410_v34 = vld [vmem:[#allocation7 + $0x90c] ss:$16 sps:$4 sm:$0xff]  }
 0x1c5   : > { %v1775_v10 = vpop.f32.mrf.mxu0  ;;  %3739 = vmatprep.subr.bf16.mxu0 %v9350_v62  ;;  %v1816_v12 = vpop.f32.mrf.mxu1  ;;  %v9374_v62 = vld [vmem:[#allocation7 + $0xd44] ss:$16 sps:$4 sm:$0xff]   ;;  %v9402_v27 = vld [vmem:[#allocation7 + $0x928] ss:$16 sps:$4 sm:$0xff]  }
 0x1c6   : > { %v1776_v14 = vadd.f32 %v1775_v10, %v1732_v3  ;;  %v10792_v20 = vadd.f32 %v1816_v12, %v1774_v9  ;;  %3781 = vmatpush2.bf16.msra.mxu1 %v9345_v63  ;;  %v9366_v3 = vld [vmem:[#allocation7 + $0xd60] ss:$16 sps:$4 sm:$0xff]   ;;  %v2977_v60 = vrot.slane %v8117_v51, 1  ;;  %v10142_v9 = vld [vmem:[#allocation2 + $0x24] sm:$0xf] }
 0x1c7   : > { %v1777_v50 = vpop.f32.mrf.mxu0  ;;  %v1818_v28 = vpop.f32.mrf.mxu1  ;;  %3782 = vmatprep.subr.bf16.mxu1 %v9353_v5  ;;  %v2811_v5 = vld [vmem:[#allocation2 + $0x10] sm:$0xe]  ;;  %v9384_v12 = vld [vmem:[#allocation7 + $0xd00] ss:$16 sps:$4 sm:$0xff]   ;;  %v9404_v51 = vld [vmem:[#allocation7 + $0x92c] ss:$16 sps:$4 sm:$0xff]  }
 0x1c8   : > { %v1778_v30 = vadd.f32 %v1777_v50, %v1734_v2  ;;  %3740 = vmatpush2.bf16.msra.mxu0 %v9348_v4  ;;  %v10796_v55 = vadd.f32 %v1818_v28, %v1776_v14  ;;  %v9372_v2 = vld [vmem:[#allocation7 + $0xd40] ss:$16 sps:$4 sm:$0xff]   ;;  %v10811_v63 = vsel %vm2970_vm5, %v2977_v60, %v2978_v61  ;;  %v9380_v4 = vld [vmem:[#allocation7 + $0xd24] ss:$16 sps:$4 sm:$0xff]   ;;  %v8119_v10 = vcombine.low %v2811_v5, %v10142_v9  ;;  %v9389_v14 = vld [vmem:[#allocation7 + $0x98c] ss:$16 sps:$4 sm:$0xff]  }
 0x1c9   : > { %v1779_v38 = vpop.f32.mrf.mxu0  ;;  %3741 = vmatprep.subr.bf16.mxu0 %v9356_v7  ;;  %v1820_v1 = vpop.f32.mrf.mxu1  ;;  %v9383_v7 = vld [vmem:[#allocation7 + $0x9ac] ss:$16 sps:$4 sm:$0xff]   ;;  %v9417_v61 = vld [vmem:[#allocation7 + $0xb68] ss:$16 sps:$4 sm:$0xff]  }
 0x1ca   : > { %v1780_v43 = vadd.f32 %v1779_v38, %v1736_v8  ;;  %v10798_v48 = vadd.f32 %v1820_v1, %v1778_v30  ;;  %3783 = vmatpush2.bf16.msra.mxu1 %v9351_v11  ;;  %v9386_v8 = vld [vmem:[#allocation7 + $0xd04] ss:$16 sps:$4 sm:$0xff]   ;;  %v9381_v11 = vld [vmem:[#allocation7 + $0x9a8] ss:$16 sps:$4 sm:$0xff]   ;;  %v9395_v28 = vld [vmem:[#allocation7 + $0xbec] ss:$16 sps:$4 sm:$0xff]  }
 0x1cb   : > { %v1822_v54 = vpop.f32.mrf.mxu1  ;;  %3784 = vmatprep.subr.bf16.mxu1 %v9359_v17  ;;  %v10143_v17 = vld [vmem:[#allocation2 + $0x38] ss:$0 sps:$4 sm:$0x11]   ;;  %v9392_v30 = vld [vmem:[#allocation7 + $0x96c] ss:$16 sps:$4 sm:$0xff]  }
 0x1cc   : > { %3742 = vmatpush2.bf16.msra.mxu0 %v9354_v15  ;;  %v10803_v57 = vadd.f32 %v1822_v54, %v1780_v43  ;;  %v2983_v15 = vrot.slane %v8119_v10, 1  ;;  %v2984_v50 = vrot.slane %v10143_v17, 1  ;;  %v9398_v1 = vld [vmem:[#allocation7 + $0x94c] ss:$16 sps:$4 sm:$0xff]   ;;  %v9399_v43 = vld [vmem:[#allocation7 + $0xbc8] ss:$16 sps:$4 sm:$0xff]  }
 0x1cd   : > { %3743 = vmatprep.subr.bf16.mxu0 %v9362_v24  ;;  %v9387_v24 = vld [vmem:[#allocation7 + $0x988] ss:$16 sps:$4 sm:$0xff]   ;;  %v9413_v54 = vld [vmem:[#allocation7 + $0xb8c] ss:$16 sps:$4 sm:$0xff]  }
 0x1ce   : > { %3785 = vmatpush2.bf16.msra.mxu1 %v9357_v40  ;;  %v10817_v38 = vsel %vm2970_vm5, %v2983_v15, %v2984_v50  ;;  %v9390_v40 = vld [vmem:[#allocation7 + $0x968] ss:$16 sps:$4 sm:$0xff]   ;;  %v9416_v60 = vld [vmem:[#allocation7 + $0xaec] ss:$16 sps:$4 sm:$0xff]  }
 0x1cf   : > { %3786 = vmatprep.subr.bf16.mxu1 %v9365_v45  ;;  %v9396_v45 = vld [vmem:[#allocation7 + $0x948] ss:$16 sps:$4 sm:$0xff]   ;;  %v9428_v5 = vld [vmem:[#allocation7 + $0xaac] ss:$16 sps:$4 sm:$0xff]  }
 0x1d0   : > { %3744 = vmatpush2.bf16.msra.mxu0 %v9360_v44  ;;  %v9407_v44 = vld [vmem:[#allocation7 + $0xbac] ss:$16 sps:$4 sm:$0xff]   ;;  %v9435_v9 = vld [vmem:[#allocation7 + $0xb08] ss:$16 sps:$4 sm:$0xff]  }
 0x1d1   : > { %3807 = vmatprep.subr.bf16.mxu0 %v9368_v19  ;;  %v9405_v19 = vld [vmem:[#allocation7 + $0xba8] ss:$16 sps:$4 sm:$0xff]   ;;  %v9443_v10 = vld [vmem:[#allocation7 + $0xcec] ss:$16 sps:$4 sm:$0xff]  }
 0x1d2   : > { %3787 = vmatpush2.bf16.msra.mxu1 %v9363_v58  ;;  %v9411_v58 = vld [vmem:[#allocation7 + $0xb88] ss:$16 sps:$4 sm:$0xff]   ;;  %v9449_v15 = vld [vmem:[#allocation7 + $0xccc] ss:$16 sps:$4 sm:$0xff]  }
 0x1d3   : > { %3746 = vmatmul.mubr.bf16.vlgmr.msra.gmra.mxu0 %v10807_v32  ;;  %3842 = vmatprep.subr.bf16.mxu1 %v9371_v59  ;;  %v9408_v59 = vld [vmem:[#allocation7 + $0x908] ss:$16 sps:$4 sm:$0xff]   ;;  %v9446_v50 = vld [vmem:[#allocation7 + $0xa4c] ss:$16 sps:$4 sm:$0xff]  }
 0x1d4   : > { %3808 = vmatpush1.bf16.msra.mxu0 %v9366_v3  ;;  %3831 = vmatprep.mubr.bf16.mxu0 %v10369_v0  ;;  %v9419_v3 = vld [vmem:[#allocation7 + $0xb6c] ss:$16 sps:$4 sm:$0xff]   ;;  %v9438_v17 = vld [vmem:[#allocation7 + $0xa68] ss:$16 sps:$4 sm:$0xff]  }
 0x1d5   : > { %3809 = vmatprep.subr.bf16.mxu0 %v9374_v62  ;;  %3789 = vmatmul.mubr.bf16.vlgmr.msra.gmra.mxu1 %v10811_v63  ;;  %v9414_v62 = vld [vmem:[#allocation7 + $0xae8] ss:$16 sps:$4 sm:$0xff]  }
 0x1d6   : > { %3843 = vmatpush1.bf16.msra.mxu1 %v9369_v39  ;;  %3874 = vmatprep.mubr.bf16.mxu1 %v10758_v53  ;;  %v9401_v53 = vld [vmem:[#allocation7 + $0xbcc] ss:$16 sps:$4 sm:$0xff]  }
 0x1d7   : > { %3844 = vmatprep.subr.bf16.mxu1 %v9377_v21  ;;  %v9422_v39 = vld [vmem:[#allocation7 + $0xacc] ss:$16 sps:$4 sm:$0xff]  }
 0x1d8   : > { %3810 = vmatpush1.bf16.msra.mxu0 %v9372_v2  ;;  %v9423_v2 = vld [vmem:[#allocation7 + $0xb48] ss:$16 sps:$4 sm:$0xff]   ;;  %v9431_v21 = vld [vmem:[#allocation7 + $0xb2c] ss:$16 sps:$4 sm:$0xff]  }
 0x1d9   : > { %3811 = vmatprep.subr.bf16.mxu0 %v9380_v4  ;;  %v9420_v4 = vld [vmem:[#allocation7 + $0xac8] ss:$16 sps:$4 sm:$0xff]  }
 0x1da   : > { %3845 = vmatpush1.bf16.msra.mxu1 %v9375_v36  ;;  %v9429_v36 = vld [vmem:[#allocation7 + $0xb28] ss:$16 sps:$4 sm:$0xff]  }
 0x1db   : > { %3846 = vmatprep.subr.bf16.mxu1 %v9383_v7  ;;  %v9426_v7 = vld [vmem:[#allocation7 + $0xaa8] ss:$16 sps:$4 sm:$0xff]  }
 0x1dc   : > { %3812 = vmatpush1.bf16.msra.mxu0 %v9378_v6  ;;  %v9437_v6 = vld [vmem:[#allocation7 + $0xb0c] ss:$16 sps:$4 sm:$0xff]  }
 0x1dd   : > { %3813 = vmatprep.subr.bf16.mxu0 %v9386_v8  ;;  %v9434_v8 = vld [vmem:[#allocation7 + $0xa8c] ss:$16 sps:$4 sm:$0xff]  }
 0x1de   : > { %3847 = vmatpush1.bf16.msra.mxu1 %v9381_v11  ;;  %v9432_v11 = vld [vmem:[#allocation7 + $0xa88] ss:$16 sps:$4 sm:$0xff]  }
 0x1df   : > { %3848 = vmatprep.subr.bf16.mxu1 %v9389_v14  ;;  %v9441_v14 = vld [vmem:[#allocation7 + $0xce8] ss:$16 sps:$4 sm:$0xff]  }
 0x1e0   : > { %3814 = vmatpush1.bf16.msra.mxu0 %v9384_v12  ;;  %v9440_v12 = vld [vmem:[#allocation7 + $0xa6c] ss:$16 sps:$4 sm:$0xff]  }
 0x1e1   : > { %3885 = vmatprep.subr.bf16.mxu0 %v9395_v28  ;;  %v9455_v28 = vld [vmem:[#allocation7 + $0xcac] ss:$16 sps:$4 sm:$0xff]  }
 0x1e2   : > { %3849 = vmatpush1.bf16.msra.mxu1 %v9387_v24  ;;  %v9447_v24 = vld [vmem:[#allocation7 + $0xcc8] ss:$16 sps:$4 sm:$0xff]  }
 0x1e3   : > { %8264 = vmatmul.mubr.msk.bf16.vlgmr.msra.gmra.mxu0 %vm1563_vm0, %v10817_v38  ;;  %3850 = vmatprep.subr.bf16.mxu1 %v9392_v30  ;;  %v9444_v30 = vld [vmem:[#allocation7 + $0xa48] ss:$16 sps:$4 sm:$0xff]  }
 0x1e4   : > { %3886 = vmatpush1.bf16.msra.mxu0 %v9393_v33  ;;  %3917 = vmatprep.mubr.bf16.mxu0 %v10762_v56  ;;  %v9425_v56 = vld [vmem:[#allocation7 + $0xb4c] ss:$16 sps:$4 sm:$0xff]  }
 0x1e5   : > { %3887 = vmatprep.subr.bf16.mxu0 %v9401_v53  ;;  %v9452_v33 = vld [vmem:[#allocation7 + $0xa2c] ss:$16 sps:$4 sm:$0xff]   ;;  %v9453_v53 = vld [vmem:[#allocation7 + $0xca8] ss:$16 sps:$4 sm:$0xff]  }
 0x1e6   : > { %3851 = vmatpush1.bf16.msra.mxu1 %v9390_v40  ;;  %v9461_v40 = vld [vmem:[#allocation7 + $0xc8c] ss:$16 sps:$4 sm:$0xff]  }
 0x1e7   : > { %3852 = vmatprep.subr.bf16.mxu1 %v9398_v1  ;;  %v9450_v1 = vld [vmem:[#allocation7 + $0xa28] ss:$16 sps:$4 sm:$0xff]  }
 0x1e8   : > { %3888 = vmatpush1.bf16.msra.mxu0 %v9399_v43  ;;  %v9458_v43 = vld [vmem:[#allocation7 + $0xa0c] ss:$16 sps:$4 sm:$0xff]  }
 0x1e9   : > { %3889 = vmatprep.subr.bf16.mxu0 %v9407_v44  ;;  %v9459_v44 = vld [vmem:[#allocation7 + $0xc88] ss:$16 sps:$4 sm:$0xff]  }
 0x1ea   : > { %3853 = vmatpush1.bf16.msra.mxu1 %v9396_v45  ;;  %v9464_v45 = vld [vmem:[#allocation7 + $0xc6c] ss:$16 sps:$4 sm:$0xff]  }
 0x1eb   : > { %3854 = vmatprep.subr.bf16.mxu1 %v9404_v51  ;;  %v9456_v51 = vld [vmem:[#allocation7 + $0xa08] ss:$16 sps:$4 sm:$0xff]  }
 0x1ec   : > { %3890 = vmatpush1.bf16.msra.mxu0 %v9405_v19  ;;  %v9462_v19 = vld [vmem:[#allocation7 + $0xc68] ss:$16 sps:$4 sm:$0xff]  }
 0x1ed   : > { %3891 = vmatprep.subr.bf16.mxu0 %v9413_v54  ;;  %v9467_v54 = vld [vmem:[#allocation7 + $0xd6c] ss:$16 sps:$4 sm:$0xff]  }
 0x1ee   : > { %3855 = vmatpush1.bf16.msra.mxu1 %v9402_v27  ;;  %v9470_v27 = vld [vmem:[#allocation7 + $0xc4c] ss:$16 sps:$4 sm:$0xff]  }
 0x1ef   : > { %3856 = vmatprep.subr.bf16.mxu1 %v9410_v34  ;;  %v9465_v34 = vld [vmem:[#allocation7 + $0xd68] ss:$16 sps:$4 sm:$0xff]  }
 0x1f0   : > { %3892 = vmatpush1.bf16.msra.mxu0 %v9411_v58  ;;  %v9468_v58 = vld [vmem:[#allocation7 + $0xc48] ss:$16 sps:$4 sm:$0xff]  }
 0x1f1   : > { %3893 = vmatprep.subr.bf16.mxu0 %v9419_v3  ;;  %v9473_v3 = vld [vmem:[#allocation7 + $0xd4c] ss:$16 sps:$4 sm:$0xff]  }
 0x1f2   : > { %3857 = vmatpush1.bf16.msra.mxu1 %v9408_v59  ;;  %v9476_v59 = vld [vmem:[#allocation7 + $0xc2c] ss:$16 sps:$4 sm:$0xff]  }
 0x1f3   : > { %3858 = vmatprep.subr.bf16.mxu1 %v9416_v60  ;;  %v9471_v60 = vld [vmem:[#allocation7 + $0xd48] ss:$16 sps:$4 sm:$0xff]  }
 0x1f4   : > { %3894 = vmatpush1.bf16.msra.mxu0 %v9417_v61  ;;  %v9474_v61 = vld [vmem:[#allocation7 + $0xc28] ss:$16 sps:$4 sm:$0xff]  }
 0x1f5   : > { %3895 = vmatprep.subr.bf16.mxu0 %v9425_v56  ;;  %v9479_v56 = vld [vmem:[#allocation7 + $0xd2c] ss:$16 sps:$4 sm:$0xff]  }
 0x1f6   : > { %3859 = vmatpush2.bf16.msra.mxu1 %v9414_v62  ;;  %v9482_v62 = vld [vmem:[#allocation7 + $0xc0c] ss:$16 sps:$4 sm:$0xff]  }
 0x1f7   : > { %3860 = vmatprep.subr.bf16.mxu1 %v9422_v39  ;;  %v9477_v39 = vld [vmem:[#allocation7 + $0xd28] ss:$16 sps:$4 sm:$0xff]  }
 0x1f8   : > { %3896 = vmatpush1.bf16.msra.mxu0 %v9423_v2  ;;  %v9480_v2 = vld [vmem:[#allocation7 + $0xc08] ss:$16 sps:$4 sm:$0xff]  }
 0x1f9   : > { %3897 = vmatprep.subr.bf16.mxu0 %v9431_v21  ;;  %v9485_v21 = vld [vmem:[#allocation7 + $0xd0c] ss:$16 sps:$4 sm:$0xff]  }
 0x1fa   : > { %3861 = vmatpush2.bf16.msra.mxu1 %v9420_v4  ;;  %v9483_v4 = vld [vmem:[#allocation7 + $0xd08] ss:$16 sps:$4 sm:$0xff]  }
 0x1fb   : > { %3862 = vmatprep.subr.bf16.mxu1 %v9428_v5  ;;  %v9488_v5 = vld [vmem:[#allocation10 + $0x564] ss:$16 sps:$4 sm:$0xff]  }
 0x1fc   : > { %3898 = vmatpush1.bf16.msra.mxu0 %v9429_v36  ;;  %v9486_v36 = vld [vmem:[#allocation10 + $0x560] ss:$16 sps:$4 sm:$0xff]  }
 0x1fd   : > { %3899 = vmatprep.subr.bf16.mxu0 %v9437_v6  ;;  %v9489_v6 = vld [vmem:[#allocation10 + $0x540] ss:$16 sps:$4 sm:$0xff]  }
 0x1fe   : > { %3863 = vmatpush2.bf16.msra.mxu1 %v9426_v7  ;;  %v9494_v7 = vld [vmem:[#allocation10 + $0x524] ss:$16 sps:$4 sm:$0xff]  }
 0x1ff   : > { %3864 = vmatprep.subr.bf16.mxu1 %v9434_v8  ;;  %v9492_v8 = vld [vmem:[#allocation10 + $0x520] ss:$16 sps:$4 sm:$0xff]  }
 0x200   : > { %3900 = vmatpush1.bf16.msra.mxu0 %v9435_v9  ;;  %v9497_v9 = vld [vmem:[#allocation10 + $0x504] ss:$16 sps:$4 sm:$0xff]  }
 0x201   : > { %3901 = vmatprep.subr.bf16.mxu0 %v9443_v10  ;;  %v336_v10 = vld [vmem:[#allocation3] sm:$0x11] }
 0x202   : > { %3865 = vmatpush2.bf16.msra.mxu1 %v9432_v11  ;;  %v9495_v11 = vld [vmem:[#allocation10 + $0x500] ss:$16 sps:$4 sm:$0xff]  }
 0x203   : > { %3866 = vmatprep.subr.bf16.mxu1 %v9440_v12  ;;  %v337_v12 = vsel %vm10591_vm11, 0, %v336_v10  ;;  %v351_v10 = vld [vmem:[#allocation3 + $0x38] sm:$0x1] }
 0x204   : > { %3902 = vmatpush2.bf16.msra.mxu0 %v9441_v14  ;;  %v9500_v14 = vld [vmem:[#allocation10 + $0x4e4] ss:$16 sps:$4 sm:$0xff]   ;;  %338 = vst [vmem:[#allocation3] sm:$0x11] %v337_v12 }
 0x205   : > { %3903 = vmatprep.subr.bf16.mxu0 %v9449_v15  ;;  %v9503_v15 = vld [vmem:[#allocation10 + $0x4c4] ss:$16 sps:$4 sm:$0xff]  }
 0x206   : > { %3867 = vmatpush2.bf16.msra.mxu1 %v9438_v17  ;;  %v345_v17 = vld [vmem:[#allocation3 + $0x28] sm:$0x11]  ;;  %v9547_v12 = vld [vmem:[#allocation10 + $0x744] ss:$16 sps:$4 sm:$0xff]  }
 0x207   : > { %3868 = vmatprep.subr.bf16.mxu1 %v9446_v50  ;;  %v346_v50 = vsel %vm10597_vm12, 0, %v345_v17 }
 0x208   : > { %3904 = vmatpush2.bf16.msra.mxu0 %v9447_v24  ;;  %v9506_v24 = vld [vmem:[#allocation10 + $0x4a4] ss:$16 sps:$4 sm:$0xff]   ;;  %347 = vst [vmem:[#allocation3 + $0x28] sm:$0x11] %v346_v50 }
 0x209   : > { %3905 = vmatprep.subr.bf16.mxu0 %v9455_v28  ;;  %v10831_v28 = vpop.f32.mrf.mxu0  ;;  %v9553_v50 = vld [vmem:[#allocation10 + $0x724] ss:$16 sps:$4 sm:$0xff]  }
 0x20a   : > { %3869 = vmatpush2.bf16.msra.mxu1 %v9444_v30  ;;  %v10833_v30 = vpop.f32.mrf.mxu1 }
 0x20b   : > { %3870 = vmatprep.subr.bf16.mxu1 %v9452_v33  ;;  %v9504_v33 = vld [vmem:[#allocation10 + $0x4a0] ss:$16 sps:$4 sm:$0xff]  }
 0x20c   : > { %3906 = vmatpush2.bf16.msra.mxu0 %v9453_v53  ;;  %v9509_v53 = vld [vmem:[#allocation10 + $0x484] ss:$16 sps:$4 sm:$0xff]  }
 0x20d   : > { %3907 = vmatprep.subr.bf16.mxu0 %v9461_v40  ;;  %v10835_v40 = vpop.f32.mrf.mxu0 }
 0x20e   : > { %3871 = vmatpush2.bf16.msra.mxu1 %v9450_v1  ;;  %v10837_v1 = vpop.f32.mrf.mxu1 }
 0x20f   : > { %3872 = vmatprep.subr.bf16.mxu1 %v9458_v43  ;;  %v9507_v43 = vld [vmem:[#allocation10 + $0x480] ss:$16 sps:$4 sm:$0xff]  }
 0x210   : > { %3908 = vmatpush2.bf16.msra.mxu0 %v9459_v44  ;;  %v9512_v44 = vld [vmem:[#allocation10 + $0x664] ss:$16 sps:$4 sm:$0xff]  }
 0x211   : > { %3909 = vmatprep.subr.bf16.mxu0 %v9464_v45  ;;  %v10839_v45 = vpop.f32.mrf.mxu0 }
 0x212   : > { %3873 = vmatpush2.bf16.msra.mxu1 %v9456_v51  ;;  %v10841_v51 = vpop.f32.mrf.mxu1 }
 0x213   : > { %3936 = vmatprep.subr.bf16.mxu1 %v9467_v54  ;;  %v9515_v54 = vld [vmem:[#allocation10 + $0x644] ss:$16 sps:$4 sm:$0xff]  }
 0x214   : > { %3910 = vmatpush2.bf16.msra.mxu0 %v9462_v19  ;;  %v9510_v19 = vld [vmem:[#allocation10 + $0x660] ss:$16 sps:$4 sm:$0xff]  }
 0x215   : > { %3911 = vmatprep.subr.bf16.mxu0 %v9470_v27  ;;  %3875 = vmatmul.mubr.bf16.vlgmr.msra.gmra.mxu1 %v10807_v32  ;;  %v9491_v32 = vld [vmem:[#allocation10 + $0x544] ss:$16 sps:$4 sm:$0xff]   ;;  %v10843_v27 = vpop.f32.mrf.mxu0 }
 0x216   : > { %3937 = vmatpush1.bf16.msra.mxu1 %v9465_v34  ;;  %3960 = vmatprep.mubr.bf16.mxu1 %v10369_v0  ;;  %v10845_v34 = vpop.f32.mrf.mxu1 }
 0x217   : > { %3938 = vmatprep.subr.bf16.mxu1 %v9473_v3  ;;  %v10847_v3 = vpop.f32.mrf.mxu0 }
 0x218   : > { %3912 = vmatpush2.bf16.msra.mxu0 %v9468_v58  ;;  %v9513_v58 = vld [vmem:[#allocation10 + $0x640] ss:$16 sps:$4 sm:$0xff]  }
 0x219   : > { %3913 = vmatprep.subr.bf16.mxu0 %v9476_v59  ;;  %v9518_v59 = vld [vmem:[#allocation10 + $0x624] ss:$16 sps:$4 sm:$0xff]  }
 0x21a   : > { %3939 = vmatpush1.bf16.msra.mxu1 %v9471_v60 }
 0x21b   : > { %3940 = vmatprep.subr.bf16.mxu1 %v9479_v56 }
 0x21c   : > { %3914 = vmatpush2.bf16.msra.mxu0 %v9474_v61 }
 0x21d   : > { %3915 = vmatprep.subr.bf16.mxu0 %v9482_v62  ;;  %v9516_v62 = vld [vmem:[#allocation10 + $0x620] ss:$16 sps:$4 sm:$0xff]  }
 0x21e   : > { %3941 = vmatpush1.bf16.msra.mxu1 %v9477_v39  ;;  %v10850_v39 = vpop.f32.mrf.mxu0 }
 0x21f   : > { %3942 = vmatprep.subr.bf16.mxu1 %v9485_v21  ;;  %v9521_v21 = vld [vmem:[#allocation10 + $0x604] ss:$16 sps:$4 sm:$0xff]  }
 0x220   : > { %3916 = vmatpush2.bf16.msra.mxu0 %v9480_v2 }
 0x221   : > { %5210 = vmatprep.subr.bf16.mxu0 %v9488_v5 }
 0x222   : > { %3943 = vmatpush1.bf16.msra.mxu1 %v9483_v4 }
 0x223   : > { %3918 = vmatmul.mubr.bf16.vlgmr.msra.gmra.mxu0 %v10811_v63  ;;  %v9498_v63 = vld [vmem:[#allocation10 + $0x4e0] ss:$16 sps:$4 sm:$0xff]  }
 0x224   : > { %5211 = vmatpush1.bf16.msra.mxu0 %v9486_v36 }
 0x225   : > { %5212 = vmatprep.subr.bf16.mxu0 %v9491_v32  ;;  %8265 = vmatmul.mubr.msk.bf16.vlgmr.msra.gmra.mxu1 %vm1563_vm0, %v10817_v38  ;;  %v9501_v38 = vld [vmem:[#allocation10 + $0x4c0] ss:$16 sps:$4 sm:$0xff]  }
 0x226   : > { %v9519_v32 = vld [vmem:[#allocation10 + $0x600] ss:$16 sps:$4 sm:$0xff]  }
 0x228   : > { %5213 = vmatpush1.bf16.msra.mxu0 %v9489_v6  ;;  %v9539_v6 = vld [vmem:[#allocation10 + $0x760] ss:$16 sps:$4 sm:$0xff]  }
 0x229   : > { %5214 = vmatprep.subr.bf16.mxu0 %v9494_v7  ;;  %v9541_v7 = vld [vmem:[#allocation10 + $0x764] ss:$16 sps:$4 sm:$0xff]  }
 0x22a   : > { %5253 = vmatprep.subr.bf16.mxu1 %v9541_v7  ;;  %v9537_v7 = vld [vmem:[#allocation10 + $0x8e4] ss:$16 sps:$4 sm:$0xff]  }
 0x22b   : > { %5254 = vmatpush1.bf16.msra.mxu1 %v9539_v6 }
 0x22c   : > { %5215 = vmatpush1.bf16.msra.mxu0 %v9492_v8  ;;  %v10854_v8 = vpop.f32.mrf.mxu0  ;;  %5255 = vmatprep.subr.bf16.mxu1 %v9547_v12  ;;  %v9583_v12 = vld [vmem:[#allocation10 + $0x680] ss:$16 sps:$4 sm:$0xff]  }
 0x22d   : > { %5216 = vmatprep.subr.bf16.mxu0 %v9497_v9  ;;  %v9524_v9 = vld [vmem:[#allocation10 + $0x5e4] ss:$16 sps:$4 sm:$0xff]  }
 0x230   : > { %5217 = vmatpush1.bf16.msra.mxu0 %v9495_v11  ;;  %v9545_v11 = vld [vmem:[#allocation10 + $0x740] ss:$16 sps:$4 sm:$0xff]  }
 0x231   : > { %5218 = vmatprep.subr.bf16.mxu0 %v9500_v14  ;;  %v10861_v14 = vpop.f32.mrf.mxu0  ;;  %5256 = vmatpush1.bf16.msra.mxu1 %v9545_v11  ;;  %v9585_v11 = vld [vmem:[#allocation10 + $0x684] ss:$16 sps:$4 sm:$0xff]  }
 0x232   : > { %5257 = vmatprep.subr.bf16.mxu1 %v9553_v50  ;;  %v348_v50 = vld [vmem:[#allocation3 + $0x30] sm:$0x11] }
 0x234   : > { %5219 = vmatpush1.bf16.msra.mxu0 %v9498_v63 }
 0x235   : > { %5220 = vmatprep.subr.bf16.mxu0 %v9503_v15 }
 0x238   : > { %5221 = vmatpush1.bf16.msra.mxu0 %v9501_v38  ;;  %v9530_v38 = vld [vmem:[#allocation10 + $0x5a4] ss:$16 sps:$4 sm:$0xff]  }
 0x239   : > { %5222 = vmatprep.subr.bf16.mxu0 %v9506_v24 }
 0x23c   : > { %5223 = vmatpush1.bf16.msra.mxu0 %v9504_v33 }
 0x23d   : > { %5224 = vmatprep.subr.bf16.mxu0 %v9509_v53  ;;  %v9551_v53 = vld [vmem:[#allocation10 + $0x720] ss:$16 sps:$4 sm:$0xff]  }
 0x23e   : > { %5258 = vmatpush1.bf16.msra.mxu1 %v9551_v53  ;;  %v9601_v53 = vld [vmem:[#allocation10 + $0x820] ss:$16 sps:$4 sm:$0xff]  }
 0x240   : > { %5225 = vmatpush1.bf16.msra.mxu0 %v9507_v43 }
 0x241   : > { %5226 = vmatprep.subr.bf16.mxu0 %v9512_v44 }
 0x244   : > { %5227 = vmatpush2.bf16.msra.mxu0 %v9510_v19 }
 0x245   : > { %5228 = vmatprep.subr.bf16.mxu0 %v9515_v54  ;;  %v2714_v60 = vpop.f32.mrf.mxu1 }
 0x246   : > { %v2715_v61 = vadd.f32 %v2714_v60, %v10792_v20 }
 0x247   : > { %v2716_v56 = vpop.f32.mrf.mxu1 }
 0x248   : > { %5229 = vmatpush2.bf16.msra.mxu0 %v9513_v58  ;;  %v2717_v2 = vadd.f32 %v2716_v56, %v10796_v55  ;;  %v352_v55 = vsel %vm10679_vm9, 0, %v351_v10  ;;  %v9528_v58 = vld [vmem:[#allocation10 + $0x5a0] ss:$16 sps:$4 sm:$0xff]   ;;  %v9559_v56 = vld [vmem:[#allocation10 + $0x704] ss:$16 sps:$4 sm:$0xff]  }
 0x249   : > { %5230 = vmatprep.subr.bf16.mxu0 %v9518_v59  ;;  %v2718_v4 = vpop.f32.mrf.mxu1  ;;  %353 = vst [vmem:[#allocation3 + $0x38] sm:$0x1] %v352_v55  ;;  %5259 = vmatprep.subr.bf16.mxu1 %v9559_v56  ;;  %v9571_v10 = vld [vmem:[#allocation10 + $0x6c0] ss:$16 sps:$4 sm:$0xff]   ;;  %v9573_v55 = vld [vmem:[#allocation10 + $0x6c4] ss:$16 sps:$4 sm:$0xff]  }
 0x24a   : > { %v2719_v5 = vadd.f32 %v2718_v4, %v10798_v48  ;;  %v9522_v48 = vld [vmem:[#allocation10 + $0x5e0] ss:$16 sps:$4 sm:$0xff]   ;;  %356 = vst.msk [vmem:[#allocation3 + $0x38] sm:$0x1] %vm311_vm7, %v10369_v0 }
 0x24b   : > { %v2720_v36 = vpop.f32.mrf.mxu1  ;;  %v9557_v4 = vld [vmem:[#allocation10 + $0x700] ss:$16 sps:$4 sm:$0xff]  }
 0x24c   : > { %5231 = vmatpush2.bf16.msra.mxu0 %v9516_v62  ;;  %v2721_v20 = vadd.f32 %v2720_v36, %v10803_v57  ;;  %v9527_v57 = vld [vmem:[#allocation10 + $0x5c4] ss:$16 sps:$4 sm:$0xff]   ;;  %5260 = vmatpush1.bf16.msra.mxu1 %v9557_v4  ;;  %v9625_v56 = vld [vmem:[#allocation10 + $0x7a0] ss:$16 sps:$4 sm:$0xff]   ;;  %v9640_v4 = vld [vmem:[#allocation10 + $0x56c] ss:$16 sps:$4 sm:$0xff]  }
 0x24d   : > { %5232 = vmatprep.subr.bf16.mxu0 %v9521_v21 }
 0x250   : > { %5233 = vmatpush2.bf16.msra.mxu0 %v9519_v32  ;;  %v9531_v32 = vld [vmem:[#allocation10 + $0x580] ss:$16 sps:$4 sm:$0xff]  }
 0x251   : > { %5234 = vmatprep.subr.bf16.mxu0 %v9524_v9  ;;  %v9567_v9 = vld [vmem:[#allocation10 + $0x6e4] ss:$16 sps:$4 sm:$0xff]  }
 0x252   : > { %5261 = vmatprep.subr.bf16.mxu1 %v9567_v9  ;;  %v1645_v9 = vadd.f32 %v10770_v16, %v10768_v13 }
 0x253   : > { %v2757_v63 = vpop.f32.mrf.mxu0 }
 0x254   : > { %v2758_v15 = vadd.f32 %v2757_v63, %v2715_v61  ;;  %5235 = vmatpush2.bf16.msra.mxu0 %v9522_v48  ;;  %v9533_v61 = vld [vmem:[#allocation10 + $0x584] ss:$16 sps:$4 sm:$0xff]   ;;  %v9577_v48 = vld [vmem:[#allocation10 + $0x6a0] ss:$16 sps:$4 sm:$0xff]  }
 0x255   : > { %v2759_v17 = vpop.f32.mrf.mxu0  ;;  %5236 = vmatprep.subr.bf16.mxu0 %v9527_v57  ;;  %v2800_v24 = vpop.f32.mrf.mxu1  ;;  %v339_v57 = vld [vmem:[#allocation3 + $0x8] sm:$0x11]  ;;  %v9591_v63 = vld [vmem:[#allocation10 + $0x864] ss:$16 sps:$4 sm:$0xff]  }
 0x256   : > { %v2760_v33 = vadd.f32 %v2759_v17, %v2717_v2  ;;  %v10863_v43 = vadd.f32 %v2800_v24, %v2758_v15  ;;  %v340_v15 = vsel %vm10591_vm11, 0, %v339_v57  ;;  %v9597_v17 = vld [vmem:[#allocation10 + $0x844] ss:$16 sps:$4 sm:$0xff]  }
 0x257   : > { %v2761_v44 = vpop.f32.mrf.mxu0  ;;  %v2802_v19 = vpop.f32.mrf.mxu1  ;;  %341 = vst [vmem:[#allocation3 + $0x8] sm:$0x11] %v340_v15  ;;  %v9603_v24 = vld [vmem:[#allocation10 + $0x824] ss:$16 sps:$4 sm:$0xff]   ;;  %v1651_v15 = vadd.f32 %v10784_v47, %v10780_v41 }
 0x258   : > { %v2762_v54 = vadd.f32 %v2761_v44, %v2719_v5  ;;  %5237 = vmatpush2.bf16.msra.mxu0 %v9525_v18  ;;  %v10865_v59 = vadd.f32 %v2802_v19, %v2760_v33  ;;  %v9565_v5 = vld [vmem:[#allocation10 + $0x6e0] ss:$16 sps:$4 sm:$0xff]   ;;  %v349_v33 = vsel %vm10597_vm12, 0, %v348_v50  ;;  %v9609_v44 = vld [vmem:[#allocation10 + $0x804] ss:$16 sps:$4 sm:$0xff]  }
 0x259   : > { %v2763_v60 = vpop.f32.mrf.mxu0  ;;  %5238 = vmatprep.subr.bf16.mxu0 %v9530_v38  ;;  %v2804_v62 = vpop.f32.mrf.mxu1  ;;  %5262 = vmatpush1.bf16.msra.mxu1 %v9565_v5  ;;  %v9589_v18 = vld [vmem:[#allocation10 + $0x860] ss:$16 sps:$4 sm:$0xff]   ;;  %350 = vst [vmem:[#allocation3 + $0x30] sm:$0x11] %v349_v33 }
 0x25a   : > { %v2764_v21 = vadd.f32 %v2763_v60, %v2721_v20  ;;  %v10867_v2 = vadd.f32 %v2804_v62, %v2762_v54  ;;  %5263 = vmatprep.subr.bf16.mxu1 %v9573_v55  ;;  %v9579_v20 = vld [vmem:[#allocation10 + $0x6a4] ss:$16 sps:$4 sm:$0xff]   ;;  %v9595_v38 = vld [vmem:[#allocation10 + $0x840] ss:$16 sps:$4 sm:$0xff]   ;;  %v1688_v55 = vadd.f32 %v10782_v42, %v1645_v9 }
 0x25b   : > { %v2806_v36 = vpop.f32.mrf.mxu1  ;;  %v9607_v19 = vld [vmem:[#allocation10 + $0x800] ss:$16 sps:$4 sm:$0xff]   ;;  %v9615_v54 = vld [vmem:[#allocation10 + $0x7e4] ss:$16 sps:$4 sm:$0xff]  }
 0x25c   : > { %5239 = vmatpush2.bf16.msra.mxu0 %v9528_v58  ;;  %v10869_v6 = vadd.f32 %v2806_v36, %v2764_v21  ;;  %v9613_v58 = vld [vmem:[#allocation10 + $0x7e0] ss:$16 sps:$4 sm:$0xff]   ;;  %v9627_v62 = vld [vmem:[#allocation10 + $0x7a4] ss:$16 sps:$4 sm:$0xff]  }
 0x25d   : > { %5240 = vmatprep.subr.bf16.mxu0 %v9533_v61  ;;  %5264 = vmatpush1.bf16.msra.mxu1 %v9571_v10  ;;  %v9619_v60 = vld [vmem:[#allocation10 + $0x7c0] ss:$16 sps:$4 sm:$0xff]   ;;  %v9621_v61 = vld [vmem:[#allocation10 + $0x7c4] ss:$16 sps:$4 sm:$0xff]   ;;  %v1647_v10 = vadd.f32 %v10774_v26, %v10772_v23  ;;  %v1694_v26 = vadd.f32 %v10790_v22, %v1651_v15 }
 0x25e   : > { %5265 = vmatprep.subr.bf16.mxu1 %v9579_v20  ;;  %v9633_v21 = vld [vmem:[#allocation10 + $0x784] ss:$16 sps:$4 sm:$0xff]  }
 0x25f   : > { %v2592_v47 = vadd.f32 %v10843_v27, %v1694_v26 }
 0x260   : > { %5241 = vmatpush2.bf16.msra.mxu0 %v9531_v32  ;;  %v3981_v32 = vlaneseq }
 0x261   : > { %5304 = vmatprep.subr.bf16.mxu0 %v9537_v7  ;;  %5266 = vmatpush1.bf16.msra.mxu1 %v9577_v48  ;;  %v1649_v48 = vadd.f32 %v10778_v37, %v10776_v31 }
 0x262   : > { %5267 = vmatprep.subr.bf16.mxu1 %v9585_v11  ;;  %v10880_v20 = vshrl.u32 %v3981_v32, 7  ;;  %v1690_v11 = vadd.f32 %v10786_v52, %v1647_v10  ;;  %v10893_v52 = vld [vmem:[#allocation9] sm:$0xf] }
 0x263   : > { %v1692_v13 = vadd.f32 %v10788_v35, %v1649_v48 }
 0x264   : > { %v2588_v16 = vadd.f32 %v10835_v40, %v1690_v11  ;;  %v3983_v23 = vsub.s32 0, %v10880_v20 }
 0x265   : > { %5268 = vmatpush1.bf16.msra.mxu1 %v9583_v12  ;;  %v2590_v42 = vadd.f32 %v10839_v45, %v1692_v13 }
 0x266   : > { %5269 = vmatprep.subr.bf16.mxu1 %v9591_v63  ;;  %v2586_v63 = vadd.f32 %v10831_v28, %v1688_v55  ;;  %v2631_v41 = vadd.f32 %v10837_v1, %v2588_v16  ;;  %v3984_v45 = vrot.slane %v10893_v52, %v3983_v23  ;;  %v4085_v16 = vld [vmem:[#allocation3 + $0x28] sm:$0x11] }
 0x267   : > { %v2633_v50 = vadd.f32 %v10841_v51, %v2590_v42 }
 0x269   : > { %5270 = vmatpush2.bf16.msra.mxu1 %v9589_v18  ;;  %v2629_v18 = vadd.f32 %v10833_v30, %v2586_v63  ;;  %v2674_v30 = vadd.f32 %v10850_v39, %v2631_v41 }
 0x26a   : > { %5271 = vmatprep.subr.bf16.mxu1 %v9597_v17  ;;  %v3987_v17 = vsub.s32 1, %v10880_v20 }
 0x26b   : > { %v2672_v40 = vadd.f32 %v10847_v3, %v2629_v18  ;;  %v2635_v3 = vadd.f32 %v10845_v34, %v2592_v47 }
 0x26c   : > { %v3988_v27 = vrot.slane %v10893_v52, %v3987_v17 }
 0x26d   : > { %5272 = vmatpush2.bf16.msra.mxu1 %v9595_v38  ;;  %v2678_v39 = vadd.f32 %v10861_v14, %v2635_v3 }
 0x26e   : > { %5273 = vmatprep.subr.bf16.mxu1 %v9603_v24 }
 0x271   : > { %5274 = vmatpush2.bf16.msra.mxu1 %v9601_v53 }
 0x272   : > { %5275 = vmatprep.subr.bf16.mxu1 %v9609_v44 }
 0x275   : > { %5276 = vmatpush2.bf16.msra.mxu1 %v9607_v19  ;;  %v2676_v19 = vadd.f32 %v10854_v8, %v2633_v50 }
 0x276   : > { %5277 = vmatprep.subr.bf16.mxu1 %v9615_v54 }
 0x279   : > { %5278 = vmatpush2.bf16.msra.mxu1 %v9613_v58 }
 0x27a   : > { %5279 = vmatprep.subr.bf16.mxu1 %v9621_v61 }
 0x27d   : > { %5280 = vmatpush2.bf16.msra.mxu1 %v9619_v60 }
 0x27e   : > { %5281 = vmatprep.subr.bf16.mxu1 %v9627_v62 }
 0x281   : > { %5282 = vmatpush2.bf16.msra.mxu1 %v9625_v56 }
 0x282   : > { %5283 = vmatprep.subr.bf16.mxu1 %v9633_v21 }
 0x285   : > { %5284 = vmatpush2.bf16.msra.mxu1 %v9631_v49 }
 0x286   : > { %5339 = vmatprep.subr.bf16.mxu1 %v9640_v4 }
 0x293   : > { %v3747_v36 = vpop.f32.mrf.mxu0 }
 0x295   : > { %v3790_v5 = vpop.f32.mrf.mxu1  ;;  %v3749_v7 = vpop.f32.mrf.mxu0 }
 0x296   : > { %v3791_v28 = vadd.f32 %v3790_v5, %v3747_v36 }
 0x297   : > { %v3792_v12 = vpop.f32.mrf.mxu1  ;;  %v3751_v57 = vpop.f32.mrf.mxu0 }
 0x298   : > { %v3793_v38 = vadd.f32 %v3792_v12, %v3749_v7  ;;  %v4077_v12 = vld [vmem:[#allocation3] sm:$0xff] }
 0x299   : > { %v3794_v31 = vpop.f32.mrf.mxu1  ;;  %v3753_v37 = vpop.f32.mrf.mxu0 }
 0x29a   : > { %v3795_v53 = vadd.f32 %v3794_v31, %v3751_v57 }
 0x29b   : > { %v3796_v24 = vpop.f32.mrf.mxu1 }
 0x29c   : > { %v3797_v58 = vadd.f32 %v3796_v24, %v3753_v37 }
 0x2a3   : > { %v3833_v35 = vpop.f32.mrf.mxu0 }
 0x2a4   : > { %v3834_v22 = vadd.f32 %v3833_v35, %v3791_v28 }
 0x2a5   : > { %v3835_v33 = vpop.f32.mrf.mxu0 }
 0x2a6   : > { %v3971_v44 = vadd.f32 %v3834_v22, %v2672_v40  ;;  %v3836_v1 = vadd.f32 %v3835_v33, %v3793_v38 }
 0x2a7   : > { %v3837_v54 = vpop.f32.mrf.mxu0 }
 0x2a8   : > { %v4001_v60 = vadd.f32 %v3984_v45, %v3971_v44  ;;  %v3972_v61 = vadd.f32 %v3836_v1, %v2674_v30  ;;  %v3838_v51 = vadd.f32 %v3837_v54, %v3795_v53  ;;  %v4093_v1 = vld [vmem:[#allocation3 + $0x10] sm:$0xf] }
 0x2a9   : > { %v3839_v56 = vpop.f32.mrf.mxu0 }
 0x2aa   : > { %v4002_v62 = vadd.f32 %v3988_v27, %v3972_v61  ;;  %v3975_v49 = vadd.f32 %v3838_v51, %v2676_v19  ;;  %v3840_v21 = vadd.f32 %v3839_v56, %v3797_v58  ;;  %v4009_v4 = vmax.f32 %v4001_v60, 0.0  ;;  %v4096_v58 = vld [vmem:[#allocation3 + $0x24] sm:$0xf] }
 0x2ac   : > { %v4010_v36 = vmax.f32 %v4002_v62, 0.0  ;;  %v4005_v32 = vadd.f32 %v3984_v45, %v3975_v49  ;;  %v3976_v5 = vadd.f32 %v3840_v21, %v2678_v39 }
 0x2ae   : > { %v8733_v7 = vpack.c.bf16 %v4010_v36, %v4009_v4  ;;  %v4006_v9 = vadd.f32 %v3988_v27, %v3976_v5  ;;  %v4013_v10 = vmax.f32 %v4005_v32, 0.0  ;;  %v9535_v4 = vld [vmem:[#allocation10 + $0x8e0] ss:$16 sps:$4 sm:$0xff]   ;;  %v10931_v36 = vcombine.low %v4093_v1, %v4096_v58 }
 0x2b0   : > { %v4038_v34 = vshrl.u32 %v8733_v7, 16  ;;  %v4014_v8 = vmax.f32 %v4006_v9, 0.0  ;;  %v4041_v48 = vshll.u32 %v8733_v7, 16  ;;  %v9544_v7 = vld [vmem:[#allocation10 + $0x8c4] ss:$16 sps:$4 sm:$0xff]  }
 0x2b1   : > { %v9542_v9 = vld [vmem:[#allocation10 + $0x8c0] ss:$16 sps:$4 sm:$0xff]  }
 0x2b2   : > { %v4040_v55 = vrot.slane %v4038_v34, 7  ;;  %v8735_v11 = vpack.c.bf16 %v4014_v8, %v4013_v10  ;;  %v9564_v34 = vld [vmem:[#allocation3 + $0x38] ss:$0 sps:$4 sm:$0x11]   ;;  %v4474_v10 = vshll.u32 %v10931_v36, 16 }
 0x2b3   : > { %v9550_v8 = vld [vmem:[#allocation10 + $0x8a4] ss:$16 sps:$4 sm:$0xff]  }
 0x2b4   : > { %v4043_v57 = vor.u32 %v4041_v48, %v4040_v55  ;;  %v4053_v63 = vshrl.u32 %v8735_v11, 16  ;;  %v4056_v13 = vshll.u32 %v8735_v11, 16  ;;  %v4051_v26 = vrot.slane %v4040_v55, 4  ;;  %v9548_v55 = vld [vmem:[#allocation10 + $0x8a0] ss:$16 sps:$4 sm:$0xff]  }
 0x2b5   : > { %v4472_v48 = vshrl.u32 %v10931_v36, 16  ;;  %v4476_v11 = vrot.slane %v4474_v10, 1 }
 0x2b6   : > { %v4078_v14 = vsel %vm10633_vm4, %v4043_v57, %v4077_v12  ;;  %v4055_v15 = vrot.slane %v4053_v63, 7  ;;  %v4479_v12 = vshll.u32 %v9564_v34, 16  ;;  %v9556_v57 = vld [vmem:[#allocation10 + $0x884] ss:$16 sps:$4 sm:$0xff]   ;;  %v9554_v63 = vld [vmem:[#allocation10 + $0x880] ss:$16 sps:$4 sm:$0xff]  }
 0x2b7   : > { %4079 = vst [vmem:[#allocation3] sm:$0xff] %v4078_v14 }
 0x2b8   : > { %v4058_v42 = vor.u32 %v4056_v13, %v4055_v15  ;;  %v4069_v31 = vrot.slane %v4055_v15, 4  ;;  %v4481_v15 = vrot.slane %v4479_v12, 1  ;;  %v9562_v13 = vld [vmem:[#allocation10 + $0x76c] ss:$16 sps:$4 sm:$0xff]  }
 0x2ba   : > { %v4059_v37 = vsel %vm10639_vm6, %v4051_v26, %v4058_v42  ;;  %v4086_v18 = vsel %vm10591_vm11, %v4069_v31, %v4085_v16  ;;  %v9560_v26 = vld [vmem:[#allocation10 + $0x768] ss:$16 sps:$4 sm:$0xff]   ;;  %v9570_v31 = vld [vmem:[#allocation10 + $0x74c] ss:$16 sps:$4 sm:$0xff]  }
 0x2bb   : > { %4087 = vst [vmem:[#allocation3 + $0x28] sm:$0x11] %v4086_v18  ;;  %v10917_v28 = vcombine.high %v4078_v14, %v4059_v37  ;;  %v10919_v41 = vcombine.low %v4078_v14, %v4059_v37  ;;  %v4477_v14 = vor.u32 %v4476_v11, %v4472_v48  ;;  %v9568_v18 = vld [vmem:[#allocation10 + $0x748] ss:$16 sps:$4 sm:$0xff]  }
 0x2bc   : > { %v9592_v48 = vld [vmem:[#allocation10 + $0x6c8] ss:$16 sps:$4 sm:$0xff]  }
 0x2bd   : > { %v4438_v47 = vshll.u32 %v10917_v28, 16  ;;  %v4426_v35 = vshll.u32 %v10919_v41, 16  ;;  %v4436_v53 = vshrl.u32 %v10917_v28, 16  ;;  %v4424_v44 = vshrl.u32 %v10919_v41, 16 }
 0x2be   : > { %v6452_v40 = vld [vmem:[#allocation3] sm:$0xee]  ;;  %v10945_v42 = vsel %vm778_vm1, %v4477_v14, %v4481_v15 }
 0x2bf   : > { %v8573_v38 = vcombine.high %v6452_v40, %v4059_v37  ;;  %v8572_v22 = vcombine.low %v6452_v40, %v4059_v37  ;;  %v4440_v50 = vrot.slane %v4438_v47, 1  ;;  %v4428_v30 = vrot.slane %v4426_v35, 1  ;;  %v9576_v47 = vld [vmem:[#allocation10 + $0x72c] ss:$16 sps:$4 sm:$0xff]   ;;  %v9574_v40 = vld [vmem:[#allocation10 + $0x728] ss:$16 sps:$4 sm:$0xff]  }
 0x2c1   : > { %v6616_v27 = vrot.slane %v8573_v38, 1  ;;  %v6613_v3 = vrot.slane %v8572_v22, 1  ;;  %v4441_v51 = vor.u32 %v4440_v50, %v4436_v53  ;;  %v4429_v56 = vor.u32 %v4428_v30, %v4424_v44  ;;  %v9582_v38 = vld [vmem:[#allocation10 + $0x70c] ss:$16 sps:$4 sm:$0xff]  }
 0x2c2   : > { %v4241_v45 = vld [vmem:[#allocation3 + $0x28] sm:$0x11]  ;;  %v3995_v53 = vsub.s32 3, %v10880_v20 }
 0x2c3   : > { %v8276_v24 = vcombine.high %v4241_v45, %v4241_v45  ;;  %v8275_v33 = vcombine.low %v4241_v45, %v4241_v45  ;;  %v3991_v45 = vsub.s32 2, %v10880_v20  ;;  %v9588_v44 = vld [vmem:[#allocation10 + $0x6ec] ss:$16 sps:$4 sm:$0xff]  }
 0x2c5   : > { %v4443_v19 = vshll.u32 %v8276_v24, 16  ;;  %v4431_v54 = vshll.u32 %v8275_v33, 16  ;;  %v6617_v60 = vrot.slane %v8276_v24, 1  ;;  %v6614_v61 = vrot.slane %v8275_v33, 1  ;;  %v9580_v24 = vld [vmem:[#allocation10 + $0x708] ss:$16 sps:$4 sm:$0xff]  }
 0x2c7   : > { %v4445_v39 = vrot.slane %v4443_v19, 1  ;;  %v4433_v62 = vrot.slane %v4431_v54, 1  ;;  %v10926_v49 = vsel %vm2970_vm5, %v6616_v27, %v6617_v60  ;;  %v10929_v21 = vsel %vm2970_vm5, %v6613_v3, %v6614_v61  ;;  %v9586_v61 = vld [vmem:[#allocation10 + $0x6e8] ss:$16 sps:$4 sm:$0xff]  }
 0x2c8   : > { %v3992_v19 = vrot.slane %v10893_v52, %v3991_v45 }
 0x2c9   : > { %v10934_v32 = vsel %vm778_vm1, %v4441_v51, %v4445_v39  ;;  %v10937_v5 = vsel %vm778_vm1, %v4429_v56, %v4433_v62  ;;  %v3996_v39 = vrot.slane %v10893_v52, %v3995_v53 }
 0x2ca   : > { %5242 = vmatprep.mubr.bf16.mxu0 %v10934_v32 }
 0x2cb   : > { %5243 = vmatmul.mubr.bf16.vlgmr.msra.gmra.mxu0 %v10937_v5 }
 0x2cc   : > { %5305 = vmatpush1.bf16.msra.mxu0 %v9535_v4  ;;  %5328 = vmatprep.mubr.bf16.mxu0 %v10369_v0  ;;  %v9594_v4 = vld [vmem:[#allocation10 + $0x6cc] ss:$16 sps:$4 sm:$0xff]  }
 0x2cd   : > { %5306 = vmatprep.subr.bf16.mxu0 %v9544_v7 }
 0x2d0   : > { %5307 = vmatpush1.bf16.msra.mxu0 %v9542_v9 }
 0x2d1   : > { %5308 = vmatprep.subr.bf16.mxu0 %v9550_v8 }
 0x2d4   : > { %5309 = vmatpush1.bf16.msra.mxu0 %v9548_v55 }
 0x2d5   : > { %5310 = vmatprep.subr.bf16.mxu0 %v9556_v57  ;;  %v3876_v16 = vpop.f32.mrf.mxu1  ;;  %v9600_v57 = vld [vmem:[#allocation10 + $0x6ac] ss:$16 sps:$4 sm:$0xff]  }
 0x2d7   : > { %v3878_v37 = vpop.f32.mrf.mxu1 }
 0x2d8   : > { %5311 = vmatpush1.bf16.msra.mxu0 %v9554_v63 }
 0x2d9   : > { %5382 = vmatprep.subr.bf16.mxu0 %v9562_v13  ;;  %v3880_v35 = vpop.f32.mrf.mxu1  ;;  %v9598_v13 = vld [vmem:[#allocation10 + $0x6a8] ss:$16 sps:$4 sm:$0xff]  }
 0x2db   : > { %8424 = vmatmul.mubr.msk.bf16.vlgmr.msra.gmra.mxu0 %vm1563_vm0, %v10945_v42  ;;  %v3882_v50 = vpop.f32.mrf.mxu1 }
 0x2dc   : > { %5383 = vmatpush1.bf16.msra.mxu0 %v9560_v26 }
 0x2dd   : > { %5384 = vmatprep.subr.bf16.mxu0 %v9570_v31 }
 0x2e0   : > { %5385 = vmatpush1.bf16.msra.mxu0 %v9568_v18 }
 0x2e1   : > { %5386 = vmatprep.subr.bf16.mxu0 %v9576_v47  ;;  %v9604_v47 = vld [vmem:[#allocation10 + $0x688] ss:$16 sps:$4 sm:$0xff]  }
 0x2e3   : > { %v3919_v22 = vpop.f32.mrf.mxu0 }
 0x2e4   : > { %v3920_v30 = vadd.f32 %v3919_v22, %v3876_v16  ;;  %5387 = vmatpush1.bf16.msra.mxu0 %v9574_v40  ;;  %v4080_v22 = vld [vmem:[#allocation3 + $0x8] sm:$0xff] }
 0x2e5   : > { %v3921_v33 = vpop.f32.mrf.mxu0  ;;  %5388 = vmatprep.subr.bf16.mxu0 %v9582_v38  ;;  %v3962_v1 = vpop.f32.mrf.mxu1  ;;  %v9612_v38 = vld [vmem:[#allocation10 + $0x86c] ss:$16 sps:$4 sm:$0xff]  }
 0x2e6   : > { %v3922_v27 = vadd.f32 %v3921_v33, %v3878_v37  ;;  %v3963_v3 = vadd.f32 %v3962_v1, %v3920_v30  ;;  %v9618_v1 = vld [vmem:[#allocation10 + $0x84c] ss:$16 sps:$4 sm:$0xff]  }
 0x2e7   : > { %v3923_v54 = vpop.f32.mrf.mxu0  ;;  %v3964_v58 = vpop.f32.mrf.mxu1 }
 0x2e8   : > { %v3924_v60 = vadd.f32 %v3923_v54, %v3880_v35  ;;  %5389 = vmatpush1.bf16.msra.mxu0 %v9580_v24  ;;  %v3973_v51 = vadd.f32 %v3963_v3, %v10863_v43  ;;  %v3965_v56 = vadd.f32 %v3964_v58, %v3922_v27  ;;  %v4088_v27 = vld [vmem:[#allocation3 + $0x30] sm:$0x11]  ;;  %v9616_v58 = vld [vmem:[#allocation10 + $0x848] ss:$16 sps:$4 sm:$0xff]  }
 0x2e9   : > { %v3925_v62 = vpop.f32.mrf.mxu0  ;;  %5390 = vmatprep.subr.bf16.mxu0 %v9588_v44  ;;  %v3966_v7 = vpop.f32.mrf.mxu1 }
 0x2ea   : > { %v3926_v9 = vadd.f32 %v3925_v62, %v3882_v50  ;;  %v4003_v34 = vadd.f32 %v3992_v19, %v3973_v51  ;;  %v3974_v10 = vadd.f32 %v3965_v56, %v10865_v59  ;;  %v3967_v8 = vadd.f32 %v3966_v7, %v3924_v60  ;;  %v9606_v59 = vld [vmem:[#allocation10 + $0x68c] ss:$16 sps:$4 sm:$0xff]  }
 0x2eb   : > { %v3968_v55 = vpop.f32.mrf.mxu1  ;;  %v9630_v62 = vld [vmem:[#allocation10 + $0x80c] ss:$16 sps:$4 sm:$0xff]  }
 0x2ec   : > { %5391 = vmatpush1.bf16.msra.mxu0 %v9586_v61  ;;  %v4004_v11 = vadd.f32 %v3996_v39, %v3974_v10  ;;  %v3977_v43 = vadd.f32 %v3967_v8, %v10867_v2  ;;  %v3969_v12 = vadd.f32 %v3968_v55, %v3926_v9  ;;  %v4011_v63 = vmax.f32 %v4003_v34, 0.0  ;;  %v9628_v9 = vld [vmem:[#allocation10 + $0x808] ss:$16 sps:$4 sm:$0xff]  }
 0x2ed   : > { %5392 = vmatprep.subr.bf16.mxu0 %v9594_v4 }
 0x2ee   : > { %v4012_v52 = vmax.f32 %v4004_v11, 0.0  ;;  %v4007_v14 = vadd.f32 %v3992_v19, %v3977_v43  ;;  %v3978_v15 = vadd.f32 %v3969_v12, %v10869_v6  ;;  %v9610_v6 = vld [vmem:[#allocation10 + $0x868] ss:$16 sps:$4 sm:$0xff]  }
 0x2ef   : > { %v9634_v12 = vld [vmem:[#allocation10 + $0x7e8] ss:$16 sps:$4 sm:$0xff]  }
 0x2f0   : > { %5393 = vmatpush1.bf16.msra.mxu0 %v9592_v48  ;;  %v8734_v16 = vpack.c.bf16 %v4012_v52, %v4011_v63  ;;  %v4008_v26 = vadd.f32 %v3996_v39, %v3978_v15  ;;  %v4015_v37 = vmax.f32 %v4007_v14, 0.0  ;;  %v9622_v39 = vld [vmem:[#allocation10 + $0x828] ss:$16 sps:$4 sm:$0xff]  }
 0x2f1   : > { %5394 = vmatprep.subr.bf16.mxu0 %v9600_v57 }
 0x2f2   : > { %v4045_v31 = vshrl.u32 %v8734_v16, 16  ;;  %v4016_v18 = vmax.f32 %v4008_v26, 0.0  ;;  %v4048_v35 = vshll.u32 %v8734_v16, 16 }
 0x2f4   : > { %5395 = vmatpush1.bf16.msra.mxu0 %v9598_v13  ;;  %v4047_v2 = vrot.slane %v4045_v31, 7  ;;  %v8736_v40 = vpack.c.bf16 %v4016_v18, %v4015_v37 }
 0x2f5   : > { %5396 = vmatprep.subr.bf16.mxu0 %v9606_v59 }
 0x2f6   : > { %v4050_v50 = vor.u32 %v4048_v35, %v4047_v2  ;;  %v4062_v30 = vshrl.u32 %v8736_v40, 16  ;;  %v4065_v44 = vshll.u32 %v8736_v40, 16  ;;  %v4060_v3 = vrot.slane %v4047_v2, 4  ;;  %v9638_v2 = vld [vmem:[#allocation10 + $0x568] ss:$16 sps:$4 sm:$0xff]  }
 0x2f8   : > { %5397 = vmatpush1.bf16.msra.mxu0 %v9604_v47  ;;  %v4081_v24 = vsel %vm10633_vm4, %v4050_v50, %v4080_v22  ;;  %v4064_v33 = vrot.slane %v4062_v30, 7  ;;  %v9644_v47 = vld [vmem:[#allocation10 + $0x7cc] ss:$16 sps:$4 sm:$0xff]   ;;  %v9642_v50 = vld [vmem:[#allocation10 + $0x7c8] ss:$16 sps:$4 sm:$0xff]  }
 0x2f9   : > { %5398 = vmatprep.subr.bf16.mxu0 %v9612_v38  ;;  %4082 = vst [vmem:[#allocation3 + $0x8] sm:$0xff] %v4081_v24  ;;  %v9647_v30 = vld [vmem:[#allocation10 + $0x54c] ss:$16 sps:$4 sm:$0xff]  }
 0x2fa   : > { %v4067_v19 = vor.u32 %v4065_v44, %v4064_v33  ;;  %v4070_v54 = vrot.slane %v4064_v33, 4  ;;  %v9648_v33 = vld [vmem:[#allocation10 + $0x7a8] ss:$16 sps:$4 sm:$0xff]   ;;  %v9653_v44 = vld [vmem:[#allocation10 + $0x52c] ss:$16 sps:$4 sm:$0xff]  }
 0x2fc   : > { %5399 = vmatpush2.bf16.msra.mxu0 %v9610_v6  ;;  %v4068_v60 = vsel %vm10639_vm6, %v4060_v3, %v4067_v19  ;;  %v4089_v61 = vsel %vm10591_vm11, %v4070_v54, %v4088_v27  ;;  %v9650_v6 = vld [vmem:[#allocation10 + $0x7ac] ss:$16 sps:$4 sm:$0xff]   ;;  %v9651_v27 = vld [vmem:[#allocation10 + $0x528] ss:$16 sps:$4 sm:$0xff]   ;;  %v9662_v54 = vld [vmem:[#allocation10 + $0xe4] ss:$16 sps:$4 sm:$0xff]  }
 0x2fd   : > { %5400 = vmatprep.subr.bf16.mxu0 %v9618_v1  ;;  %4090 = vst [vmem:[#allocation3 + $0x30] sm:$0x11] %v4089_v61  ;;  %v10967_v51 = vcombine.high %v4081_v24, %v4068_v60  ;;  %v10969_v56 = vcombine.low %v4081_v24, %v4068_v60  ;;  %v9645_v24 = vld [vmem:[#allocation10 + $0x548] ss:$16 sps:$4 sm:$0xff]   ;;  %v9656_v1 = vld [vmem:[#allocation10 + $0x78c] ss:$16 sps:$4 sm:$0xff]  }
 0x2fe   : > { %v9654_v3 = vld [vmem:[#allocation10 + $0x788] ss:$16 sps:$4 sm:$0xff]   ;;  %v9659_v19 = vld [vmem:[#allocation10 + $0x50c] ss:$16 sps:$4 sm:$0xff]   ;;  %v9668_v61 = vld [vmem:[#allocation10 + $0xc4] ss:$16 sps:$4 sm:$0xff]  }
 0x2ff   : > { %v4462_v4 = vshll.u32 %v10967_v51, 16  ;;  %v4450_v7 = vshll.u32 %v10969_v56, 16  ;;  %v4460_v57 = vshrl.u32 %v10967_v51, 16  ;;  %v4448_v52 = vshrl.u32 %v10969_v56, 16 }
 0x300   : > { %5401 = vmatpush2.bf16.msra.mxu0 %v9616_v58  ;;  %v6453_v29 = vld [vmem:[#allocation3 + $0x8] sm:$0xee] }
 0x301   : > { %5402 = vmatprep.subr.bf16.mxu0 %v9624_v25  ;;  %v8575_v10 = vcombine.high %v6453_v29, %v4068_v60  ;;  %v8574_v8 = vcombine.low %v6453_v29, %v4068_v60  ;;  %v4464_v48 = vrot.slane %v4462_v4, 1  ;;  %v4452_v43 = vrot.slane %v4450_v7, 1  ;;  %v9657_v58 = vld [vmem:[#allocation10 + $0x508] ss:$16 sps:$4 sm:$0xff]   ;;  %v9665_v60 = vld [vmem:[#allocation10 + $0x4ec] ss:$16 sps:$4 sm:$0xff]  }
 0x302   : > { %v9663_v25 = vld [vmem:[#allocation10 + $0x4e8] ss:$16 sps:$4 sm:$0xff]   ;;  %v9674_v4 = vld [vmem:[#allocation10 + $0xa4] ss:$16 sps:$4 sm:$0xff]   ;;  %v9672_v29 = vld [vmem:[#allocation10 + $0xa0] ss:$16 sps:$4 sm:$0xff]  }
 0x303   : > { %v6622_v15 = vrot.slane %v8575_v10, 1  ;;  %v6619_v16 = vrot.slane %v8574_v8, 1  ;;  %v4465_v59 = vor.u32 %v4464_v48, %v4460_v57  ;;  %v4453_v37 = vor.u32 %v4452_v43, %v4448_v52  ;;  %v9669_v7 = vld [vmem:[#allocation10 + $0x4c8] ss:$16 sps:$4 sm:$0xff]   ;;  %v9678_v10 = vld [vmem:[#allocation10 + $0x80] ss:$16 sps:$4 sm:$0xff]  }
 0x304   : > { %5403 = vmatpush2.bf16.msra.mxu0 %v9622_v39  ;;  %v4242_v34 = vld [vmem:[#allocation3 + $0x30] sm:$0x11]  ;;  %v9683_v8 = vld [vmem:[#allocation10 + $0x48c] ss:$16 sps:$4 sm:$0xff]   ;;  %v9681_v48 = vld [vmem:[#allocation10 + $0x488] ss:$16 sps:$4 sm:$0xff]  }
 0x305   : > { %5404 = vmatprep.subr.bf16.mxu0 %v9630_v62  ;;  %v8278_v55 = vcombine.high %v4242_v34, %v4242_v34  ;;  %v8277_v11 = vcombine.low %v4242_v34, %v4242_v34  ;;  %v9666_v39 = vld [vmem:[#allocation10 + $0xc0] ss:$16 sps:$4 sm:$0xff]   ;;  %v9671_v62 = vld [vmem:[#allocation10 + $0x4cc] ss:$16 sps:$4 sm:$0xff]   ;;  %v9675_v34 = vld [vmem:[#allocation10 + $0x4a8] ss:$16 sps:$4 sm:$0xff]  }
 0x306   : > { %v9689_v43 = vld [vmem:[#allocation10 + $0x66c] ss:$16 sps:$4 sm:$0xff]   ;;  %v9687_v57 = vld [vmem:[#allocation10 + $0x668] ss:$16 sps:$4 sm:$0xff]  }
 0x307   : > { %v4467_v63 = vshll.u32 %v8278_v55, 16  ;;  %v4455_v14 = vshll.u32 %v8277_v11, 16  ;;  %v6623_v13 = vrot.slane %v8278_v55, 1  ;;  %v6620_v26 = vrot.slane %v8277_v11, 1  ;;  %v9686_v55 = vld [vmem:[#allocation10 + $0x64] ss:$16 sps:$4 sm:$0xff]  }
 0x308   : > { %5405 = vmatpush2.bf16.msra.mxu0 %v9628_v9  ;;  %v9677_v9 = vld [vmem:[#allocation10 + $0x4ac] ss:$16 sps:$4 sm:$0xff]   ;;  %v9684_v11 = vld [vmem:[#allocation10 + $0x60] ss:$16 sps:$4 sm:$0xff]  }
 0x309   : > { %5406 = vmatprep.subr.bf16.mxu0 %v9636_v46  ;;  %v4469_v31 = vrot.slane %v4467_v63, 1  ;;  %v4457_v18 = vrot.slane %v4455_v14, 1  ;;  %v10976_v35 = vsel %vm2970_vm5, %v6622_v15, %v6623_v13  ;;  %v10979_v40 = vsel %vm2970_vm5, %v6619_v16, %v6620_v26  ;;  %v9680_v46 = vld [vmem:[#allocation10 + $0x84] ss:$16 sps:$4 sm:$0xff]   ;;  %v9690_v63 = vld [vmem:[#allocation10 + $0x40] ss:$16 sps:$4 sm:$0xff]  }
 0x30a   : > { %v9695_v52 = vld [vmem:[#allocation10 + $0x64c] ss:$16 sps:$4 sm:$0xff]   ;;  %v9698_v14 = vld [vmem:[#allocation10 + $0x24] ss:$16 sps:$4 sm:$0xff]   ;;  %v9693_v15 = vld [vmem:[#allocation10 + $0x648] ss:$16 sps:$4 sm:$0xff]  }
 0x30b   : > { %v4470_v38 = vsel %vm778_vm1, %v4465_v59, %v4469_v31  ;;  %v4458_v22 = vsel %vm778_vm1, %v4453_v37, %v4457_v18  ;;  %v9696_v13 = vld [vmem:[#allocation10 + $0x20] ss:$16 sps:$4 sm:$0xff]   ;;  %v9701_v16 = vld [vmem:[#allocation10 + $0x62c] ss:$16 sps:$4 sm:$0xff]   ;;  %v9704_v26 = vld [vmem:[#allocation10 + $0x4] ss:$16 sps:$4 sm:$0xff]  }
 0x30c   : > { %5407 = vmatpush2.bf16.msra.mxu0 %v9634_v12  ;;  %5285 = vmatprep.mubr.bf16.mxu1 %v4470_v38  ;;  %v9692_v12 = vld [vmem:[#allocation10 + $0x44] ss:$16 sps:$4 sm:$0xff]   ;;  %v9699_v59 = vld [vmem:[#allocation10 + $0x628] ss:$16 sps:$4 sm:$0xff]   ;;  %v9702_v31 = vld [vmem:[#allocation10] ss:$16 sps:$4 sm:$0xff]  }
 0x30d   : > { %5414 = vmatprep.mubr.bf16.mxu0 %v4470_v38  ;;  %5286 = vmatmul.mubr.bf16.vlgmr.msra.gmra.mxu1 %v4458_v22  ;;  %v9707_v37 = vld [vmem:[#allocation10 + $0x60c] ss:$16 sps:$4 sm:$0xff]   ;;  %v9710_v18 = vld [vmem:[#allocation10 + $0x1e4] ss:$16 sps:$4 sm:$0xff]  }
 0x30e   : > { %5408 = vmatprep.subr.bf16.mxu0 %v9644_v47  ;;  %5340 = vmatpush1.bf16.msra.mxu1 %v9638_v2  ;;  %v9705_v47 = vld [vmem:[#allocation10 + $0x608] ss:$16 sps:$4 sm:$0xff]   ;;  %v9708_v2 = vld [vmem:[#allocation10 + $0x1e0] ss:$16 sps:$4 sm:$0xff]   ;;  %v9713_v38 = vld [vmem:[#allocation10 + $0x5ec] ss:$16 sps:$4 sm:$0xff]  }
 0x30f   : > { %5371 = vmatprep.mubr.bf16.mxu1 %v10934_v32  ;;  %5341 = vmatprep.subr.bf16.mxu1 %v9647_v30  ;;  %v9660_v32 = vld [vmem:[#allocation10 + $0xe0] ss:$16 sps:$4 sm:$0xff]  }
 0x310   : > { %5409 = vmatpush2.bf16.msra.mxu0 %v9642_v50  ;;  %v9711_v50 = vld [vmem:[#allocation10 + $0x5e8] ss:$16 sps:$4 sm:$0xff]   ;;  %v9714_v30 = vld [vmem:[#allocation10 + $0x1c0] ss:$16 sps:$4 sm:$0xff]  }
 0x311   : > { %5410 = vmatprep.subr.bf16.mxu0 %v9650_v6  ;;  %v9719_v6 = vld [vmem:[#allocation10 + $0x5cc] ss:$16 sps:$4 sm:$0xff]  }
 0x312   : > { %5342 = vmatpush1.bf16.msra.mxu1 %v9645_v24  ;;  %v9722_v24 = vld [vmem:[#allocation10 + $0x1a4] ss:$16 sps:$4 sm:$0xff]  }
 0x313   : > { %5343 = vmatprep.subr.bf16.mxu1 %v9653_v44  ;;  %v9720_v44 = vld [vmem:[#allocation10 + $0x1a0] ss:$16 sps:$4 sm:$0xff]  }
 0x314   : > { %5411 = vmatpush2.bf16.msra.mxu0 %v9648_v33  ;;  %v9717_v33 = vld [vmem:[#allocation10 + $0x5c8] ss:$16 sps:$4 sm:$0xff]  }
 0x315   : > { %5412 = vmatprep.subr.bf16.mxu0 %v9656_v1  ;;  %v9725_v1 = vld [vmem:[#allocation10 + $0x5ac] ss:$16 sps:$4 sm:$0xff]  }
 0x316   : > { %5344 = vmatpush1.bf16.msra.mxu1 %v9651_v27  ;;  %v9728_v27 = vld [vmem:[#allocation10 + $0x184] ss:$16 sps:$4 sm:$0xff]  }
 0x317   : > { %5345 = vmatprep.subr.bf16.mxu1 %v9659_v19  ;;  %v9726_v19 = vld [vmem:[#allocation10 + $0x180] ss:$16 sps:$4 sm:$0xff]  }
 0x318   : > { %5413 = vmatpush2.bf16.msra.mxu0 %v9654_v3  ;;  %v9723_v3 = vld [vmem:[#allocation10 + $0x5a8] ss:$16 sps:$4 sm:$0xff]  }
 0x319   : > { %6194 = vmatprep.subr.bf16.mxu0 %v9662_v54  ;;  %v9731_v54 = vld [vmem:[#allocation10 + $0x58c] ss:$16 sps:$4 sm:$0xff]  }
 0x31a   : > { %5346 = vmatpush1.bf16.msra.mxu1 %v9657_v58  ;;  %v9734_v58 = vld [vmem:[#allocation10 + $0x164] ss:$16 sps:$4 sm:$0xff]  }
 0x31b   : > { %5415 = vmatmul.mubr.bf16.vlgmr.msra.gmra.mxu0 %v4458_v22  ;;  %5347 = vmatprep.subr.bf16.mxu1 %v9665_v60  ;;  %v9716_v22 = vld [vmem:[#allocation10 + $0x1c4] ss:$16 sps:$4 sm:$0xff]   ;;  %v9732_v60 = vld [vmem:[#allocation10 + $0x160] ss:$16 sps:$4 sm:$0xff]  }
 0x31c   : > { %6195 = vmatpush1.bf16.msra.mxu0 %v9660_v32  ;;  %6226 = vmatprep.mubr.bf16.mxu0 %v10917_v28  ;;  %v9729_v32 = vld [vmem:[#allocation10 + $0x588] ss:$16 sps:$4 sm:$0xff]  }
 0x31d   : > { %6196 = vmatprep.subr.bf16.mxu0 %v9668_v61  ;;  %v9737_v61 = vld [vmem:[#allocation10 + $0x8ec] ss:$16 sps:$4 sm:$0xff]  }
 0x31e   : > { %5348 = vmatpush1.bf16.msra.mxu1 %v9663_v25  ;;  %v9740_v25 = vld [vmem:[#allocation10 + $0x144] ss:$16 sps:$4 sm:$0xff]  }
 0x31f   : > { %5349 = vmatprep.subr.bf16.mxu1 %v9671_v62  ;;  %v9738_v62 = vld [vmem:[#allocation10 + $0x140] ss:$16 sps:$4 sm:$0xff]  }
 0x320   : > { %6197 = vmatpush1.bf16.msra.mxu0 %v9666_v39  ;;  %v9735_v39 = vld [vmem:[#allocation10 + $0x8e8] ss:$16 sps:$4 sm:$0xff]  }
 0x321   : > { %6198 = vmatprep.subr.bf16.mxu0 %v9674_v4  ;;  %v9743_v4 = vld [vmem:[#allocation10 + $0x8cc] ss:$16 sps:$4 sm:$0xff]  }
 0x322   : > { %5350 = vmatpush1.bf16.msra.mxu1 %v9669_v7  ;;  %v9746_v7 = vld [vmem:[#allocation10 + $0x124] ss:$16 sps:$4 sm:$0xff]  }
 0x323   : > { %5351 = vmatprep.subr.bf16.mxu1 %v9677_v9  ;;  %v9744_v9 = vld [vmem:[#allocation10 + $0x120] ss:$16 sps:$4 sm:$0xff]  }
 0x324   : > { %6199 = vmatpush1.bf16.msra.mxu0 %v9672_v29  ;;  %v9741_v29 = vld [vmem:[#allocation10 + $0x8c8] ss:$16 sps:$4 sm:$0xff]  }
 0x325   : > { %6200 = vmatprep.subr.bf16.mxu0 %v9680_v46  ;;  %v9749_v46 = vld [vmem:[#allocation10 + $0x8ac] ss:$16 sps:$4 sm:$0xff]  }
 0x326   : > { %5352 = vmatpush1.bf16.msra.mxu1 %v9675_v34  ;;  %v9752_v34 = vld [vmem:[#allocation10 + $0x104] ss:$16 sps:$4 sm:$0xff]  }
 0x327   : > { %5353 = vmatprep.subr.bf16.mxu1 %v9683_v8  ;;  %v9750_v8 = vld [vmem:[#allocation10 + $0x100] ss:$16 sps:$4 sm:$0xff]  }
 0x328   : > { %6201 = vmatpush1.bf16.msra.mxu0 %v9678_v10  ;;  %v9747_v10 = vld [vmem:[#allocation10 + $0x8a8] ss:$16 sps:$4 sm:$0xff]  }
 0x329   : > { %6202 = vmatprep.subr.bf16.mxu0 %v9686_v55  ;;  %v9755_v55 = vld [vmem:[#allocation10 + $0x88c] ss:$16 sps:$4 sm:$0xff]  }
 0x32a   : > { %5354 = vmatpush1.bf16.msra.mxu1 %v9681_v48  ;;  %v9758_v48 = vld [vmem:[#allocation10 + $0x464] ss:$16 sps:$4 sm:$0xff]  }
 0x32b   : > { %5355 = vmatprep.subr.bf16.mxu1 %v9689_v43  ;;  %v9761_v43 = vld [vmem:[#allocation10 + $0x2e4] ss:$16 sps:$4 sm:$0xff]  }
 0x32c   : > { %6203 = vmatpush1.bf16.msra.mxu0 %v9684_v11  ;;  %v9756_v11 = vld [vmem:[#allocation10 + $0x460] ss:$16 sps:$4 sm:$0xff]  }
 0x32d   : > { %6204 = vmatprep.subr.bf16.mxu0 %v9692_v12  ;;  %v9764_v12 = vld [vmem:[#allocation10 + $0x444] ss:$16 sps:$4 sm:$0xff]  }
 0x32e   : > { %5356 = vmatpush2.bf16.msra.mxu1 %v9687_v57  ;;  %v9759_v57 = vld [vmem:[#allocation10 + $0x2e0] ss:$16 sps:$4 sm:$0xff]  }
 0x32f   : > { %5357 = vmatprep.subr.bf16.mxu1 %v9695_v52  ;;  %v9767_v52 = vld [vmem:[#allocation10 + $0x2c4] ss:$16 sps:$4 sm:$0xff]  }
 0x330   : > { %6205 = vmatpush1.bf16.msra.mxu0 %v9690_v63  ;;  %v9762_v63 = vld [vmem:[#allocation10 + $0x440] ss:$16 sps:$4 sm:$0xff]  }
 0x331   : > { %6206 = vmatprep.subr.bf16.mxu0 %v9698_v14  ;;  %v9770_v14 = vld [vmem:[#allocation10 + $0x424] ss:$16 sps:$4 sm:$0xff]  }
 0x332   : > { %5358 = vmatpush2.bf16.msra.mxu1 %v9693_v15  ;;  %v9765_v15 = vld [vmem:[#allocation10 + $0x2c0] ss:$16 sps:$4 sm:$0xff]  }
 0x333   : > { %5359 = vmatprep.subr.bf16.mxu1 %v9701_v16  ;;  %v9773_v16 = vld [vmem:[#allocation10 + $0x2a4] ss:$16 sps:$4 sm:$0xff]  }
 0x334   : > { %6207 = vmatpush1.bf16.msra.mxu0 %v9696_v13  ;;  %v9768_v13 = vld [vmem:[#allocation10 + $0x420] ss:$16 sps:$4 sm:$0xff]  }
 0x335   : > { %6208 = vmatprep.subr.bf16.mxu0 %v9704_v26  ;;  %v9776_v26 = vld [vmem:[#allocation10 + $0x404] ss:$16 sps:$4 sm:$0xff]  }
 0x336   : > { %5360 = vmatpush2.bf16.msra.mxu1 %v9699_v59  ;;  %v9771_v59 = vld [vmem:[#allocation10 + $0x2a0] ss:$16 sps:$4 sm:$0xff]  }
 0x337   : > { %5361 = vmatprep.subr.bf16.mxu1 %v9707_v37  ;;  %v9779_v37 = vld [vmem:[#allocation10 + $0x284] ss:$16 sps:$4 sm:$0xff]  }
 0x338   : > { %6209 = vmatpush1.bf16.msra.mxu0 %v9702_v31  ;;  %v9774_v31 = vld [vmem:[#allocation10 + $0x400] ss:$16 sps:$4 sm:$0xff]  }
 0x339   : > { %6210 = vmatprep.subr.bf16.mxu0 %v9710_v18  ;;  %v9782_v18 = vld [vmem:[#allocation10 + $0x2ec] ss:$16 sps:$4 sm:$0xff]  }
 0x33a   : > { %5362 = vmatpush2.bf16.msra.mxu1 %v9705_v47  ;;  %v9780_v47 = vld [vmem:[#allocation10 + $0x2e8] ss:$16 sps:$4 sm:$0xff]  }
 0x33b   : > { %5363 = vmatprep.subr.bf16.mxu1 %v9713_v38  ;;  %v9788_v38 = vld [vmem:[#allocation10 + $0x2cc] ss:$16 sps:$4 sm:$0xff]  }
 0x33c   : > { %6211 = vmatpush2.bf16.msra.mxu0 %v9708_v2  ;;  %v9785_v2 = vld [vmem:[#allocation10 + $0x264] ss:$16 sps:$4 sm:$0xff]  }
 0x33d   : > { %6212 = vmatprep.subr.bf16.mxu0 %v9716_v22  ;;  %v9783_v22 = vld [vmem:[#allocation10 + $0x260] ss:$16 sps:$4 sm:$0xff]  }
 0x33e   : > { %5364 = vmatpush2.bf16.msra.mxu1 %v9711_v50  ;;  %v9786_v50 = vld [vmem:[#allocation10 + $0x2c8] ss:$16 sps:$4 sm:$0xff]  }
 0x33f   : > { %5365 = vmatprep.subr.bf16.mxu1 %v9719_v6  ;;  %v9794_v6 = vld [vmem:[#allocation10 + $0x2ac] ss:$16 sps:$4 sm:$0xff]  }
 0x340   : > { %6213 = vmatpush2.bf16.msra.mxu0 %v9714_v30  ;;  %v9791_v30 = vld [vmem:[#allocation10 + $0x244] ss:$16 sps:$4 sm:$0xff]  }
 0x341   : > { %6214 = vmatprep.subr.bf16.mxu0 %v9722_v24  ;;  %v9789_v24 = vld [vmem:[#allocation10 + $0x240] ss:$16 sps:$4 sm:$0xff]  }
 0x342   : > { %5366 = vmatpush2.bf16.msra.mxu1 %v9717_v33  ;;  %v9792_v33 = vld [vmem:[#allocation10 + $0x2a8] ss:$16 sps:$4 sm:$0xff]  }
 0x343   : > { %5367 = vmatprep.subr.bf16.mxu1 %v9725_v1  ;;  %v9800_v1 = vld [vmem:[#allocation10 + $0x28c] ss:$16 sps:$4 sm:$0xff]  }
 0x344   : > { %6215 = vmatpush2.bf16.msra.mxu0 %v9720_v44  ;;  %v9797_v44 = vld [vmem:[#allocation10 + $0x224] ss:$16 sps:$4 sm:$0xff]  }
 0x345   : > { %6216 = vmatprep.subr.bf16.mxu0 %v9728_v27  ;;  %v9795_v27 = vld [vmem:[#allocation10 + $0x220] ss:$16 sps:$4 sm:$0xff]  }
 0x346   : > { %5368 = vmatpush2.bf16.msra.mxu1 %v9723_v3  ;;  %v9798_v3 = vld [vmem:[#allocation10 + $0x288] ss:$16 sps:$4 sm:$0xff]  }
 0x347   : > { %5369 = vmatprep.subr.bf16.mxu1 %v9731_v54  ;;  %v9801_v54 = vld [vmem:[#allocation10 + $0x200] ss:$16 sps:$4 sm:$0xff]  }
 0x348   : > { %6217 = vmatpush2.bf16.msra.mxu0 %v9726_v19  ;;  %v9803_v19 = vld [vmem:[#allocation10 + $0x204] ss:$16 sps:$4 sm:$0xff]  }
 0x349   : > { %6218 = vmatprep.subr.bf16.mxu0 %v9734_v58  ;;  %v9804_v58 = vld [vmem:[#allocation10 + $0x268] ss:$16 sps:$4 sm:$0xff]  }
 0x34a   : > { %5370 = vmatpush2.bf16.msra.mxu1 %v9729_v32  ;;  %v9809_v32 = vld [vmem:[#allocation10 + $0x3e4] ss:$16 sps:$4 sm:$0xff]  }
 0x34b   : > { %5433 = vmatprep.subr.bf16.mxu1 %v9737_v61  ;;  %v9807_v61 = vld [vmem:[#allocation10 + $0x3e0] ss:$16 sps:$4 sm:$0xff]  }
 0x34c   : > { %6219 = vmatpush2.bf16.msra.mxu0 %v9732_v60  ;;  %v9812_v60 = vld [vmem:[#allocation10 + $0x24c] ss:$16 sps:$4 sm:$0xff]  }
 0x34d   : > { %6220 = vmatprep.subr.bf16.mxu0 %v9740_v25  ;;  %5372 = vmatmul.mubr.bf16.vlgmr.msra.gmra.mxu1 %v10937_v5  ;;  %v9753_v5 = vld [vmem:[#allocation10 + $0x888] ss:$16 sps:$4 sm:$0xff]  }
 0x34e   : > { %5434 = vmatpush1.bf16.msra.mxu1 %v9735_v39  ;;  %5457 = vmatprep.mubr.bf16.mxu1 %v10369_v0  ;;  %v9810_v25 = vld [vmem:[#allocation10 + $0x248] ss:$16 sps:$4 sm:$0xff]   ;;  %v9815_v39 = vld [vmem:[#allocation10 + $0x3c4] ss:$16 sps:$4 sm:$0xff]  }
 0x34f   : > { %5435 = vmatprep.subr.bf16.mxu1 %v9743_v4  ;;  %v9813_v4 = vld [vmem:[#allocation10 + $0x3c0] ss:$16 sps:$4 sm:$0xff]  }
 0x350   : > { %6221 = vmatpush2.bf16.msra.mxu0 %v9738_v62  ;;  %v9818_v62 = vld [vmem:[#allocation10 + $0x22c] ss:$16 sps:$4 sm:$0xff]  }
 0x351   : > { %6222 = vmatprep.subr.bf16.mxu0 %v9746_v7  ;;  %v9816_v7 = vld [vmem:[#allocation10 + $0x228] ss:$16 sps:$4 sm:$0xff]  }
 0x352   : > { %5436 = vmatpush1.bf16.msra.mxu1 %v9741_v29  ;;  %v9821_v29 = vld [vmem:[#allocation10 + $0x3a4] ss:$16 sps:$4 sm:$0xff]  }
 0x353   : > { %5437 = vmatprep.subr.bf16.mxu1 %v9749_v46  ;;  %v9819_v46 = vld [vmem:[#allocation10 + $0x3a0] ss:$16 sps:$4 sm:$0xff]  }
 0x354   : > { %6223 = vmatpush2.bf16.msra.mxu0 %v9744_v9  ;;  %v9824_v9 = vld [vmem:[#allocation10 + $0x20c] ss:$16 sps:$4 sm:$0xff]  }
 0x355   : > { %6224 = vmatprep.subr.bf16.mxu0 %v9752_v34  ;;  %v9822_v34 = vld [vmem:[#allocation10 + $0x208] ss:$16 sps:$4 sm:$0xff]  }
 0x356   : > { %5438 = vmatpush1.bf16.msra.mxu1 %v9747_v10  ;;  %v9827_v10 = vld [vmem:[#allocation10 + $0x384] ss:$16 sps:$4 sm:$0xff]  }
 0x357   : > { %5439 = vmatprep.subr.bf16.mxu1 %v9755_v55  ;;  %v9825_v55 = vld [vmem:[#allocation10 + $0x380] ss:$16 sps:$4 sm:$0xff]  }
 0x358   : > { %6225 = vmatpush2.bf16.msra.mxu0 %v9750_v8  ;;  %v9830_v8 = vld [vmem:[#allocation10 + $0x3ec] ss:$16 sps:$4 sm:$0xff]  }
 0x359   : > { %6288 = vmatprep.subr.bf16.mxu0 %v9758_v48  ;;  %v9828_v48 = vld [vmem:[#allocation10 + $0x3e8] ss:$16 sps:$4 sm:$0xff]  }
 0x35a   : > { %5440 = vmatpush1.bf16.msra.mxu1 %v9753_v5  ;;  %v9833_v5 = vld [vmem:[#allocation10 + $0x364] ss:$16 sps:$4 sm:$0xff]  }
 0x35b   : > { %6227 = vmatmul.mubr.bf16.vlgmr.msra.gmra.mxu0 %v10919_v41  ;;  %6237 = vmatprep.subr.bf16.mxu1 %v9761_v43  ;;  %v9831_v43 = vld [vmem:[#allocation10 + $0x360] ss:$16 sps:$4 sm:$0xff]  }
 0x35c   : > { %6289 = vmatpush1.bf16.msra.mxu0 %v9756_v11  ;;  %6312 = vmatprep.mubr.bf16.mxu0 %v10369_v0  ;;  %v9836_v11 = vld [vmem:[#allocation10 + $0x3cc] ss:$16 sps:$4 sm:$0xff]  }
 0x35d   : > { %6290 = vmatprep.subr.bf16.mxu0 %v9764_v12  ;;  %8425 = vmatmul.mubr.msk.bf16.vlgmr.msra.gmra.mxu1 %vm1563_vm0, %v10945_v42  ;;  %v9777_v42 = vld [vmem:[#allocation10 + $0x280] ss:$16 sps:$4 sm:$0xff]   ;;  %v9834_v12 = vld [vmem:[#allocation10 + $0x3c8] ss:$16 sps:$4 sm:$0xff]  }
 0x35e   : > { %6238 = vmatpush1.bf16.msra.mxu1 %v9759_v57  ;;  %6269 = vmatprep.mubr.bf16.mxu1 %v10967_v51  ;;  %v9839_v57 = vld [vmem:[#allocation10 + $0x344] ss:$16 sps:$4 sm:$0xff]  }
 0x35f   : > { %6239 = vmatprep.subr.bf16.mxu1 %v9767_v52  ;;  %v9837_v52 = vld [vmem:[#allocation10 + $0x340] ss:$16 sps:$4 sm:$0xff]  }
 0x360   : > { %6291 = vmatpush1.bf16.msra.mxu0 %v9762_v63  ;;  %v9842_v63 = vld [vmem:[#allocation10 + $0x3ac] ss:$16 sps:$4 sm:$0xff]  }
 0x361   : > { %6292 = vmatprep.subr.bf16.mxu0 %v9770_v14  ;;  %v9840_v14 = vld [vmem:[#allocation10 + $0x3a8] ss:$16 sps:$4 sm:$0xff]  }
 0x362   : > { %6240 = vmatpush1.bf16.msra.mxu1 %v9765_v15  ;;  %v9845_v15 = vld [vmem:[#allocation10 + $0x324] ss:$16 sps:$4 sm:$0xff]  }
 0x363   : > { %6241 = vmatprep.subr.bf16.mxu1 %v9773_v16  ;;  %v9843_v16 = vld [vmem:[#allocation10 + $0x320] ss:$16 sps:$4 sm:$0xff]  }
 0x364   : > { %6293 = vmatpush1.bf16.msra.mxu0 %v9768_v13  ;;  %v9848_v13 = vld [vmem:[#allocation10 + $0x38c] ss:$16 sps:$4 sm:$0xff]  }
 0x365   : > { %6294 = vmatprep.subr.bf16.mxu0 %v9776_v26  ;;  %v9846_v26 = vld [vmem:[#allocation10 + $0x388] ss:$16 sps:$4 sm:$0xff]  }
 0x366   : > { %6242 = vmatpush1.bf16.msra.mxu1 %v9771_v59  ;;  %v9851_v59 = vld [vmem:[#allocation10 + $0x304] ss:$16 sps:$4 sm:$0xff]  }
 0x367   : > { %6243 = vmatprep.subr.bf16.mxu1 %v9779_v37  ;;  %v9849_v37 = vld [vmem:[#allocation10 + $0x300] ss:$16 sps:$4 sm:$0xff]  }
 0x368   : > { %6295 = vmatpush1.bf16.msra.mxu0 %v9774_v31  ;;  %v9854_v31 = vld [vmem:[#allocation10 + $0x36c] ss:$16 sps:$4 sm:$0xff]  }
 0x369   : > { %6366 = vmatprep.subr.bf16.mxu0 %v9782_v18  ;;  %v9852_v18 = vld [vmem:[#allocation10 + $0x368] ss:$16 sps:$4 sm:$0xff]  }
 0x36a   : > { %6244 = vmatpush1.bf16.msra.mxu1 %v9777_v42  ;;  %v9857_v42 = vld [vmem:[#allocation10 + $0xec] ss:$16 sps:$4 sm:$0xff]  }
 0x36b   : > { %8570 = vmatmul.mubr.msk.bf16.vlgmr.msra.gmra.mxu0 %vm1563_vm0, %v10931_v36  ;;  %6245 = vmatprep.subr.bf16.mxu1 %v9785_v2  ;;  %v9855_v2 = vld [vmem:[#allocation10 + $0xe8] ss:$16 sps:$4 sm:$0xff]  }
 0x36c   : > { %6367 = vmatpush1.bf16.msra.mxu0 %v9780_v47  ;;  %6398 = vmatprep.mubr.bf16.mxu0 %v10967_v51  ;;  %v9806_v51 = vld [vmem:[#allocation10 + $0x26c] ss:$16 sps:$4 sm:$0xff]  }
 0x36d   : > { %6368 = vmatprep.subr.bf16.mxu0 %v9788_v38  ;;  %v9860_v47 = vld [vmem:[#allocation10 + $0x34c] ss:$16 sps:$4 sm:$0xff]   ;;  %v9858_v38 = vld [vmem:[#allocation10 + $0x348] ss:$16 sps:$4 sm:$0xff]  }
 0x36e   : > { %6246 = vmatpush1.bf16.msra.mxu1 %v9783_v22  ;;  %v9863_v22 = vld [vmem:[#allocation10 + $0xcc] ss:$16 sps:$4 sm:$0xff]  }
 0x36f   : > { %6247 = vmatprep.subr.bf16.mxu1 %v9791_v30  ;;  %v9861_v30 = vld [vmem:[#allocation10 + $0xc8] ss:$16 sps:$4 sm:$0xff]  }
 0x370   : > { %6369 = vmatpush1.bf16.msra.mxu0 %v9786_v50  ;;  %v9866_v50 = vld [vmem:[#allocation10 + $0x32c] ss:$16 sps:$4 sm:$0xff]  }
 0x371   : > { %6370 = vmatprep.subr.bf16.mxu0 %v9794_v6  ;;  %v9864_v6 = vld [vmem:[#allocation10 + $0x328] ss:$16 sps:$4 sm:$0xff]  }
 0x372   : > { %6248 = vmatpush1.bf16.msra.mxu1 %v9789_v24  ;;  %v9869_v24 = vld [vmem:[#allocation10 + $0xac] ss:$16 sps:$4 sm:$0xff]  }
 0x373   : > { %6249 = vmatprep.subr.bf16.mxu1 %v9797_v44  ;;  %v9867_v44 = vld [vmem:[#allocation10 + $0xa8] ss:$16 sps:$4 sm:$0xff]  }
 0x374   : > { %6371 = vmatpush1.bf16.msra.mxu0 %v9792_v33  ;;  %v9872_v33 = vld [vmem:[#allocation10 + $0x30c] ss:$16 sps:$4 sm:$0xff]  }
 0x375   : > { %6372 = vmatprep.subr.bf16.mxu0 %v9800_v1  ;;  %v9870_v1 = vld [vmem:[#allocation10 + $0x308] ss:$16 sps:$4 sm:$0xff]  }
 0x376   : > { %6250 = vmatpush1.bf16.msra.mxu1 %v9795_v27  ;;  %v9875_v27 = vld [vmem:[#allocation10 + $0x8c] ss:$16 sps:$4 sm:$0xff]  }
 0x377   : > { %6251 = vmatprep.subr.bf16.mxu1 %v9803_v19  ;;  %v9873_v19 = vld [vmem:[#allocation10 + $0x88] ss:$16 sps:$4 sm:$0xff]  }
 0x378   : > { %6373 = vmatpush1.bf16.msra.mxu0 %v9798_v3  ;;  %v9878_v3 = vld [vmem:[#allocation10 + $0x9e4] ss:$16 sps:$4 sm:$0xff]  }
 0x379   : > { %6374 = vmatprep.subr.bf16.mxu0 %v9806_v51  ;;  %v9881_v51 = vld [vmem:[#allocation10 + $0x6c] ss:$16 sps:$4 sm:$0xff]  }
 0x37a   : > { %6252 = vmatpush1.bf16.msra.mxu1 %v9801_v54  ;;  %v9884_v54 = vld [vmem:[#allocation10 + $0x9c4] ss:$16 sps:$4 sm:$0xff]  }
 0x37b   : > { %6253 = vmatprep.subr.bf16.mxu1 %v9809_v32  ;;  %v9882_v32 = vld [vmem:[#allocation10 + $0x9c0] ss:$16 sps:$4 sm:$0xff]  }
 0x37c   : > { %6375 = vmatpush1.bf16.msra.mxu0 %v9804_v58  ;;  %v9879_v58 = vld [vmem:[#allocation10 + $0x68] ss:$16 sps:$4 sm:$0xff]  }
 0x37d   : > { %6376 = vmatprep.subr.bf16.mxu0 %v9812_v60  ;;  %v9887_v60 = vld [vmem:[#allocation10 + $0x4c] ss:$16 sps:$4 sm:$0xff]  }
 0x37e   : > { %6254 = vmatpush2.bf16.msra.mxu1 %v9807_v61  ;;  %v9890_v61 = vld [vmem:[#allocation10 + $0x9a4] ss:$16 sps:$4 sm:$0xff]  }
 0x37f   : > { %6255 = vmatprep.subr.bf16.mxu1 %v9815_v39  ;;  %v9888_v39 = vld [vmem:[#allocation10 + $0x9a0] ss:$16 sps:$4 sm:$0xff]  }
 0x380   : > { %6377 = vmatpush1.bf16.msra.mxu0 %v9810_v25  ;;  %v9885_v25 = vld [vmem:[#allocation10 + $0x48] ss:$16 sps:$4 sm:$0xff]  }
 0x381   : > { %6378 = vmatprep.subr.bf16.mxu0 %v9818_v62  ;;  %v9893_v62 = vld [vmem:[#allocation10 + $0x2c] ss:$16 sps:$4 sm:$0xff]  }
 0x382   : > { %6256 = vmatpush2.bf16.msra.mxu1 %v9813_v4  ;;  %v9896_v4 = vld [vmem:[#allocation10 + $0x984] ss:$16 sps:$4 sm:$0xff]  }
 0x383   : > { %6257 = vmatprep.subr.bf16.mxu1 %v9821_v29  ;;  %v9899_v29 = vld [vmem:[#allocation10 + $0xc] ss:$16 sps:$4 sm:$0xff]  }
 0x384   : > { %6379 = vmatpush1.bf16.msra.mxu0 %v9816_v7  ;;  %v9891_v7 = vld [vmem:[#allocation10 + $0x28] ss:$16 sps:$4 sm:$0xff]  }
 0x385   : > { %6380 = vmatprep.subr.bf16.mxu0 %v9824_v9  ;;  %v9902_v9 = vld [vmem:[#allocation10 + $0x964] ss:$16 sps:$4 sm:$0xff]  }
 0x386   : > { %6258 = vmatpush2.bf16.msra.mxu1 %v9819_v46  ;;  %v9897_v46 = vld [vmem:[#allocation10 + $0x8] ss:$16 sps:$4 sm:$0xff]  }
 0x387   : > { %6259 = vmatprep.subr.bf16.mxu1 %v9827_v10  ;;  %v9905_v10 = vld [vmem:[#allocation10 + $0x1ec] ss:$16 sps:$4 sm:$0xff]  }
 0x388   : > { %6381 = vmatpush1.bf16.msra.mxu0 %v9822_v34  ;;  %v9900_v34 = vld [vmem:[#allocation10 + $0x960] ss:$16 sps:$4 sm:$0xff]  }
 0x389   : > { %6382 = vmatprep.subr.bf16.mxu0 %v9830_v8  ;;  %v9908_v8 = vld [vmem:[#allocation10 + $0x944] ss:$16 sps:$4 sm:$0xff]  }
 0x38a   : > { %6260 = vmatpush2.bf16.msra.mxu1 %v9825_v55  ;;  %v9903_v55 = vld [vmem:[#allocation10 + $0x1e8] ss:$16 sps:$4 sm:$0xff]  }
 0x38b   : > { %6261 = vmatprep.subr.bf16.mxu1 %v9833_v5  ;;  %v9911_v5 = vld [vmem:[#allocation10 + $0x1cc] ss:$16 sps:$4 sm:$0xff]  }
 0x38c   : > { %6383 = vmatpush2.bf16.msra.mxu0 %v9828_v48  ;;  %v9906_v48 = vld [vmem:[#allocation10 + $0x940] ss:$16 sps:$4 sm:$0xff]  }
 0x38d   : > { %6384 = vmatprep.subr.bf16.mxu0 %v9836_v11  ;;  %v9914_v11 = vld [vmem:[#allocation10 + $0x924] ss:$16 sps:$4 sm:$0xff]  }
 0x38e   : > { %6262 = vmatpush2.bf16.msra.mxu1 %v9831_v43  ;;  %v9909_v43 = vld [vmem:[#allocation10 + $0x1c8] ss:$16 sps:$4 sm:$0xff]  }
 0x38f   : > { %6263 = vmatprep.subr.bf16.mxu1 %v9839_v57  ;;  %v9917_v57 = vld [vmem:[#allocation10 + $0x1ac] ss:$16 sps:$4 sm:$0xff]  }
 0x390   : > { %6385 = vmatpush2.bf16.msra.mxu0 %v9834_v12  ;;  %v9912_v12 = vld [vmem:[#allocation10 + $0x920] ss:$16 sps:$4 sm:$0xff]  }
 0x391   : > { %6386 = vmatprep.subr.bf16.mxu0 %v9842_v63  ;;  %v9920_v63 = vld [vmem:[#allocation10 + $0x904] ss:$16 sps:$4 sm:$0xff]  }
 0x392   : > { %6264 = vmatpush2.bf16.msra.mxu1 %v9837_v52  ;;  %v9915_v52 = vld [vmem:[#allocation10 + $0x1a8] ss:$16 sps:$4 sm:$0xff]  }
 0x393   : > { %6265 = vmatprep.subr.bf16.mxu1 %v9845_v15  ;;  %v9923_v15 = vld [vmem:[#allocation10 + $0x18c] ss:$16 sps:$4 sm:$0xff]  }
 0x394   : > { %6387 = vmatpush2.bf16.msra.mxu0 %v9840_v14  ;;  %v9918_v14 = vld [vmem:[#allocation10 + $0x900] ss:$16 sps:$4 sm:$0xff]  }
 0x395   : > { %6388 = vmatprep.subr.bf16.mxu0 %v9848_v13  ;;  %v9926_v13 = vld [vmem:[#allocation10 + $0xae4] ss:$16 sps:$4 sm:$0xff]  }
 0x396   : > { %6266 = vmatpush2.bf16.msra.mxu1 %v9843_v16  ;;  %v9921_v16 = vld [vmem:[#allocation10 + $0x188] ss:$16 sps:$4 sm:$0xff]  }
 0x397   : > { %6267 = vmatprep.subr.bf16.mxu1 %v9851_v59  ;;  %v9929_v59 = vld [vmem:[#allocation10 + $0x16c] ss:$16 sps:$4 sm:$0xff]  }
 0x398   : > { %6389 = vmatpush2.bf16.msra.mxu0 %v9846_v26  ;;  %v9924_v26 = vld [vmem:[#allocation10 + $0xae0] ss:$16 sps:$4 sm:$0xff]  }
 0x399   : > { %6390 = vmatprep.subr.bf16.mxu0 %v9854_v31  ;;  %v9932_v31 = vld [vmem:[#allocation10 + $0xac4] ss:$16 sps:$4 sm:$0xff]  }
 0x39a   : > { %6268 = vmatpush2.bf16.msra.mxu1 %v9849_v37  ;;  %v9927_v37 = vld [vmem:[#allocation10 + $0x168] ss:$16 sps:$4 sm:$0xff]  }
 0x39b   : > { %6323 = vmatprep.subr.bf16.mxu1 %v9857_v42  ;;  %v9935_v42 = vld [vmem:[#allocation10 + $0x14c] ss:$16 sps:$4 sm:$0xff]  }
 0x39c   : > { %6391 = vmatpush2.bf16.msra.mxu0 %v9852_v18  ;;  %v9930_v18 = vld [vmem:[#allocation10 + $0xac0] ss:$16 sps:$4 sm:$0xff]  }
 0x39d   : > { %6392 = vmatprep.subr.bf16.mxu0 %v9860_v47  ;;  %6270 = vmatmul.mubr.bf16.vlgmr.msra.gmra.mxu1 %v10969_v56  ;;  %v9938_v47 = vld [vmem:[#allocation10 + $0xaa4] ss:$16 sps:$4 sm:$0xff]  }
 0x39e   : > { %6324 = vmatpush1.bf16.msra.mxu1 %v9855_v2  ;;  %6355 = vmatprep.mubr.bf16.mxu1 %v10917_v28  ;;  %v9876_v28 = vld [vmem:[#allocation10 + $0x9e0] ss:$16 sps:$4 sm:$0xff]   ;;  %v9933_v2 = vld [vmem:[#allocation10 + $0x148] ss:$16 sps:$4 sm:$0xff]  }
 0x39f   : > { %6325 = vmatprep.subr.bf16.mxu1 %v9863_v22  ;;  %v9941_v22 = vld [vmem:[#allocation10 + $0x12c] ss:$16 sps:$4 sm:$0xff]  }
 0x3a0   : > { %6393 = vmatpush2.bf16.msra.mxu0 %v9858_v38  ;;  %v9936_v38 = vld [vmem:[#allocation10 + $0xaa0] ss:$16 sps:$4 sm:$0xff]  }
 0x3a1   : > { %6394 = vmatprep.subr.bf16.mxu0 %v9866_v50  ;;  %v9944_v50 = vld [vmem:[#allocation10 + $0xa84] ss:$16 sps:$4 sm:$0xff]  }
 0x3a2   : > { %6326 = vmatpush1.bf16.msra.mxu1 %v9861_v30  ;;  %v9939_v30 = vld [vmem:[#allocation10 + $0x128] ss:$16 sps:$4 sm:$0xff]  }
 0x3a3   : > { %6327 = vmatprep.subr.bf16.mxu1 %v9869_v24  ;;  %v9947_v24 = vld [vmem:[#allocation10 + $0x10c] ss:$16 sps:$4 sm:$0xff]  }
 0x3a4   : > { %6395 = vmatpush2.bf16.msra.mxu0 %v9864_v6  ;;  %v9942_v6 = vld [vmem:[#allocation10 + $0xa80] ss:$16 sps:$4 sm:$0xff]  }
 0x3a5   : > { %6396 = vmatprep.subr.bf16.mxu0 %v9872_v33  ;;  %v9950_v33 = vld [vmem:[#allocation10 + $0xa64] ss:$16 sps:$4 sm:$0xff]  }
 0x3a6   : > { %6328 = vmatpush1.bf16.msra.mxu1 %v9867_v44  ;;  %v9945_v44 = vld [vmem:[#allocation10 + $0x108] ss:$16 sps:$4 sm:$0xff]  }
 0x3a7   : > { %6329 = vmatprep.subr.bf16.mxu1 %v9875_v27  ;;  %v9953_v27 = vld [vmem:[#allocation10 + $0x46c] ss:$16 sps:$4 sm:$0xff]  }
 0x3a8   : > { %6397 = vmatpush2.bf16.msra.mxu0 %v9870_v1  ;;  %v9948_v1 = vld [vmem:[#allocation10 + $0xa60] ss:$16 sps:$4 sm:$0xff]  }
 0x3a9   : > { %7355 = vmatprep.subr.bf16.mxu0 %v9878_v3  ;;  %v9956_v3 = vld [vmem:[#allocation10 + $0xa44] ss:$16 sps:$4 sm:$0xff]  }
 0x3aa   : > { %6330 = vmatpush1.bf16.msra.mxu1 %v9873_v19  ;;  %v9951_v19 = vld [vmem:[#allocation10 + $0x468] ss:$16 sps:$4 sm:$0xff]  }
 0x3ab   : > { %6399 = vmatmul.mubr.bf16.vlgmr.msra.gmra.mxu0 %v10969_v56  ;;  %6331 = vmatprep.subr.bf16.mxu1 %v9881_v51  ;;  %v9894_v56 = vld [vmem:[#allocation10 + $0x980] ss:$16 sps:$4 sm:$0xff]   ;;  %v9959_v51 = vld [vmem:[#allocation10 + $0x44c] ss:$16 sps:$4 sm:$0xff]  }
 0x3ac   : > { %7356 = vmatpush1.bf16.msra.mxu0 %v9876_v28  ;;  %7387 = vmatprep.mubr.bf16.mxu0 %v10926_v49  ;;  %v9954_v28 = vld [vmem:[#allocation10 + $0xa40] ss:$16 sps:$4 sm:$0xff]  }
 0x3ad   : > { %7357 = vmatprep.subr.bf16.mxu0 %v9884_v54  ;;  %v9962_v54 = vld [vmem:[#allocation10 + $0xa24] ss:$16 sps:$4 sm:$0xff]  }
 0x3ae   : > { %6332 = vmatpush1.bf16.msra.mxu1 %v9879_v58  ;;  %v9957_v58 = vld [vmem:[#allocation10 + $0x448] ss:$16 sps:$4 sm:$0xff]  }
 0x3af   : > { %6333 = vmatprep.subr.bf16.mxu1 %v9887_v60  ;;  %v9965_v60 = vld [vmem:[#allocation10 + $0x42c] ss:$16 sps:$4 sm:$0xff]  }
 0x3b0   : > { %7358 = vmatpush1.bf16.msra.mxu0 %v9882_v32  ;;  %v9960_v32 = vld [vmem:[#allocation10 + $0xa20] ss:$16 sps:$4 sm:$0xff]  }
 0x3b1   : > { %7359 = vmatprep.subr.bf16.mxu0 %v9890_v61  ;;  %v9968_v61 = vld [vmem:[#allocation10 + $0xa04] ss:$16 sps:$4 sm:$0xff]  }
 0x3b2   : > { %6334 = vmatpush1.bf16.msra.mxu1 %v9885_v25  ;;  %v9963_v25 = vld [vmem:[#allocation10 + $0x428] ss:$16 sps:$4 sm:$0xff]  }
 0x3b3   : > { %6335 = vmatprep.subr.bf16.mxu1 %v9893_v62  ;;  %v9971_v62 = vld [vmem:[#allocation10 + $0x40c] ss:$16 sps:$4 sm:$0xff]  }
 0x3b4   : > { %7360 = vmatpush1.bf16.msra.mxu0 %v9888_v39  ;;  %v9966_v39 = vld [vmem:[#allocation10 + $0xa00] ss:$16 sps:$4 sm:$0xff]  }
 0x3b5   : > { %7361 = vmatprep.subr.bf16.mxu0 %v9896_v4  ;;  %v9974_v4 = vld [vmem:[#allocation10 + $0xd64] ss:$16 sps:$4 sm:$0xff]  }
 0x3b6   : > { %6336 = vmatpush1.bf16.msra.mxu1 %v9891_v7  ;;  %v9972_v7 = vld [vmem:[#allocation10 + $0xd60] ss:$16 sps:$4 sm:$0xff]  }
 0x3b7   : > { %6337 = vmatprep.subr.bf16.mxu1 %v9899_v29  ;;  %v9980_v29 = vld [vmem:[#allocation10 + $0xd44] ss:$16 sps:$4 sm:$0xff]  }
 0x3b8   : > { %7362 = vmatpush1.bf16.msra.mxu0 %v9894_v56  ;;  %v9977_v56 = vld [vmem:[#allocation10 + $0xbe4] ss:$16 sps:$4 sm:$0xff]  }
 0x3b9   : > { %7363 = vmatprep.subr.bf16.mxu0 %v9902_v9  ;;  %v9975_v9 = vld [vmem:[#allocation10 + $0xbe0] ss:$16 sps:$4 sm:$0xff]  }
 0x3ba   : > { %6338 = vmatpush1.bf16.msra.mxu1 %v9897_v46  ;;  %v11002_v46 = vpop.f32.mrf.mxu0 }
 0x3bb   : > { %6339 = vmatprep.subr.bf16.mxu1 %v9905_v10  ;;  %v9983_v10 = vld [vmem:[#allocation10 + $0xbc4] ss:$16 sps:$4 sm:$0xff]  }
 0x3bc   : > { %7364 = vmatpush1.bf16.msra.mxu0 %v9900_v34  ;;  %v9978_v34 = vld [vmem:[#allocation10 + $0xd40] ss:$16 sps:$4 sm:$0xff]  }
 0x3bd   : > { %7365 = vmatprep.subr.bf16.mxu0 %v9908_v8  ;;  %v9986_v8 = vld [vmem:[#allocation10 + $0xd24] ss:$16 sps:$4 sm:$0xff]  }
 0x3be   : > { %6340 = vmatpush2.bf16.msra.mxu1 %v9903_v55  ;;  %v6454_v55 = vld [vmem:[#allocation3 + $0x10] sm:$0xe] }
 0x3bf   : > { %6341 = vmatprep.subr.bf16.mxu1 %v9911_v5  ;;  %v11008_v5 = vpop.f32.mrf.mxu0 }
 0x3c0   : > { %7366 = vmatpush1.bf16.msra.mxu0 %v9906_v48  ;;  %v9981_v48 = vld [vmem:[#allocation10 + $0xbc0] ss:$16 sps:$4 sm:$0xff]  }
 0x3c1   : > { %7367 = vmatprep.subr.bf16.mxu0 %v9914_v11  ;;  %v9984_v11 = vld [vmem:[#allocation10 + $0xd20] ss:$16 sps:$4 sm:$0xff]  }
 0x3c2   : > { %6342 = vmatpush2.bf16.msra.mxu1 %v9909_v43  ;;  %v9989_v43 = vld [vmem:[#allocation10 + $0xba4] ss:$16 sps:$4 sm:$0xff]  }
 0x3c3   : > { %6343 = vmatprep.subr.bf16.mxu1 %v9917_v57 }
 0x3c4   : > { %7368 = vmatpush1.bf16.msra.mxu0 %v9912_v12  ;;  %v10144_v12 = vld [vmem:[#allocation3 + $0x24] sm:$0xf] }
 0x3c5   : > { %7369 = vmatprep.subr.bf16.mxu0 %v9920_v63  ;;  %v8576_v57 = vcombine.low %v6454_v55, %v10144_v12  ;;  %v9992_v63 = vld [vmem:[#allocation10 + $0xd04] ss:$16 sps:$4 sm:$0xff]   ;;  %v10029_v55 = vld [vmem:[#allocation10 + $0xcc0] ss:$16 sps:$4 sm:$0xff]  }
 0x3c6   : > { %6344 = vmatpush2.bf16.msra.mxu1 %v9915_v52  ;;  %v9987_v52 = vld [vmem:[#allocation10 + $0xba0] ss:$16 sps:$4 sm:$0xff]   ;;  %v10037_v12 = vld [vmem:[#allocation10 + $0xca4] ss:$16 sps:$4 sm:$0xff]  }
 0x3c7   : > { %6345 = vmatprep.subr.bf16.mxu1 %v9923_v15  ;;  %v9995_v15 = vld [vmem:[#allocation10 + $0xb84] ss:$16 sps:$4 sm:$0xff]  }
 0x3c8   : > { %7370 = vmatpush1.bf16.msra.mxu0 %v9918_v14  ;;  %v11010_v14 = vpop.f32.mrf.mxu0 }
 0x3c9   : > { %7371 = vmatprep.subr.bf16.mxu0 %v9926_v13  ;;  %v6625_v13 = vrot.slane %v8576_v57, 1 }
 0x3ca   : > { %6346 = vmatpush2.bf16.msra.mxu1 %v9921_v16  ;;  %v10145_v16 = vld [vmem:[#allocation3 + $0x38] ss:$0 sps:$4 sm:$0x11]  }
 0x3cb   : > { %6347 = vmatprep.subr.bf16.mxu1 %v9929_v59  ;;  %v9998_v59 = vld [vmem:[#allocation10 + $0xbec] ss:$16 sps:$4 sm:$0xff]  }
 0x3cc   : > { %7372 = vmatpush2.bf16.msra.mxu0 %v9924_v26  ;;  %v6626_v26 = vrot.slane %v10145_v16, 1 }
 0x3cd   : > { %7373 = vmatprep.subr.bf16.mxu0 %v9932_v31  ;;  %v9993_v31 = vld [vmem:[#allocation10 + $0xb80] ss:$16 sps:$4 sm:$0xff]  }
 0x3ce   : > { %6348 = vmatpush2.bf16.msra.mxu1 %v9927_v37  ;;  %v11012_v37 = vpop.f32.mrf.mxu0 }
 0x3cf   : > { %6349 = vmatprep.subr.bf16.mxu1 %v9935_v42  ;;  %v9996_v42 = vld [vmem:[#allocation10 + $0xbe8] ss:$16 sps:$4 sm:$0xff]  }
 0x3d0   : > { %7374 = vmatpush2.bf16.msra.mxu0 %v9930_v18  ;;  %v11015_v18 = vsel %vm2970_vm5, %v6625_v13, %v6626_v26  ;;  %v10038_v26 = vld [vmem:[#allocation10 + $0xb08] ss:$16 sps:$4 sm:$0xff]  }
 0x3d1   : > { %7375 = vmatprep.subr.bf16.mxu0 %v9938_v47  ;;  %v10001_v47 = vld [vmem:[#allocation10 + $0xb64] ss:$16 sps:$4 sm:$0xff]  }
 0x3d2   : > { %6350 = vmatpush2.bf16.msra.mxu1 %v9933_v2  ;;  %v10004_v2 = vld [vmem:[#allocation10 + $0xbcc] ss:$16 sps:$4 sm:$0xff]  }
 0x3d3   : > { %6351 = vmatprep.subr.bf16.mxu1 %v9941_v22  ;;  %v9999_v22 = vld [vmem:[#allocation10 + $0xb60] ss:$16 sps:$4 sm:$0xff]  }
 0x3d4   : > { %7376 = vmatpush2.bf16.msra.mxu0 %v9936_v38  ;;  %v11017_v38 = vpop.f32.mrf.mxu0 }
 0x3d5   : > { %7377 = vmatprep.subr.bf16.mxu0 %v9944_v50  ;;  %v10002_v50 = vld [vmem:[#allocation10 + $0xbc8] ss:$16 sps:$4 sm:$0xff]  }
 0x3d6   : > { %6352 = vmatpush2.bf16.msra.mxu1 %v9939_v30  ;;  %v10007_v30 = vld [vmem:[#allocation10 + $0xb44] ss:$16 sps:$4 sm:$0xff]  }
 0x3d7   : > { %6353 = vmatprep.subr.bf16.mxu1 %v9947_v24  ;;  %v11022_v24 = vpop.f32.mrf.mxu0 }
 0x3d8   : > { %7378 = vmatpush2.bf16.msra.mxu0 %v9942_v6  ;;  %v10010_v6 = vld [vmem:[#allocation10 + $0xbac] ss:$16 sps:$4 sm:$0xff]  }
 0x3d9   : > { %7379 = vmatprep.subr.bf16.mxu0 %v9950_v33  ;;  %v10005_v33 = vld [vmem:[#allocation10 + $0xb40] ss:$16 sps:$4 sm:$0xff]  }
 0x3da   : > { %6354 = vmatpush2.bf16.msra.mxu1 %v9945_v44  ;;  %v11024_v44 = vpop.f32.mrf.mxu1 }
 0x3db   : > { %6417 = vmatprep.subr.bf16.mxu1 %v9953_v27  ;;  %v10013_v27 = vld [vmem:[#allocation10 + $0xb24] ss:$16 sps:$4 sm:$0xff]  }
 0x3dc   : > { %7380 = vmatpush2.bf16.msra.mxu0 %v9948_v1  ;;  %v10008_v1 = vld [vmem:[#allocation10 + $0xba8] ss:$16 sps:$4 sm:$0xff]  }
 0x3dd   : > { %7381 = vmatprep.subr.bf16.mxu0 %v9956_v3  ;;  %6356 = vmatmul.mubr.bf16.vlgmr.msra.gmra.mxu1 %v10919_v41  ;;  %v9969_v41 = vld [vmem:[#allocation10 + $0x408] ss:$16 sps:$4 sm:$0xff]   ;;  %v10016_v3 = vld [vmem:[#allocation10 + $0xb8c] ss:$16 sps:$4 sm:$0xff]  }
 0x3de   : > { %6418 = vmatpush1.bf16.msra.mxu1 %v9951_v19  ;;  %6441 = vmatprep.mubr.bf16.mxu1 %v10369_v0  ;;  %v11026_v19 = vpop.f32.mrf.mxu0 }
 0x3df   : > { %6419 = vmatprep.subr.bf16.mxu1 %v9959_v51  ;;  %v10014_v51 = vld [vmem:[#allocation10 + $0xb88] ss:$16 sps:$4 sm:$0xff]  }
 0x3e0   : > { %7382 = vmatpush2.bf16.msra.mxu0 %v9954_v28  ;;  %v11028_v28 = vpop.f32.mrf.mxu1 }
 0x3e1   : > { %7383 = vmatprep.subr.bf16.mxu0 %v9962_v54  ;;  %v10019_v54 = vld [vmem:[#allocation10 + $0xb04] ss:$16 sps:$4 sm:$0xff]  }
 0x3e2   : > { %6420 = vmatpush1.bf16.msra.mxu1 %v9957_v58  ;;  %v10022_v58 = vld [vmem:[#allocation10 + $0xb6c] ss:$16 sps:$4 sm:$0xff]  }
 0x3e3   : > { %6421 = vmatprep.subr.bf16.mxu1 %v9965_v60  ;;  %v10017_v60 = vld [vmem:[#allocation10 + $0xb00] ss:$16 sps:$4 sm:$0xff]  }
 0x3e4   : > { %7384 = vmatpush2.bf16.msra.mxu0 %v9960_v32  ;;  %v11030_v32 = vpop.f32.mrf.mxu0 }
 0x3e5   : > { %7385 = vmatprep.subr.bf16.mxu0 %v9968_v61  ;;  %v11032_v61 = vpop.f32.mrf.mxu1 }
 0x3e6   : > { %6422 = vmatpush1.bf16.msra.mxu1 %v9963_v25  ;;  %v5416_v25 = vpop.f32.mrf.mxu0 }
 0x3e7   : > { %6423 = vmatprep.subr.bf16.mxu1 %v9971_v62  ;;  %v10025_v62 = vld [vmem:[#allocation10 + $0xce4] ss:$16 sps:$4 sm:$0xff]  }
 0x3e8   : > { %7386 = vmatpush2.bf16.msra.mxu0 %v9966_v39  ;;  %v10020_v39 = vld [vmem:[#allocation10 + $0xb68] ss:$16 sps:$4 sm:$0xff]  }
 0x3e9   : > { %7449 = vmatprep.subr.bf16.mxu0 %v9974_v4  ;;  %v10028_v4 = vld [vmem:[#allocation10 + $0xb4c] ss:$16 sps:$4 sm:$0xff]  }
 0x3ea   : > { %6424 = vmatpush1.bf16.msra.mxu1 %v9969_v41  ;;  %v10023_v41 = vld [vmem:[#allocation10 + $0xce0] ss:$16 sps:$4 sm:$0xff]  }
 0x3eb   : > { %7388 = vmatmul.mubr.bf16.vlgmr.msra.gmra.mxu0 %v10929_v21  ;;  %7398 = vmatprep.subr.bf16.mxu1 %v9977_v56  ;;  %v5418_v56 = vpop.f32.mrf.mxu0 }
 0x3ec   : > { %7450 = vmatpush1.bf16.msra.mxu0 %v9972_v7  ;;  %7473 = vmatprep.mubr.bf16.mxu0 %v10369_v0  ;;  %v11034_v7 = vpop.f32.mrf.mxu1 }
 0x3ed   : > { %7451 = vmatprep.subr.bf16.mxu0 %v9980_v29  ;;  %8571 = vmatmul.mubr.msk.bf16.vlgmr.msra.gmra.mxu1 %vm1563_vm0, %v10931_v36  ;;  %v9990_v36 = vld [vmem:[#allocation10 + $0xd00] ss:$16 sps:$4 sm:$0xff]   ;;  %v10026_v29 = vld [vmem:[#allocation10 + $0xb48] ss:$16 sps:$4 sm:$0xff]  }
 0x3ee   : > { %7399 = vmatpush1.bf16.msra.mxu1 %v9975_v9  ;;  %7430 = vmatprep.mubr.bf16.mxu1 %v10976_v35  ;;  %v10031_v9 = vld [vmem:[#allocation10 + $0xcc4] ss:$16 sps:$4 sm:$0xff]  }
 0x3ef   : > { %7400 = vmatprep.subr.bf16.mxu1 %v9983_v10 }
 0x3f0   : > { %7452 = vmatpush1.bf16.msra.mxu0 %v9978_v34  ;;  %v10034_v34 = vld [vmem:[#allocation10 + $0xb2c] ss:$16 sps:$4 sm:$0xff]  }
 0x3f1   : > { %7453 = vmatprep.subr.bf16.mxu0 %v9986_v8 }
 0x3f2   : > { %7401 = vmatpush1.bf16.msra.mxu1 %v9981_v48  ;;  %v5420_v48 = vpop.f32.mrf.mxu0 }
 0x3f3   : > { %7402 = vmatprep.subr.bf16.mxu1 %v9989_v43  ;;  %v10032_v43 = vld [vmem:[#allocation10 + $0xb28] ss:$16 sps:$4 sm:$0xff]  }
 0x3f4   : > { %7454 = vmatpush1.bf16.msra.mxu0 %v9984_v11  ;;  %v5422_v13 = vpop.f32.mrf.mxu0 }
 0x3f5   : > { %7455 = vmatprep.subr.bf16.mxu0 %v9992_v63  ;;  %v10040_v63 = vld [vmem:[#allocation10 + $0xb0c] ss:$16 sps:$4 sm:$0xff]  }
 0x3f6   : > { %7403 = vmatpush1.bf16.msra.mxu1 %v9987_v52 }
 0x3f7   : > { %7404 = vmatprep.subr.bf16.mxu1 %v9995_v15  ;;  %v10035_v15 = vld [vmem:[#allocation10 + $0xca0] ss:$16 sps:$4 sm:$0xff]  }
 0x3f8   : > { %7456 = vmatpush1.bf16.msra.mxu0 %v9990_v36 }
 0x3f9   : > { %7527 = vmatprep.subr.bf16.mxu0 %v9998_v59  ;;  %v10043_v59 = vld [vmem:[#allocation10 + $0xc84] ss:$16 sps:$4 sm:$0xff]  }
 0x3fa   : > { %7405 = vmatpush1.bf16.msra.mxu1 %v9993_v31 }
 0x3fb   : > { %8721 = vmatmul.mubr.msk.bf16.vlgmr.msra.gmra.mxu0 %vm1563_vm0, %v11015_v18  ;;  %7406 = vmatprep.subr.bf16.mxu1 %v10001_v47  ;;  %v10041_v47 = vld [vmem:[#allocation10 + $0xc80] ss:$16 sps:$4 sm:$0xff]  }
 0x3fc   : > { %7528 = vmatpush1.bf16.msra.mxu0 %v9996_v42  ;;  %7559 = vmatprep.mubr.bf16.mxu0 %v10976_v35  ;;  %v10011_v35 = vld [vmem:[#allocation10 + $0xb20] ss:$16 sps:$4 sm:$0xff]   ;;  %v10046_v42 = vld [vmem:[#allocation10 + $0xcec] ss:$16 sps:$4 sm:$0xff]  }
 0x3fd   : > { %7529 = vmatprep.subr.bf16.mxu0 %v10004_v2  ;;  %v10044_v2 = vld [vmem:[#allocation10 + $0xce8] ss:$16 sps:$4 sm:$0xff]  }
 0x3fe   : > { %7407 = vmatpush1.bf16.msra.mxu1 %v9999_v22  ;;  %v10049_v22 = vld [vmem:[#allocation10 + $0xc64] ss:$16 sps:$4 sm:$0xff]  }
 0x3ff   : > { %7408 = vmatprep.subr.bf16.mxu1 %v10007_v30  ;;  %v10047_v30 = vld [vmem:[#allocation10 + $0xc60] ss:$16 sps:$4 sm:$0xff]  }
 0x400   : > { %7530 = vmatpush1.bf16.msra.mxu0 %v10002_v50  ;;  %v10052_v50 = vld [vmem:[#allocation10 + $0xccc] ss:$16 sps:$4 sm:$0xff]  }
 0x401   : > { %7531 = vmatprep.subr.bf16.mxu0 %v10010_v6  ;;  %v10050_v6 = vld [vmem:[#allocation10 + $0xcc8] ss:$16 sps:$4 sm:$0xff]  }
 0x402   : > { %7409 = vmatpush1.bf16.msra.mxu1 %v10005_v33  ;;  %v10055_v33 = vld [vmem:[#allocation10 + $0xc44] ss:$16 sps:$4 sm:$0xff]  }
 0x403   : > { %7410 = vmatprep.subr.bf16.mxu1 %v10013_v27 }
 0x404   : > { %7532 = vmatpush1.bf16.msra.mxu0 %v10008_v1  ;;  %v10058_v1 = vld [vmem:[#allocation10 + $0xcac] ss:$16 sps:$4 sm:$0xff]  }
 0x405   : > { %7533 = vmatprep.subr.bf16.mxu0 %v10016_v3 }
 0x406   : > { %7411 = vmatpush1.bf16.msra.mxu1 %v10011_v35  ;;  %v10053_v35 = vld [vmem:[#allocation10 + $0xc40] ss:$16 sps:$4 sm:$0xff]  }
 0x407   : > { %7412 = vmatprep.subr.bf16.mxu1 %v10019_v54  ;;  %v10056_v54 = vld [vmem:[#allocation10 + $0xca8] ss:$16 sps:$4 sm:$0xff]  }
 0x408   : > { %7534 = vmatpush1.bf16.msra.mxu0 %v10014_v51 }
 0x409   : > { %7535 = vmatprep.subr.bf16.mxu0 %v10022_v58  ;;  %v10061_v58 = vld [vmem:[#allocation10 + $0xc24] ss:$16 sps:$4 sm:$0xff]  }
 0x40a   : > { %7413 = vmatpush1.bf16.msra.mxu1 %v10017_v60 }
 0x40b   : > { %7414 = vmatprep.subr.bf16.mxu1 %v10025_v62 }
 0x40c   : > { %7536 = vmatpush1.bf16.msra.mxu0 %v10020_v39 }
 0x40d   : > { %7537 = vmatprep.subr.bf16.mxu0 %v10028_v4  ;;  %v5373_v10 = vpop.f32.mrf.mxu1  ;;  %v10059_v4 = vld [vmem:[#allocation10 + $0xc20] ss:$16 sps:$4 sm:$0xff]  }
 0x40e   : > { %v5417_v8 = vadd.f32 %v5416_v25, %v5373_v10  ;;  %7415 = vmatpush2.bf16.msra.mxu1 %v10023_v41  ;;  %v10064_v25 = vld [vmem:[#allocation10 + $0xc8c] ss:$16 sps:$4 sm:$0xff]   ;;  %v10065_v10 = vld [vmem:[#allocation10 + $0xc00] ss:$16 sps:$4 sm:$0xff]  }
 0x40f   : > { %v5375_v11 = vpop.f32.mrf.mxu1  ;;  %7416 = vmatprep.subr.bf16.mxu1 %v10031_v9 }
 0x410   : > { %7538 = vmatpush1.bf16.msra.mxu0 %v10026_v29  ;;  %v5419_v57 = vadd.f32 %v5418_v56, %v5375_v11  ;;  %v10062_v56 = vld [vmem:[#allocation10 + $0xc88] ss:$16 sps:$4 sm:$0xff]   ;;  %v10067_v29 = vld [vmem:[#allocation10 + $0xc04] ss:$16 sps:$4 sm:$0xff]  }
 0x411   : > { %7539 = vmatprep.subr.bf16.mxu0 %v10034_v34  ;;  %v5377_v52 = vpop.f32.mrf.mxu1  ;;  %v10070_v34 = vld [vmem:[#allocation10 + $0xc6c] ss:$16 sps:$4 sm:$0xff]   ;;  %v10071_v11 = vld [vmem:[#allocation10 + $0x9e8] ss:$16 sps:$4 sm:$0xff]  }
 0x412   : > { %v5421_v36 = vadd.f32 %v5420_v48, %v5377_v52  ;;  %7417 = vmatpush2.bf16.msra.mxu1 %v10029_v55  ;;  %v10073_v55 = vld [vmem:[#allocation10 + $0x9ec] ss:$16 sps:$4 sm:$0xff]   ;;  %v10080_v52 = vld [vmem:[#allocation10 + $0xc28] ss:$16 sps:$4 sm:$0xff]  }
 0x413   : > { %v5379_v16 = vpop.f32.mrf.mxu1  ;;  %7418 = vmatprep.subr.bf16.mxu1 %v10037_v12  ;;  %v10076_v48 = vld [vmem:[#allocation10 + $0xc4c] ss:$16 sps:$4 sm:$0xff]  }
 0x414   : > { %7540 = vmatpush1.bf16.msra.mxu0 %v10032_v43  ;;  %v5423_v31 = vadd.f32 %v5422_v13, %v5379_v16  ;;  %v10074_v43 = vld [vmem:[#allocation10 + $0xc48] ss:$16 sps:$4 sm:$0xff]   ;;  %v10079_v12 = vld [vmem:[#allocation10 + $0x9cc] ss:$16 sps:$4 sm:$0xff]  }
 0x415   : > { %7541 = vmatprep.subr.bf16.mxu0 %v10040_v63  ;;  %v10077_v63 = vld [vmem:[#allocation10 + $0x9c8] ss:$16 sps:$4 sm:$0xff]  }
 0x416   : > { %7419 = vmatpush2.bf16.msra.mxu1 %v10035_v15  ;;  %v10088_v15 = vld [vmem:[#allocation10 + $0xc0c] ss:$16 sps:$4 sm:$0xff]   ;;  %v10083_v13 = vld [vmem:[#allocation10 + $0x9a8] ss:$16 sps:$4 sm:$0xff]  }
 0x417   : > { %7420 = vmatprep.subr.bf16.mxu1 %v10043_v59  ;;  %v10086_v16 = vld [vmem:[#allocation10 + $0xc08] ss:$16 sps:$4 sm:$0xff]  }
 0x418   : > { %7542 = vmatpush1.bf16.msra.mxu0 %v10038_v26  ;;  %v10091_v26 = vld [vmem:[#allocation10 + $0x98c] ss:$16 sps:$4 sm:$0xff]   ;;  %v10089_v59 = vld [vmem:[#allocation10 + $0x988] ss:$16 sps:$4 sm:$0xff]  }
 0x419   : > { %7543 = vmatprep.subr.bf16.mxu0 %v10046_v42  ;;  %v10097_v42 = vld [vmem:[#allocation10 + $0x94c] ss:$16 sps:$4 sm:$0xff]  }
 0x41a   : > { %7421 = vmatpush2.bf16.msra.mxu1 %v10041_v47  ;;  %v10095_v47 = vld [vmem:[#allocation10 + $0x948] ss:$16 sps:$4 sm:$0xff]  }
 0x41b   : > { %7422 = vmatprep.subr.bf16.mxu1 %v10049_v22  ;;  %v10098_v22 = vld [vmem:[#allocation10 + $0x928] ss:$16 sps:$4 sm:$0xff]  }
 0x41c   : > { %7544 = vmatpush2.bf16.msra.mxu0 %v10044_v2  ;;  %v10100_v2 = vld [vmem:[#allocation10 + $0x92c] ss:$16 sps:$4 sm:$0xff]  }
 0x41d   : > { %7545 = vmatprep.subr.bf16.mxu0 %v10052_v50  ;;  %v5459_v27 = vpop.f32.mrf.mxu1  ;;  %v10103_v50 = vld [vmem:[#allocation10 + $0x90c] ss:$16 sps:$4 sm:$0xff]  }
 0x41e   : > { %v11036_v3 = vadd.f32 %v5459_v27, %v5417_v8  ;;  %7423 = vmatpush2.bf16.msra.mxu1 %v10047_v30  ;;  %v10068_v8 = vld [vmem:[#allocation10 + $0xc68] ss:$16 sps:$4 sm:$0xff]   ;;  %v10112_v27 = vld [vmem:[#allocation10 + $0xaac] ss:$16 sps:$4 sm:$0xff]  }
 0x41f   : > { %v5461_v51 = vpop.f32.mrf.mxu1  ;;  %7424 = vmatprep.subr.bf16.mxu1 %v10055_v33  ;;  %v10101_v30 = vld [vmem:[#allocation10 + $0x908] ss:$16 sps:$4 sm:$0xff]  }
 0x420   : > { %7546 = vmatpush2.bf16.msra.mxu0 %v10050_v6  ;;  %v11038_v60 = vadd.f32 %v5461_v51, %v5419_v57  ;;  %v10082_v57 = vld [vmem:[#allocation10 + $0xc2c] ss:$16 sps:$4 sm:$0xff]   ;;  %v10104_v33 = vld [vmem:[#allocation10 + $0xae8] ss:$16 sps:$4 sm:$0xff]  }
 0x421   : > { %7547 = vmatprep.subr.bf16.mxu0 %v10058_v1  ;;  %v5463_v39 = vpop.f32.mrf.mxu1  ;;  %v10106_v6 = vld [vmem:[#allocation10 + $0xaec] ss:$16 sps:$4 sm:$0xff]  }
 0x422   : > { %v11040_v62 = vadd.f32 %v5463_v39, %v5421_v36  ;;  %7425 = vmatpush2.bf16.msra.mxu1 %v10053_v35  ;;  %v10085_v36 = vld [vmem:[#allocation10 + $0x9ac] ss:$16 sps:$4 sm:$0xff]   ;;  %v10110_v35 = vld [vmem:[#allocation10 + $0xaa8] ss:$16 sps:$4 sm:$0xff]  }
 0x423   : > { %v5465_v41 = vpop.f32.mrf.mxu1  ;;  %7426 = vmatprep.subr.bf16.mxu1 %v10061_v58  ;;  %v10109_v1 = vld [vmem:[#allocation10 + $0xacc] ss:$16 sps:$4 sm:$0xff]  }
 0x424   : > { %7548 = vmatpush2.bf16.msra.mxu0 %v10056_v54  ;;  %v11042_v9 = vadd.f32 %v5465_v41, %v5423_v31  ;;  %v10094_v31 = vld [vmem:[#allocation10 + $0x96c] ss:$16 sps:$4 sm:$0xff]   ;;  %v10113_v54 = vld [vmem:[#allocation10 + $0xa88] ss:$16 sps:$4 sm:$0xff]  }
 0x425   : > { %7549 = vmatprep.subr.bf16.mxu0 %v10064_v25  ;;  %v10115_v51 = vld [vmem:[#allocation10 + $0xa8c] ss:$16 sps:$4 sm:$0xff]   ;;  %v10116_v25 = vld [vmem:[#allocation10 + $0xa68] ss:$16 sps:$4 sm:$0xff]  }
 0x426   : > { %7427 = vmatpush2.bf16.msra.mxu1 %v10059_v4  ;;  %v10118_v58 = vld [vmem:[#allocation10 + $0xa6c] ss:$16 sps:$4 sm:$0xff]   ;;  %v10119_v4 = vld [vmem:[#allocation10 + $0xa48] ss:$16 sps:$4 sm:$0xff]  }
 0x427   : > { %7428 = vmatprep.subr.bf16.mxu1 %v10067_v29  ;;  %v10121_v39 = vld [vmem:[#allocation10 + $0xa4c] ss:$16 sps:$4 sm:$0xff]  }
 0x428   : > { %7550 = vmatpush2.bf16.msra.mxu0 %v10062_v56  ;;  %v10124_v41 = vld [vmem:[#allocation10 + $0xa2c] ss:$16 sps:$4 sm:$0xff]   ;;  %v10122_v56 = vld [vmem:[#allocation10 + $0xa28] ss:$16 sps:$4 sm:$0xff]  }
 0x429   : > { %7551 = vmatprep.subr.bf16.mxu0 %v10070_v34  ;;  %v10127_v29 = vld [vmem:[#allocation10 + $0xa0c] ss:$16 sps:$4 sm:$0xff]   ;;  %v10125_v34 = vld [vmem:[#allocation10 + $0xa08] ss:$16 sps:$4 sm:$0xff]  }
 0x42a   : > { %7429 = vmatpush2.bf16.msra.mxu1 %v10065_v10  ;;  %v10130_v10 = vld [vmem:[#allocation10 + $0xd6c] ss:$16 sps:$4 sm:$0xff]  }
 0x42b   : > { %7484 = vmatprep.subr.bf16.mxu1 %v10073_v55  ;;  %v10133_v55 = vld [vmem:[#allocation10 + $0xd4c] ss:$16 sps:$4 sm:$0xff]  }
 0x42c   : > { %7552 = vmatpush2.bf16.msra.mxu0 %v10068_v8  ;;  %v10128_v8 = vld [vmem:[#allocation10 + $0xd68] ss:$16 sps:$4 sm:$0xff]  }
 0x42d   : > { %7553 = vmatprep.subr.bf16.mxu0 %v10076_v48  ;;  %7431 = vmatmul.mubr.bf16.vlgmr.msra.gmra.mxu1 %v10979_v40  ;;  %v10131_v48 = vld [vmem:[#allocation10 + $0xd48] ss:$16 sps:$4 sm:$0xff]  }
 0x42e   : > { %7485 = vmatpush1.bf16.msra.mxu1 %v10071_v11  ;;  %7516 = vmatprep.mubr.bf16.mxu1 %v10926_v49  ;;  %v10092_v49 = vld [vmem:[#allocation10 + $0x968] ss:$16 sps:$4 sm:$0xff]   ;;  %v10136_v11 = vld [vmem:[#allocation10 + $0xd2c] ss:$16 sps:$4 sm:$0xff]  }
 0x42f   : > { %7486 = vmatprep.subr.bf16.mxu1 %v10079_v12  ;;  %v10139_v12 = vld [vmem:[#allocation10 + $0xd0c] ss:$16 sps:$4 sm:$0xff]  }
 0x430   : > { %7554 = vmatpush2.bf16.msra.mxu0 %v10074_v43  ;;  %v10134_v43 = vld [vmem:[#allocation10 + $0xd28] ss:$16 sps:$4 sm:$0xff]  }
 0x431   : > { %7555 = vmatprep.subr.bf16.mxu0 %v10082_v57  ;;  %v10137_v57 = vld [vmem:[#allocation10 + $0xd08] ss:$16 sps:$4 sm:$0xff]  }
 0x432   : > { %7487 = vmatpush1.bf16.msra.mxu1 %v10077_v63  ;;  %v6228_v63 = vpop.f32.mrf.mxu0 }
 0x433   : > { %7488 = vmatprep.subr.bf16.mxu1 %v10085_v36 }
 0x434   : > { %7556 = vmatpush2.bf16.msra.mxu0 %v10080_v52  ;;  %v6230_v52 = vpop.f32.mrf.mxu0 }
 0x435   : > { %7557 = vmatprep.subr.bf16.mxu0 %v10088_v15 }
 0x436   : > { %7489 = vmatpush1.bf16.msra.mxu1 %v10083_v13 }
 0x437   : > { %7490 = vmatprep.subr.bf16.mxu1 %v10091_v26 }
 0x438   : > { %7558 = vmatpush2.bf16.msra.mxu0 %v10086_v16 }
 0x43a   : > { %7491 = vmatpush1.bf16.msra.mxu1 %v10089_v59 }
 0x43b   : > { %7560 = vmatmul.mubr.bf16.vlgmr.msra.gmra.mxu0 %v10979_v40  ;;  %7492 = vmatprep.subr.bf16.mxu1 %v10094_v31  ;;  %v10107_v40 = vld [vmem:[#allocation10 + $0xac8] ss:$16 sps:$4 sm:$0xff]  }
 0x43e   : > { %7493 = vmatpush1.bf16.msra.mxu1 %v10092_v49 }
 0x43f   : > { %7494 = vmatprep.subr.bf16.mxu1 %v10097_v42 }
 0x442   : > { %7495 = vmatpush1.bf16.msra.mxu1 %v10095_v47 }
 0x443   : > { %7496 = vmatprep.subr.bf16.mxu1 %v10100_v2 }
 0x446   : > { %7497 = vmatpush1.bf16.msra.mxu1 %v10098_v22 }
 0x447   : > { %7498 = vmatprep.subr.bf16.mxu1 %v10103_v50 }
 0x44a   : > { %7499 = vmatpush1.bf16.msra.mxu1 %v10101_v30 }
 0x44b   : > { %7500 = vmatprep.subr.bf16.mxu1 %v10106_v6 }
 0x44e   : > { %7501 = vmatpush2.bf16.msra.mxu1 %v10104_v33 }
 0x44f   : > { %7502 = vmatprep.subr.bf16.mxu1 %v10109_v1 }
 0x452   : > { %7503 = vmatpush2.bf16.msra.mxu1 %v10107_v40 }
 0x453   : > { %7504 = vmatprep.subr.bf16.mxu1 %v10112_v27 }
 0x456   : > { %7505 = vmatpush2.bf16.msra.mxu1 %v10110_v35 }
 0x457   : > { %7506 = vmatprep.subr.bf16.mxu1 %v10115_v51 }
 0x45a   : > { %7507 = vmatpush2.bf16.msra.mxu1 %v10113_v54 }
 0x45b   : > { %7508 = vmatprep.subr.bf16.mxu1 %v10118_v58 }
 0x45d   : > { %v6271_v13 = vpop.f32.mrf.mxu1 }
 0x45e   : > { %7509 = vmatpush2.bf16.msra.mxu1 %v10116_v25 }
 0x45f   : > { %7510 = vmatprep.subr.bf16.mxu1 %v10121_v39  ;;  %v6273_v16 = vpop.f32.mrf.mxu1 }
 0x461   : > { %v6275_v59 = vpop.f32.mrf.mxu1 }
 0x462   : > { %7511 = vmatpush2.bf16.msra.mxu1 %v10119_v4 }
 0x463   : > { %7512 = vmatprep.subr.bf16.mxu1 %v10124_v41  ;;  %v6277_v42 = vpop.f32.mrf.mxu1 }
 0x466   : > { %7513 = vmatpush2.bf16.msra.mxu1 %v10122_v56 }
 0x467   : > { %7514 = vmatprep.subr.bf16.mxu1 %v10127_v29 }
 0x46a   : > { %7515 = vmatpush2.bf16.msra.mxu1 %v10125_v34 }
 0x46b   : > { %7578 = vmatprep.subr.bf16.mxu1 %v10130_v10 }
 0x46d   : > { %7517 = vmatmul.mubr.bf16.vlgmr.msra.gmra.mxu1 %v10929_v21  ;;  %v6232_v21 = vpop.f32.mrf.mxu0 }
 0x46e   : > { %7579 = vmatpush1.bf16.msra.mxu1 %v10128_v8  ;;  %7602 = vmatprep.mubr.bf16.mxu1 %v10369_v0  ;;  %v5290_v8 = vadd.f32 %v11028_v28, %v11008_v5 }
 0x46f   : > { %7580 = vmatprep.subr.bf16.mxu1 %v10133_v55  ;;  %v6234_v36 = vpop.f32.mrf.mxu0 }
 0x471   : > { %v6314_v15 = vpop.f32.mrf.mxu0 }
 0x472   : > { %7581 = vmatpush1.bf16.msra.mxu1 %v10131_v48  ;;  %v5292_v48 = vadd.f32 %v11032_v61, %v11010_v14  ;;  %v7621_v14 = vld [vmem:[#allocation12] sm:$0xf] }
 0x473   : > { %7582 = vmatprep.subr.bf16.mxu1 %v10136_v11  ;;  %v6316_v0 = vpop.f32.mrf.mxu0 }
 0x475   : > { %v11051_v26 = vpop.f32.mrf.mxu0 }
 0x476   : > { %7583 = vmatpush1.bf16.msra.mxu1 %v10134_v43 }
 0x477   : > { %7584 = vmatprep.subr.bf16.mxu1 %v10139_v12  ;;  %v11053_v31 = vpop.f32.mrf.mxu0  ;;  %v5333_v12 = vadd.f32 %v11022_v24, %v5290_v8 }
 0x479   : > { %v6400_v49 = vpop.f32.mrf.mxu0 }
 0x47a   : > { %7585 = vmatpush1.bf16.msra.mxu1 %v10137_v57  ;;  %v5294_v57 = vadd.f32 %v11034_v7, %v11012_v37 }
 0x47b   : > { %v6402_v47 = vpop.f32.mrf.mxu0 }
 0x47c   : > { %v5337_v5 = vadd.f32 %v11030_v32, %v5294_v57 }
 0x47d   : > { %8722 = vmatmul.mubr.msk.bf16.vlgmr.msra.gmra.mxu1 %vm1563_vm0, %v11015_v18  ;;  %v6404_v6 = vpop.f32.mrf.mxu0 }
 0x47f   : > { %v6406_v54 = vpop.f32.mrf.mxu0 }
 0x49d   : > { %v6357_v2 = vpop.f32.mrf.mxu1 }
 0x49e   : > { %v6358_v22 = vadd.f32 %v6357_v2, %v11036_v3  ;;  %v6231_v2 = vadd.f32 %v6230_v52, %v5333_v12 }
 0x49f   : > { %v6359_v50 = vpop.f32.mrf.mxu1 }
 0x4a0   : > { %v6360_v18 = vadd.f32 %v6359_v50, %v11038_v60  ;;  %v6401_v30 = vadd.f32 %v6400_v49, %v6358_v22  ;;  %v6274_v22 = vadd.f32 %v6273_v16, %v6231_v2  ;;  %v7634_v2 = vrot.slane %v7621_v14, %v3991_v45 }
 0x4a1   : > { %v6361_v33 = vpop.f32.mrf.mxu1 }
 0x4a2   : > { %v6362_v1 = vadd.f32 %v6361_v33, %v11040_v62  ;;  %v6403_v40 = vadd.f32 %v6402_v47, %v6360_v18  ;;  %v5335_v47 = vadd.f32 %v11026_v19, %v5292_v48  ;;  %v6235_v18 = vadd.f32 %v6234_v36, %v5337_v5 }
 0x4a3   : > { %v6363_v27 = vpop.f32.mrf.mxu1  ;;  %v7626_v19 = vrot.slane %v7621_v14, %v3983_v23  ;;  %v6317_v7 = vadd.f32 %v6316_v0, %v6274_v22  ;;  %v7630_v36 = vrot.slane %v7621_v14, %v3987_v17  ;;  %v10147_v17 = vld [vmem:[%s10552_s15 + $0x8] sm:$0xff]  ;;  %v7638_v22 = vrot.slane %v7621_v14, %v3995_v53  ;;  %v10151_v53 = vld [vmem:[%s10552_s15 + $0x18] sm:$0xff] }
 0x4a4   : > { %v6364_v35 = vadd.f32 %v6363_v27, %v11042_v9  ;;  %v6405_v51 = vadd.f32 %v6404_v6, %v6362_v1  ;;  %v5288_v9 = vadd.f32 %v11024_v44, %v11002_v46  ;;  %v6233_v28 = vadd.f32 %v6232_v21, %v5335_v47 }
 0x4a6   : > { %v6407_v58 = vadd.f32 %v6406_v54, %v6364_v35  ;;  %v5331_v43 = vadd.f32 %v11017_v38, %v5288_v9  ;;  %v6276_v38 = vadd.f32 %v6275_v59, %v6233_v28 }
 0x4a8   : > { %v6229_v49 = vadd.f32 %v6228_v63, %v5331_v43  ;;  %v6278_v63 = vadd.f32 %v6277_v42, %v6235_v18  ;;  %v6319_v16 = vadd.f32 %v11051_v26, %v6276_v38  ;;  %v10146_v42 = vld [vmem:[%s10552_s15] sm:$0xff] }
 0x4aa   : > { %v6272_v44 = vadd.f32 %v6271_v13, %v6229_v49  ;;  %v6321_v0 = vadd.f32 %v11053_v31, %v6278_v63  ;;  %v10148_v31 = vld [vmem:[%s10552_s15 + $0x20] sm:$0xff] }
 0x4ab   : > { %v7389_v62 = vpop.f32.mrf.mxu0 }
 0x4ac   : > { %v6315_v6 = vadd.f32 %v6314_v15, %v6272_v44 }
 0x4ad   : > { %v6443_v25 = vpop.f32.mrf.mxu1  ;;  %v7391_v34 = vpop.f32.mrf.mxu0 }
 0x4ae   : > { %v11059_v39 = vadd.f32 %v6443_v25, %v6401_v30 }
 0x4af   : > { %v6445_v4 = vpop.f32.mrf.mxu1  ;;  %v7393_v10 = vpop.f32.mrf.mxu0 }
 0x4b0   : > { %v11061_v3 = vadd.f32 %v6445_v4, %v6403_v40 }
 0x4b1   : > { %v6447_v41 = vpop.f32.mrf.mxu1  ;;  %v7395_v55 = vpop.f32.mrf.mxu0 }
 0x4b2   : > { %v11063_v60 = vadd.f32 %v6447_v41, %v6405_v51 }
 0x4b3   : > { %v6449_v56 = vpop.f32.mrf.mxu1 }
 0x4b4   : > { %v11065_v29 = vadd.f32 %v6449_v56, %v6407_v58 }
 0x4bb   : > { %v7475_v11 = vpop.f32.mrf.mxu0 }
 0x4bd   : > { %v7477_v46 = vpop.f32.mrf.mxu0 }
 0x4bf   : > { %v7479_v24 = vpop.f32.mrf.mxu0 }
 0x4c1   : > { %v7481_v59 = vpop.f32.mrf.mxu0 }
 0x4ed   : > { %v7432_v50 = vpop.f32.mrf.mxu1 }
 0x4ee   : > { %v7433_v61 = vadd.f32 %v7432_v50, %v7389_v62  ;;  %v10149_v62 = vld [vmem:[%s10552_s15 + $0x28] sm:$0xff] }
 0x4ef   : > { %v7434_v30 = vpop.f32.mrf.mxu1 }
 0x4f0   : > { %v7435_v33 = vadd.f32 %v7434_v30, %v7391_v34  ;;  %v7476_v37 = vadd.f32 %v7475_v11, %v7433_v61 }
 0x4f1   : > { %v7436_v52 = vpop.f32.mrf.mxu1 }
 0x4f2   : > { %v7613_v32 = vadd.f32 %v7476_v37, %v6315_v6  ;;  %v7437_v21 = vadd.f32 %v7436_v52, %v7393_v10  ;;  %v7478_v13 = vadd.f32 %v7477_v46, %v7435_v33  ;;  %v10150_v6 = vld [vmem:[%s10552_s15 + $0x10] sm:$0xff] }
 0x4f3   : > { %v7438_v15 = vpop.f32.mrf.mxu1 }
 0x4f4   : > { %v7643_v1 = vadd.f32 %v7626_v19, %v7613_v32  ;;  %v7614_v40 = vadd.f32 %v7478_v13, %v6317_v7  ;;  %v7439_v23 = vadd.f32 %v7438_v15, %v7395_v55  ;;  %v7480_v27 = vadd.f32 %v7479_v24, %v7437_v21 }
 0x4f6   : > { %v7651_v35 = vadd.f32 %v10146_v42, %v7643_v1  ;;  %v7644_v51 = vadd.f32 %v7630_v36, %v7614_v40  ;;  %v7617_v54 = vadd.f32 %v7480_v27, %v6319_v16  ;;  %v7482_v58 = vadd.f32 %v7481_v59, %v7439_v23 }
 0x4f8   : > { %7659 = vst [vmem:[%s11088_s24] sm:$0xff] %v7651_v35  ;;  %v7652_v26 = vadd.f32 %v10147_v17, %v7644_v51  ;;  %v7647_v25 = vadd.f32 %v7626_v19, %v7617_v54  ;;  %v7618_v4 = vadd.f32 %v7482_v58, %v6321_v0 }
 0x4fa   : > { %7660 = vst [vmem:[%s11088_s24 + $0x8] sm:$0xff] %v7652_v26  ;;  %v7655_v41 = vadd.f32 %v10148_v31, %v7647_v25  ;;  %v7648_v56 = vadd.f32 %v7630_v36, %v7618_v4 }
 0x4fb   : > { %v7561_v8 = vpop.f32.mrf.mxu0 }
 0x4fc   : > { %7663 = vst [vmem:[%s11088_s24 + $0x20] sm:$0xff] %v7655_v41  ;;  %v7656_v34 = vadd.f32 %v10149_v62, %v7648_v56 }
 0x4fd   : > { %v7563_v48 = vpop.f32.mrf.mxu0 }
 0x4fe   : > { %7664 = vst [vmem:[%s11088_s24 + $0x28] sm:$0xff] %v7656_v34 }
 0x4ff   : > { %v7565_v12 = vpop.f32.mrf.mxu0 }
 0x501   : > { %v7567_v50 = vpop.f32.mrf.mxu0 }
 0x52d   : > { %v7518_v10 = vpop.f32.mrf.mxu1 }
 0x52e   : > { %v7562_v43 = vadd.f32 %v7561_v8, %v7518_v10 }
 0x52f   : > { %v7520_v9 = vpop.f32.mrf.mxu1 }
 0x530   : > { %v7564_v49 = vadd.f32 %v7563_v48, %v7520_v9 }
 0x531   : > { %v7522_v55 = vpop.f32.mrf.mxu1 }
 0x532   : > { %v7566_v44 = vadd.f32 %v7565_v12, %v7522_v55 }
 0x533   : > { %v7524_v11 = vpop.f32.mrf.mxu1 }
 0x534   : > { %v7568_v18 = vadd.f32 %v7567_v50, %v7524_v11 }
 0x53d   : > { %v7604_v57 = vpop.f32.mrf.mxu1 }
 0x53e   : > { %v7605_v47 = vadd.f32 %v7604_v57, %v7562_v43 }
 0x53f   : > { %v7606_v46 = vpop.f32.mrf.mxu1 }
 0x540   : > { %v7615_v5 = vadd.f32 %v7605_v47, %v11059_v39  ;;  %v7607_v28 = vadd.f32 %v7606_v46, %v7564_v49 }
 0x541   : > { %v7608_v61 = vpop.f32.mrf.mxu1 }
 0x542   : > { %v7645_v38 = vadd.f32 %v7634_v2, %v7615_v5  ;;  %v7616_v30 = vadd.f32 %v7607_v28, %v11061_v3  ;;  %v7609_v45 = vadd.f32 %v7608_v61, %v7566_v44  ;;  %v10152_v3 = vld [vmem:[%s10552_s15 + $0x30] sm:$0xff] }
 0x543   : > { %v7610_v24 = vpop.f32.mrf.mxu1 }
 0x544   : > { %v7653_v33 = vadd.f32 %v10150_v6, %v7645_v38  ;;  %v7646_v39 = vadd.f32 %v7638_v22, %v7616_v30  ;;  %v7619_v37 = vadd.f32 %v7609_v45, %v11063_v60  ;;  %v7611_v20 = vadd.f32 %v7610_v24, %v7568_v18  ;;  %v10153_v60 = vld [vmem:[%s10552_s15 + $0x38] sm:$0xff] }
 0x546   : > { %7661 = vst [vmem:[%s11088_s24 + $0x10] sm:$0xff] %v7653_v33  ;;  %v7654_v14 = vadd.f32 %v10151_v53, %v7646_v39  ;;  %v7649_v19 = vadd.f32 %v7634_v2, %v7619_v37  ;;  %v7620_v7 = vadd.f32 %v7611_v20, %v11065_v29 }
 0x548   : > { %7662 = vst [vmem:[%s11088_s24 + $0x18] sm:$0xff] %v7654_v14  ;;  %v7657_v63 = vadd.f32 %v10152_v3, %v7649_v19  ;;  %v7650_v52 = vadd.f32 %v7638_v22, %v7620_v7 }
 0x54a   : > { %7665 = vst [vmem:[%s11088_s24 + $0x30] sm:$0xff] %v7657_v63  ;;  %v7658_v29 = vadd.f32 %v10153_v60, %v7650_v52 }
 0x54c   : > { %7666 = vst [vmem:[%s11088_s24 + $0x38] sm:$0xff] %v7658_v29 }
 0x54d   : > { %10299 = shalt.err (!%p10296_p10)
}
 0x54e   : > { %s10300_s7 = scalar_lea.hbm %s11115_s6, 1024  ;;  %s10304_s14 = scalar_lea.hbm %s11168_s5, 2048 }
 0x54f   : > { %p10301_p3 = scmp.ne.s32.totalorder %s11115_s6, %s10300_s7  ;;  %p10305_p11 = scmp.lt.s32.totalorder %s11115_s6, %s11168_s5 }
 0x550   : > { %p10306_p4 = scmp.lt.s32.totalorder %s10304_s14, %s10300_s7 }
 0x551   : > { %p10302_p8 = pnand %p10301_p3, %p11208_p1 }
 0x552   : > { %p10307_p7 = por %p10306_p4, %p10305_p11 }
 0x553   : > { %p10303_p2 = pneg %p10302_p8 }
 0x555   : > { %p10308_p12 = pnand %p10307_p7, %p10303_p2 }
 0x557   : > { %10311 = shalt.err (!%p10308_p12)
}
 0x558   : > { %s10371_s26 = smov 512   ;;  %s10372_s28 = smov 32  }
 0x559   : > { %8756 = dma.vmem_to_hbm [thread:$0]  (%p11208_p1), %s11117_s23, 1024, %s11115_s6, %s7668_s22, %s10371_s26, %s10371_s26, %s10372_s28  }
 0x55a PF: > { %s7696_s30 = sand.u32 1, %s10346_s18   ;;  %p11209_p9 = scmp.ne.s32.totalorder %s11174_s25, 0 }
 0x55b   : > { %p11210_p13 = scmp.ge.s32.totalorder %s10358_s21, 2  ;;  %s7697_s13 = scalar_lea.sflag [#allocation6], %s7696_s30 }
 0x55d   : > { %p8776_p6 = pnand %p11210_p13, %p11209_p9 }
 0x55f   : > { %p8777_p0 = pneg %p8776_p6 }
 0x561   : > { %10341 = dma.done.wait (%p8777_p0), %s7697_s13, 1024  }
 0x562   : > { %10343 = vsyncadd (%p8777_p0), %s7697_s13, 4294966272  ;;  %p20_p5 = scmp.ge.s32.totalorder %s10491_s8, 4   ;;  %s11211_s18 = smov %s10350_s19 }
 0x563   : > { %s11212_s19 = smov %s10354_s20  ;;  %s11213_s20 = smov %s10507_s12 }
 0x564   : > { %s11214_s21 = smov %s10491_s8  ;;  %22 = sbr.rel (!%p20_p5) target bundleno = 7 (0x7), region = 105 }
 0x569   :  { %7702 = vsyncpa [#allocation5], 1 }
 0x56a   :  { %7704 = vsyncpa [#allocation5 + $0x1], 1 }
 0x56b   :  { %7705 = vsyncpa [#allocation8], 1 }
 0x56c   :  { %7706 = vsyncpa [#allocation11], 1 }
 0x56d   :  { %7707 = vsyncpa [#allocation6], 1 }
 0x56e   :  { %7709 = vsyncpa [#allocation6 + $0x1], 1 }

</bundles_post_ra>
